<compile_context>
chip_gen: v7x
topology: tpu7x:2x2x1
jax: 0.10.0
libtpu: 0.0.40
codegen_flags: <defaults>
</compile_context>

<pallas_src>
import jax
import jax.numpy as jnp
from jax import lax
from jax.experimental import pallas as pl
from jax.experimental.pallas import tpu as pltpu


# ----------------------------------------------------------------------------
# Fused Pallas kernel: whole SlotAttention forward for B_BLK batch elements
# ----------------------------------------------------------------------------

def _make_slot_attention_kernel(b_blk, n, n_s, n_it, d, scale, eps, ln_eps=1e-5):

    def kernel(inp_ref, slots_ref,
               wq_ref, wkv_ref,
               wih_ref, whh_ref, bih_ref, bhh_ref,
               w1_ref, b1_ref, w2_ref, b2_ref,
               gin_ref, bin_ref, gsl_ref, bsl_ref, gff_ref, bff_ref,
               slots_out_ref, attns_out_ref,
               upd_ref):

        f32 = jnp.float32
        bf16 = jnp.bfloat16

        def ln(x, g, bb):                         # LayerNorm in f32 (VPU/XLU)
            mu = jnp.mean(x, axis=-1, keepdims=True)
            xc = x - mu
            var = jnp.mean(xc * xc, axis=-1, keepdims=True)
            return xc * lax.rsqrt(var + ln_eps) * g + bb

        def recip(x):                             # EUP approximate reciprocal
            return pl.reciprocal(x, approx=True)

        def sigmoid(t):                           # exp + vrcp, both EUP
            return recip(1.0 + jnp.exp(-t))

        # ---- loop-invariant loads, hoisted out of the unrolled iteration loop ----
        wq = wq_ref[...]                          # bf16 (d, d)
        w_ih = wih_ref[...]                       # bf16 (d, 3d)
        w_hh = whh_ref[...]                       # bf16 (d, 3d)
        b_ih = bih_ref[...]                       # f32  (1, 3d)
        b_hh = bhh_ref[...]
        w1 = w1_ref[...]                          # bf16 (d, hidden)
        b1 = b1_ref[...]
        w2 = w2_ref[...]                          # bf16 (hidden, d)
        b2 = b2_ref[...]
        g_sl, b_sl = gsl_ref[...], bsl_ref[...]
        g_ff, b_ff = gff_ref[...], bff_ref[...]

        # ---- norm_input + fused k/v projection (batch collapsed into M dim) ------
        x = ln(inp_ref[...], gin_ref[...], bin_ref[...])            # (b_blk*n, d) f32
        kv = jnp.dot(x.astype(bf16), wkv_ref[...],
                     preferred_element_type=f32)                    # (b_blk*n, 2d)
        k_bf = kv[:, 0:d].astype(bf16)                              # (b_blk*n, d)
        v_bf = kv[:, d:2 * d].astype(bf16)

        slots = slots_ref[...]                                      # (b_blk*n_s, d) f32

        # iters is small & fixed -> static unroll.
        # TODO(synk): switch to lax.fori_loop(..., unroll=True) if n_it ever grows.
        for it in range(n_it):
            slots_prev = slots

            # q projection batched over every batch element in this block.
            q_bf = jnp.dot(ln(slots, g_sl, b_sl).astype(bf16), wq,
                           preferred_element_type=f32).astype(bf16)  # (b_blk*n_s, d)

            # Attention must stay per-batch (batches may not mix): tiny static loop.
            for bi in range(b_blk):
                q_b = q_bf[bi * n_s:(bi + 1) * n_s, :]               # (n_s, d)
                k_b = k_bf[bi * n:(bi + 1) * n, :]                   # (n, d)
                v_b = v_bf[bi * n:(bi + 1) * n, :]
                dots = lax.dot_general(
                    q_b, k_b, (((1,), (1,)), ((), ())),
                    preferred_element_type=f32) * scale              # (n_s, n)
                # softmax over the SLOT axis (torch dim=1), then +eps (stored attn)
                dots = dots - jnp.max(dots, axis=0, keepdims=True)
                e = jnp.exp(dots)
                attn = e * recip(jnp.sum(e, axis=0, keepdims=True)) + eps
                attns_out_ref[bi, it] = attn
                # renormalize over the input axis, weighted mean of v
                attn_w = attn * recip(jnp.sum(attn, axis=1, keepdims=True))
                upd_ref[bi * n_s:(bi + 1) * n_s, :] = jnp.dot(
                    attn_w.astype(bf16), v_b, preferred_element_type=f32)

            updates = upd_ref[...]                                   # (b_blk*n_s, d)

            # GRUCell(updates, slots_prev); gates packed [r | z | n]; both gate
            # matmuls batched over b_blk*n_s rows.
            gi = jnp.dot(updates.astype(bf16), w_ih,
                         preferred_element_type=f32) + b_ih
            gh = jnp.dot(slots_prev.astype(bf16), w_hh,
                         preferred_element_type=f32) + b_hh
            r = sigmoid(gi[:, 0:d] + gh[:, 0:d])
            z = sigmoid(gi[:, d:2 * d] + gh[:, d:2 * d])
            cand = jnp.tanh(gi[:, 2 * d:3 * d] + r * gh[:, 2 * d:3 * d])
            slots = (1.0 - z) * cand + z * slots_prev

            # residual MLP: slots += W2 @ relu(W1 @ LN(slots) + b1) + b2
            ff = ln(slots, g_ff, b_ff)
            h = jnp.maximum(
                jnp.dot(ff.astype(bf16), w1, preferred_element_type=f32) + b1, 0.0)
            slots = slots + jnp.dot(h.astype(bf16), w2,
                                    preferred_element_type=f32) + b2

        slots_out_ref[...] = slots

    return kernel


def _pick_batch_block(b, n, n_s):
    """Largest batch block that keeps >=2 grid steps (v7x megacore) and keeps every
    block's sublane extent a multiple of 8 (f32 (8,128) tiling rule); else whole
    batch in one step (full-array blocks are exempt from the tiling rule)."""
    for blk in range(b // 2, 0, -1):
        if b % blk == 0 and (blk * n_s) % 8 == 0 and (blk * n) % 8 == 0:
            return blk
    return b


def slot_attention_forward(params, inputs, slots_init, n_it, eps):
    """Run the fused SlotAttention kernel. Returns (slots (b,n_s,d), [attn]*n_it)."""
    b, n, d = inputs.shape
    n_s = slots_init.shape[1]
    scale = float(d) ** (-0.5)
    b_blk = _pick_batch_block(b, n, n_s)
    n_steps = b // b_blk

    # Fused (d, 2d) k/v weight: a 256-wide RHS exactly fills a v6e/v7x MXU tile.
    wkv = jnp.concatenate([params['wk'], params['wv']], axis=1)     # bf16 (d, 2d)
    p_list = [
        params['wq'], wkv,
        params['w_ih'], params['w_hh'], params['b_ih'], params['b_hh'],
        params['w1'], params['b1'], params['w2'], params['b2'],
        params['g_in'], params['b_in'],
        params['g_sl'], params['b_sl'],
        params['g_ff'], params['b_ff'],
    ]

    # Collapse batch into the row (M) dimension for the weight-stationary matmuls.
    inputs2 = inputs.reshape(b * n, d).astype(jnp.float32)
    slots2 = slots_init.reshape(b * n_s, d).astype(jnp.float32)

    def bcast_spec(arr):
        nd = arr.ndim
        return pl.BlockSpec(arr.shape, lambda i, _nd=nd: (0,) * _nd)

    in_specs = ([pl.BlockSpec((b_blk * n, d), lambda i: (i, 0)),      # inputs (2D)
                 pl.BlockSpec((b_blk * n_s, d), lambda i: (i, 0))]    # slots  (2D)
                + [bcast_spec(p) for p in p_list])                    # weights (shared)
    out_specs = (pl.BlockSpec((b_blk * n_s, d), lambda i: (i, 0)),            # slots
                 pl.BlockSpec((b_blk, n_it, n_s, n), lambda i: (i, 0, 0, 0)))  # attns
    out_shape = (jax.ShapeDtypeStruct((b * n_s, d), jnp.float32),
                 jax.ShapeDtypeStruct((b, n_it, n_s, n), jnp.float32))

    kernel = _make_slot_attention_kernel(b_blk, n, n_s, n_it, d, scale, eps)
    slots_out, attns = pl.pallas_call(
        kernel,
        grid=(n_steps,),
        in_specs=in_specs,
        out_specs=out_specs,
        out_shape=out_shape,
        scratch_shapes=[pltpu.VMEM((b_blk * n_s, d), jnp.float32)],  # per-batch updates
        compiler_params=pltpu.CompilerParams(
            dimension_semantics=("parallel",)),      # v7x: 2 TCs split the grid
    )(inputs2, slots2, *p_list)

    slots_out = slots_out.reshape(b, n_s, d)
    return slots_out, [attns[:, t] for t in range(n_it)]


# ----------------------------------------------------------------------------
# Parameter setup (deterministic, in-script)
# ----------------------------------------------------------------------------

def _uniform(key, shape, bound):
    return jax.random.uniform(key, shape, jnp.float32, -bound, bound)


def init_slot_attention_params(key, dim, hidden_dim):
    ks = jax.random.split(key, 14)
    lin_b = 1.0 / float(dim) ** 0.5
    hid_b = 1.0 / float(hidden_dim) ** 0.5
    bf16 = jnp.bfloat16
    params = dict(
        slots_mu=jnp.zeros((1, 1, dim), jnp.float32),
        slots_sigma=jnp.ones((1, 1, dim), jnp.float32),
        # matmul weights stored bf16 (MXU-native on v5e/v6e/v7x, halves weight DMA)
        wq=_uniform(ks[0], (dim, dim), lin_b).astype(bf16),
        wk=_uniform(ks[1], (dim, dim), lin_b).astype(bf16),
        wv=_uniform(ks[2], (dim, dim), lin_b).astype(bf16),
        # GRUCell: gates packed [r | z | n] along the 3*dim output axis
        w_ih=_uniform(ks[3], (dim, 3 * dim), lin_b).astype(bf16),
        w_hh=_uniform(ks[4], (dim, 3 * dim), lin_b).astype(bf16),
        b_ih=_uniform(ks[5], (1, 3 * dim), lin_b),
        b_hh=_uniform(ks[6], (1, 3 * dim), lin_b),
        # mlp: Linear(dim, hidden) -> ReLU -> Linear(hidden, dim)
        w1=_uniform(ks[7], (dim, hidden_dim), lin_b).astype(bf16),
        b1=_uniform(ks[8], (1, hidden_dim), lin_b),
        w2=_uniform(ks[9], (hidden_dim, dim), hid_b).astype(bf16),
        b2=_uniform(ks[10], (1, dim), hid_b),
        # LayerNorm affine params (perturbed from 1/0 so the check exercises them)
        g_in=1.0 + 0.1 * _uniform(ks[11], (1, dim), 1.0),
        b_in=0.1 * _uniform(ks[11], (1, dim), 1.0),
        g_sl=1.0 + 0.1 * _uniform(ks[12], (1, dim), 1.0),
        b_sl=0.1 * _uniform(ks[12], (1, dim), 1.0),
        g_ff=1.0 + 0.1 * _uniform(ks[13], (1, dim), 1.0),
        b_ff=0.1 * _uniform(ks[13], (1, dim), 1.0),
    )
    return params


class SlotAttention:
    """JAX/Pallas port of SlotAttention.forward (single fused TPU kernel)."""

    def __init__(self, num_slots, dim, iters=3, eps=1e-8, hidden_dim=128, *, key):
        self.num_slots = num_slots
        self.dim = dim
        self.iters = iters
        self.eps = eps
        self.params = init_slot_attention_params(key, dim, hidden_dim)

    def forward(self, inputs, *, slots_init=None, noise_key=None,
                num_slots=None, num_iters=None):
        b, n, d = inputs.shape
        n_s = num_slots if num_slots is not None else self.num_slots
        n_it = num_iters if num_iters is not None else self.iters
        if slots_init is None:
            # TODO(synk): torch.randn_like slot noise is generated host-side with
            # jax.random.normal (bit-identical RNG with torch is not possible).
            assert noise_key is not None
            mu = jnp.broadcast_to(self.params['slots_mu'], (b, n_s, d))
            sigma = jnp.broadcast_to(self.params['slots_sigma'], (b, n_s, d))
            slots_init = mu + jax.random.normal(noise_key, (b, n_s, d),
                                                jnp.float32) * sigma
        return slot_attention_forward(self.params, inputs.astype(jnp.float32),
                                      slots_init.astype(jnp.float32), n_it, self.eps)


# ----------------------------------------------------------------------------
# Pure-JAX f32 reference (matches PyTorch semantics; weights upcast from bf16)
# ----------------------------------------------------------------------------

def _layernorm_ref(x, g, b, eps=1e-5):
    mu = x.mean(axis=-1, keepdims=True)
    xc = x - mu
    var = (xc * xc).mean(axis=-1, keepdims=True)
    return xc * jax.lax.rsqrt(var + eps) * g + b


def ref_forward(params, inputs, slots_init, n_it, eps=1e-8):
    f32 = jnp.float32
    b, n, d = inputs.shape
    scale = float(d) ** (-0.5)
    sigmoid = lambda t: 1.0 / (1.0 + jnp.exp(-t))
    wq, wk, wv = (params['wq'].astype(f32), params['wk'].astype(f32),
                  params['wv'].astype(f32))
    w_ih, w_hh = params['w_ih'].astype(f32), params['w_hh'].astype(f32)
    w1, w2 = params['w1'].astype(f32), params['w2'].astype(f32)

    x = _layernorm_ref(inputs, params['g_in'], params['b_in'])
    k = x @ wk
    v = x @ wv
    slots = slots_init
    attns = []
    for _ in range(n_it):
        slots_prev = slots
        q = _layernorm_ref(slots, params['g_sl'], params['b_sl']) @ wq
        dots = jnp.einsum('bid,bjd->bij', q, k) * scale
        attn = jax.nn.softmax(dots, axis=1) + eps
        attns.append(attn)
        attn_w = attn / attn.sum(axis=-1, keepdims=True)
        updates = jnp.einsum('bjd,bij->bid', v, attn_w)
        n_s = slots.shape[1]
        u2 = updates.reshape(b * n_s, d)
        h2 = slots_prev.reshape(b * n_s, d)
        gi = u2 @ w_ih + params['b_ih']
        gh = h2 @ w_hh + params['b_hh']
        r = sigmoid(gi[:, :d] + gh[:, :d])
        z = sigmoid(gi[:, d:2 * d] + gh[:, d:2 * d])
        cand = jnp.tanh(gi[:, 2 * d:] + r * gh[:, 2 * d:])
        slots = ((1.0 - z) * cand + z * h2).reshape(b, n_s, d)
        ff = _layernorm_ref(slots, params['g_ff'], params['b_ff'])
        h = jnp.maximum(ff @ w1 + params['b1'], 0.0)
        slots = slots + h @ w2 + params['b2']
    return slots, attns


# ----------------------------------------------------------------------------
# Demo / self-check
# ----------------------------------------------------------------------------

if __name__ == "__main__":
    key = jax.random.PRNGKey(0)
    k_param, k_x, k_noise = jax.random.split(key, 3)

    B, N, D = 8, 16, 128          # batch, num input tokens, feature dim (lane-dense)
    NUM_SLOTS, ITERS, HIDDEN = 4, 3, 128
    # -> batch block = 4, grid = (2,) : two balanced "parallel" steps (v7x megacore)

    model = SlotAttention(NUM_SLOTS, D, iters=ITERS, eps=1e-8,
                          hidden_dim=HIDDEN, key=k_param)
    inputs = jax.random.normal(k_x, (B, N, D), jnp.float32)

    # Deterministic slot initialization, shared with the reference.
    noise = jax.random.normal(k_noise, (B, NUM_SLOTS, D), jnp.float32)
    slots_init = (jnp.broadcast_to(model.params['slots_mu'], (B, NUM_SLOTS, D))
                  + noise * jnp.broadcast_to(model.params['slots_sigma'],
                                             (B, NUM_SLOTS, D)))

    slots, attns = model.forward(inputs, slots_init=slots_init)
    slots = jax.block_until_ready(slots)

    ref_slots, ref_attns = ref_forward(model.params, inputs, slots_init, ITERS)

    assert slots.shape == (B, NUM_SLOTS, D)
    assert len(attns) == ITERS and attns[0].shape == (B, NUM_SLOTS, N)

    # bf16 matmul operands (f32 accumulation) vs. a pure-f32 reference -> bf16-level
    # tolerance across 3 chained iterations.
    TOL = 5e-2
    ok = bool(jnp.allclose(slots, ref_slots, atol=TOL, rtol=TOL))
    for a, ra in zip(attns, ref_attns):
        ok = ok and bool(jnp.allclose(a, ra, atol=TOL, rtol=TOL))

    if ok:
        print("KERNEL_OK")
</pallas_src>

<mosaic_0001>
module attributes {stable_mosaic.version = 11 : i64} {
  func.func @kernel(%arg0: i32, %arg1: memref<64x128xf32, #tpu.memory_space<vmem>>, %arg2: memref<16x128xf32, #tpu.memory_space<vmem>>, %arg3: memref<128x128xbf16, #tpu.memory_space<vmem>>, %arg4: memref<128x256xbf16, #tpu.memory_space<vmem>>, %arg5: memref<128x384xbf16, #tpu.memory_space<vmem>>, %arg6: memref<128x384xbf16, #tpu.memory_space<vmem>>, %arg7: memref<1x384xf32, #tpu.memory_space<vmem>>, %arg8: memref<1x384xf32, #tpu.memory_space<vmem>>, %arg9: memref<128x128xbf16, #tpu.memory_space<vmem>>, %arg10: memref<1x128xf32, #tpu.memory_space<vmem>>, %arg11: memref<128x128xbf16, #tpu.memory_space<vmem>>, %arg12: memref<1x128xf32, #tpu.memory_space<vmem>>, %arg13: memref<1x128xf32, #tpu.memory_space<vmem>>, %arg14: memref<1x128xf32, #tpu.memory_space<vmem>>, %arg15: memref<1x128xf32, #tpu.memory_space<vmem>>, %arg16: memref<1x128xf32, #tpu.memory_space<vmem>>, %arg17: memref<1x128xf32, #tpu.memory_space<vmem>>, %arg18: memref<1x128xf32, #tpu.memory_space<vmem>>, %arg19: memref<16x128xf32, #tpu.memory_space<vmem>>, %arg20: memref<4x3x4x16xf32, #tpu.memory_space<vmem>>, %arg21: memref<16x128xf32, #tpu.memory_space<vmem>>) attributes {dimension_semantics = [#tpu.dimension_semantics<parallel>], iteration_bounds = array<i64: 2>, scalar_prefetch = 0 : i64, scratch_operands = 1 : i64, tpu.core_type = #tpu.core_type<tc>, window_params = [{transform_indices = @transform_0, window_bounds = array<i64: 64, 128>}, {transform_indices = @transform_1, window_bounds = array<i64: 16, 128>}, {pipeline_mode = #tpu.pipeline_mode<synchronous>, transform_indices = @transform_2, window_bounds = array<i64: 128, 128>}, {pipeline_mode = #tpu.pipeline_mode<synchronous>, transform_indices = @transform_3, window_bounds = array<i64: 128, 256>}, {pipeline_mode = #tpu.pipeline_mode<synchronous>, transform_indices = @transform_4, window_bounds = array<i64: 128, 384>}, {pipeline_mode = #tpu.pipeline_mode<synchronous>, transform_indices = @transform_5, window_bounds = array<i64: 128, 384>}, {pipeline_mode = #tpu.pipeline_mode<synchronous>, transform_indices = @transform_6, window_bounds = array<i64: 1, 384>}, {pipeline_mode = #tpu.pipeline_mode<synchronous>, transform_indices = @transform_7, window_bounds = array<i64: 1, 384>}, {pipeline_mode = #tpu.pipeline_mode<synchronous>, transform_indices = @transform_8, window_bounds = array<i64: 128, 128>}, {pipeline_mode = #tpu.pipeline_mode<synchronous>, transform_indices = @transform_9, window_bounds = array<i64: 1, 128>}, {pipeline_mode = #tpu.pipeline_mode<synchronous>, transform_indices = @transform_10, window_bounds = array<i64: 128, 128>}, {pipeline_mode = #tpu.pipeline_mode<synchronous>, transform_indices = @transform_11, window_bounds = array<i64: 1, 128>}, {pipeline_mode = #tpu.pipeline_mode<synchronous>, transform_indices = @transform_12, window_bounds = array<i64: 1, 128>}, {pipeline_mode = #tpu.pipeline_mode<synchronous>, transform_indices = @transform_13, window_bounds = array<i64: 1, 128>}, {pipeline_mode = #tpu.pipeline_mode<synchronous>, transform_indices = @transform_14, window_bounds = array<i64: 1, 128>}, {pipeline_mode = #tpu.pipeline_mode<synchronous>, transform_indices = @transform_15, window_bounds = array<i64: 1, 128>}, {pipeline_mode = #tpu.pipeline_mode<synchronous>, transform_indices = @transform_16, window_bounds = array<i64: 1, 128>}, {pipeline_mode = #tpu.pipeline_mode<synchronous>, transform_indices = @transform_17, window_bounds = array<i64: 1, 128>}, {transform_indices = @transform_18, window_bounds = array<i64: 16, 128>}, {transform_indices = @transform_19, window_bounds = array<i64: 4, 3, 4, 16>}]} {
    %c0 = arith.constant 0 : index
    %c0_0 = arith.constant 0 : index
    %0 = vector.load %arg3[%c0, %c0_0] : memref<128x128xbf16, #tpu.memory_space<vmem>>, vector<128x128xbf16>
    %c0_1 = arith.constant 0 : index
    %c0_2 = arith.constant 0 : index
    %1 = vector.load %arg5[%c0_1, %c0_2] : memref<128x384xbf16, #tpu.memory_space<vmem>>, vector<128x384xbf16>
    %c0_3 = arith.constant 0 : index
    %c0_4 = arith.constant 0 : index
    %2 = vector.load %arg6[%c0_3, %c0_4] : memref<128x384xbf16, #tpu.memory_space<vmem>>, vector<128x384xbf16>
    %c0_5 = arith.constant 0 : index
    %c0_6 = arith.constant 0 : index
    %3 = vector.load %arg7[%c0_5, %c0_6] : memref<1x384xf32, #tpu.memory_space<vmem>>, vector<1x384xf32>
    %c0_7 = arith.constant 0 : index
    %c0_8 = arith.constant 0 : index
    %4 = vector.load %arg8[%c0_7, %c0_8] : memref<1x384xf32, #tpu.memory_space<vmem>>, vector<1x384xf32>
    %c0_9 = arith.constant 0 : index
    %c0_10 = arith.constant 0 : index
    %5 = vector.load %arg9[%c0_9, %c0_10] : memref<128x128xbf16, #tpu.memory_space<vmem>>, vector<128x128xbf16>
    %c0_11 = arith.constant 0 : index
    %c0_12 = arith.constant 0 : index
    %6 = vector.load %arg10[%c0_11, %c0_12] : memref<1x128xf32, #tpu.memory_space<vmem>>, vector<1x128xf32>
    %c0_13 = arith.constant 0 : index
    %c0_14 = arith.constant 0 : index
    %7 = vector.load %arg11[%c0_13, %c0_14] : memref<128x128xbf16, #tpu.memory_space<vmem>>, vector<128x128xbf16>
    %c0_15 = arith.constant 0 : index
    %c0_16 = arith.constant 0 : index
    %8 = vector.load %arg12[%c0_15, %c0_16] : memref<1x128xf32, #tpu.memory_space<vmem>>, vector<1x128xf32>
    %c0_17 = arith.constant 0 : index
    %c0_18 = arith.constant 0 : index
    %9 = vector.load %arg15[%c0_17, %c0_18] : memref<1x128xf32, #tpu.memory_space<vmem>>, vector<1x128xf32>
    %c0_19 = arith.constant 0 : index
    %c0_20 = arith.constant 0 : index
    %10 = vector.load %arg16[%c0_19, %c0_20] : memref<1x128xf32, #tpu.memory_space<vmem>>, vector<1x128xf32>
    %c0_21 = arith.constant 0 : index
    %c0_22 = arith.constant 0 : index
    %11 = vector.load %arg17[%c0_21, %c0_22] : memref<1x128xf32, #tpu.memory_space<vmem>>, vector<1x128xf32>
    %c0_23 = arith.constant 0 : index
    %c0_24 = arith.constant 0 : index
    %12 = vector.load %arg18[%c0_23, %c0_24] : memref<1x128xf32, #tpu.memory_space<vmem>>, vector<1x128xf32>
    %c0_25 = arith.constant 0 : index
    %c0_26 = arith.constant 0 : index
    %13 = vector.load %arg1[%c0_25, %c0_26] : memref<64x128xf32, #tpu.memory_space<vmem>>, vector<64x128xf32>
    %c0_27 = arith.constant 0 : index
    %c0_28 = arith.constant 0 : index
    %14 = vector.load %arg13[%c0_27, %c0_28] : memref<1x128xf32, #tpu.memory_space<vmem>>, vector<1x128xf32>
    %c0_29 = arith.constant 0 : index
    %c0_30 = arith.constant 0 : index
    %15 = vector.load %arg14[%c0_29, %c0_30] : memref<1x128xf32, #tpu.memory_space<vmem>>, vector<1x128xf32>
    %cst = arith.constant dense<0.000000e+00> : vector<64xf32>
    %16 = vector.multi_reduction <add>, %13, %cst [1] : vector<64x128xf32> to vector<64xf32>
    %17 = vector.shape_cast %16 : vector<64xf32> to vector<64x1xf32>
    %cst_31 = arith.constant 1.280000e+02 : f32
    %18 = vector.broadcast %cst_31 : f32 to vector<64x1xf32>
    %19 = arith.divf %17, %18 : vector<64x1xf32>
    %20 = vector.broadcast %19 : vector<64x1xf32> to vector<64x128xf32>
    %21 = arith.subf %13, %20 : vector<64x128xf32>
    %22 = arith.mulf %21, %21 : vector<64x128xf32>
    %cst_32 = arith.constant dense<0.000000e+00> : vector<64xf32>
    %23 = vector.multi_reduction <add>, %22, %cst_32 [1] : vector<64x128xf32> to vector<64xf32>
    %24 = vector.shape_cast %23 : vector<64xf32> to vector<64x1xf32>
    %cst_33 = arith.constant 1.280000e+02 : f32
    %25 = vector.broadcast %cst_33 : f32 to vector<64x1xf32>
    %26 = arith.divf %24, %25 : vector<64x1xf32>
    %cst_34 = arith.constant 9.99999974E-6 : f32
    %27 = vector.broadcast %cst_34 : f32 to vector<64x1xf32>
    %28 = arith.addf %26, %27 : vector<64x1xf32>
    %29 = math.rsqrt %28 : vector<64x1xf32>
    %30 = vector.broadcast %29 : vector<64x1xf32> to vector<64x128xf32>
    %31 = arith.mulf %21, %30 : vector<64x128xf32>
    %32 = vector.broadcast %14 : vector<1x128xf32> to vector<64x128xf32>
    %33 = arith.mulf %31, %32 : vector<64x128xf32>
    %34 = vector.broadcast %15 : vector<1x128xf32> to vector<64x128xf32>
    %35 = arith.addf %33, %34 : vector<64x128xf32>
    %36 = arith.truncf %35 : vector<64x128xf32> to vector<64x128xbf16>
    %c0_35 = arith.constant 0 : index
    %c0_36 = arith.constant 0 : index
    %37 = vector.load %arg4[%c0_35, %c0_36] : memref<128x256xbf16, #tpu.memory_space<vmem>>, vector<128x256xbf16>
    %cst_37 = arith.constant dense<0.000000e+00> : vector<64x256xf32>
    %38 = tpu.matmul %36, %37, %cst_37 {dimension_numbers = #tpu.dot_dimension_numbers<[1], [0], [0], [1], [0, 0, 1, 1], [], []>} : vector<64x128xbf16>, vector<128x256xbf16>, vector<64x256xf32> -> vector<64x256xf32>
    %39 = vector.extract_strided_slice %38 {offsets = [0, 0], sizes = [64, 128], strides = [1, 1]} : vector<64x256xf32> to vector<64x128xf32>
    %40 = arith.truncf %39 : vector<64x128xf32> to vector<64x128xbf16>
    %41 = vector.extract_strided_slice %38 {offsets = [0, 128], sizes = [64, 128], strides = [1, 1]} : vector<64x256xf32> to vector<64x128xf32>
    %42 = arith.truncf %41 : vector<64x128xf32> to vector<64x128xbf16>
    %c0_38 = arith.constant 0 : index
    %c0_39 = arith.constant 0 : index
    %43 = vector.load %arg2[%c0_38, %c0_39] : memref<16x128xf32, #tpu.memory_space<vmem>>, vector<16x128xf32>
    %cst_40 = arith.constant dense<0.000000e+00> : vector<16xf32>
    %44 = vector.multi_reduction <add>, %43, %cst_40 [1] : vector<16x128xf32> to vector<16xf32>
    %45 = vector.shape_cast %44 : vector<16xf32> to vector<16x1xf32>
    %cst_41 = arith.constant 1.280000e+02 : f32
    %46 = vector.broadcast %cst_41 : f32 to vector<16x1xf32>
    %47 = arith.divf %45, %46 : vector<16x1xf32>
    %48 = vector.broadcast %47 : vector<16x1xf32> to vector<16x128xf32>
    %49 = arith.subf %43, %48 : vector<16x128xf32>
    %50 = arith.mulf %49, %49 : vector<16x128xf32>
    %cst_42 = arith.constant dense<0.000000e+00> : vector<16xf32>
    %51 = vector.multi_reduction <add>, %50, %cst_42 [1] : vector<16x128xf32> to vector<16xf32>
    %52 = vector.shape_cast %51 : vector<16xf32> to vector<16x1xf32>
    %cst_43 = arith.constant 1.280000e+02 : f32
    %53 = vector.broadcast %cst_43 : f32 to vector<16x1xf32>
    %54 = arith.divf %52, %53 : vector<16x1xf32>
    %cst_44 = arith.constant 9.99999974E-6 : f32
    %55 = vector.broadcast %cst_44 : f32 to vector<16x1xf32>
    %56 = arith.addf %54, %55 : vector<16x1xf32>
    %57 = math.rsqrt %56 : vector<16x1xf32>
    %58 = vector.broadcast %57 : vector<16x1xf32> to vector<16x128xf32>
    %59 = arith.mulf %49, %58 : vector<16x128xf32>
    %60 = vector.broadcast %9 : vector<1x128xf32> to vector<16x128xf32>
    %61 = arith.mulf %59, %60 : vector<16x128xf32>
    %62 = vector.broadcast %10 : vector<1x128xf32> to vector<16x128xf32>
    %63 = arith.addf %61, %62 : vector<16x128xf32>
    %64 = arith.truncf %63 : vector<16x128xf32> to vector<16x128xbf16>
    %cst_45 = arith.constant dense<0.000000e+00> : vector<16x128xf32>
    %65 = tpu.matmul %64, %0, %cst_45 {dimension_numbers = #tpu.dot_dimension_numbers<[1], [0], [0], [1], [0, 0, 1, 1], [], []>} : vector<16x128xbf16>, vector<128x128xbf16>, vector<16x128xf32> -> vector<16x128xf32>
    %66 = arith.truncf %65 : vector<16x128xf32> to vector<16x128xbf16>
    %67 = vector.extract_strided_slice %66 {offsets = [0, 0], sizes = [4, 128], strides = [1, 1]} : vector<16x128xbf16> to vector<4x128xbf16>
    %68 = vector.extract_strided_slice %40 {offsets = [0, 0], sizes = [16, 128], strides = [1, 1]} : vector<64x128xbf16> to vector<16x128xbf16>
    %69 = vector.extract_strided_slice %42 {offsets = [0, 0], sizes = [16, 128], strides = [1, 1]} : vector<64x128xbf16> to vector<16x128xbf16>
    %cst_46 = arith.constant dense<0.000000e+00> : vector<4x16xf32>
    %70 = tpu.matmul %67, %68, %cst_46 {dimension_numbers = #tpu.dot_dimension_numbers<[1], [1], [0], [0], [0, 0, 1, 0], [], []>} : vector<4x128xbf16>, vector<16x128xbf16>, vector<4x16xf32> -> vector<4x16xf32>
    %cst_47 = arith.constant 0.0883883461 : f32
    %71 = vector.broadcast %cst_47 : f32 to vector<4x16xf32>
    %72 = arith.mulf %70, %71 : vector<4x16xf32>
    %cst_48 = arith.constant dense<0xFF800000> : vector<16xf32>
    %73 = vector.multi_reduction <maximumf>, %72, %cst_48 [0] : vector<4x16xf32> to vector<16xf32>
    %74 = vector.shape_cast %73 : vector<16xf32> to vector<1x16xf32>
    %75 = vector.broadcast %74 : vector<1x16xf32> to vector<4x16xf32>
    %76 = arith.subf %72, %75 : vector<4x16xf32>
    %77 = math.exp %76 : vector<4x16xf32>
    %cst_49 = arith.constant dense<0.000000e+00> : vector<16xf32>
    %78 = vector.multi_reduction <add>, %77, %cst_49 [0] : vector<4x16xf32> to vector<16xf32>
    %79 = vector.shape_cast %78 : vector<16xf32> to vector<1x16xf32>
    %80 = tpu.reciprocal %79 {approx = true} : vector<1x16xf32> -> vector<1x16xf32>
    %81 = vector.broadcast %80 : vector<1x16xf32> to vector<4x16xf32>
    %82 = arith.mulf %77, %81 : vector<4x16xf32>
    %cst_50 = arith.constant 9.99999993E-9 : f32
    %83 = vector.broadcast %cst_50 : f32 to vector<4x16xf32>
    %84 = arith.addf %82, %83 : vector<4x16xf32>
    %c0_51 = arith.constant 0 : index
    %c0_52 = arith.constant 0 : index
    %c0_53 = arith.constant 0 : index
    %c0_54 = arith.constant 0 : index
    %85 = vector.load %arg20[%c0_51, %c0_52, %c0_53, %c0_54] : memref<4x3x4x16xf32, #tpu.memory_space<vmem>>, vector<1x1x4x16xf32>
    %86 = vector.shape_cast %85 : vector<1x1x4x16xf32> to vector<4x16xf32>
    %87 = vector.shape_cast %84 : vector<4x16xf32> to vector<1x1x4x16xf32>
    tpu.vector_store %arg20[%c0_51, %c0_52, %c0_53, %c0_54], %87 {strides = array<i32>} : memref<4x3x4x16xf32, #tpu.memory_space<vmem>>, vector<1x1x4x16xf32>,
    %cst_55 = arith.constant dense<0.000000e+00> : vector<4xf32>
    %88 = vector.multi_reduction <add>, %84, %cst_55 [1] : vector<4x16xf32> to vector<4xf32>
    %89 = vector.shape_cast %88 : vector<4xf32> to vector<4x1xf32>
    %90 = tpu.reciprocal %89 {approx = true} : vector<4x1xf32> -> vector<4x1xf32>
    %91 = vector.broadcast %90 : vector<4x1xf32> to vector<4x16xf32>
    %92 = arith.mulf %84, %91 : vector<4x16xf32>
    %93 = arith.truncf %92 : vector<4x16xf32> to vector<4x16xbf16>
    %cst_56 = arith.constant dense<0.000000e+00> : vector<4x128xf32>
    %94 = tpu.matmul %93, %69, %cst_56 {dimension_numbers = #tpu.dot_dimension_numbers<[1], [0], [0], [1], [0, 0, 1, 1], [], []>} : vector<4x16xbf16>, vector<16x128xbf16>, vector<4x128xf32> -> vector<4x128xf32>
    %c0_57 = arith.constant 0 : index
    %c0_58 = arith.constant 0 : index
    %95 = vector.load %arg21[%c0_57, %c0_58] : memref<16x128xf32, #tpu.memory_space<vmem>>, vector<4x128xf32>
    tpu.vector_store %arg21[%c0_57, %c0_58], %94 {strides = array<i32>} : memref<16x128xf32, #tpu.memory_space<vmem>>, vector<4x128xf32>,
    %96 = vector.extract_strided_slice %66 {offsets = [4, 0], sizes = [4, 128], strides = [1, 1]} : vector<16x128xbf16> to vector<4x128xbf16>
    %97 = vector.extract_strided_slice %40 {offsets = [16, 0], sizes = [16, 128], strides = [1, 1]} : vector<64x128xbf16> to vector<16x128xbf16>
    %98 = vector.extract_strided_slice %42 {offsets = [16, 0], sizes = [16, 128], strides = [1, 1]} : vector<64x128xbf16> to vector<16x128xbf16>
    %cst_59 = arith.constant dense<0.000000e+00> : vector<4x16xf32>
    %99 = tpu.matmul %96, %97, %cst_59 {dimension_numbers = #tpu.dot_dimension_numbers<[1], [1], [0], [0], [0, 0, 1, 0], [], []>} : vector<4x128xbf16>, vector<16x128xbf16>, vector<4x16xf32> -> vector<4x16xf32>
    %cst_60 = arith.constant 0.0883883461 : f32
    %100 = vector.broadcast %cst_60 : f32 to vector<4x16xf32>
    %101 = arith.mulf %99, %100 : vector<4x16xf32>
    %cst_61 = arith.constant dense<0xFF800000> : vector<16xf32>
    %102 = vector.multi_reduction <maximumf>, %101, %cst_61 [0] : vector<4x16xf32> to vector<16xf32>
    %103 = vector.shape_cast %102 : vector<16xf32> to vector<1x16xf32>
    %104 = vector.broadcast %103 : vector<1x16xf32> to vector<4x16xf32>
    %105 = arith.subf %101, %104 : vector<4x16xf32>
    %106 = math.exp %105 : vector<4x16xf32>
    %cst_62 = arith.constant dense<0.000000e+00> : vector<16xf32>
    %107 = vector.multi_reduction <add>, %106, %cst_62 [0] : vector<4x16xf32> to vector<16xf32>
    %108 = vector.shape_cast %107 : vector<16xf32> to vector<1x16xf32>
    %109 = tpu.reciprocal %108 {approx = true} : vector<1x16xf32> -> vector<1x16xf32>
    %110 = vector.broadcast %109 : vector<1x16xf32> to vector<4x16xf32>
    %111 = arith.mulf %106, %110 : vector<4x16xf32>
    %cst_63 = arith.constant 9.99999993E-9 : f32
    %112 = vector.broadcast %cst_63 : f32 to vector<4x16xf32>
    %113 = arith.addf %111, %112 : vector<4x16xf32>
    %c1 = arith.constant 1 : index
    %c0_64 = arith.constant 0 : index
    %c0_65 = arith.constant 0 : index
    %c0_66 = arith.constant 0 : index
    %114 = vector.load %arg20[%c1, %c0_64, %c0_65, %c0_66] : memref<4x3x4x16xf32, #tpu.memory_space<vmem>>, vector<1x1x4x16xf32>
    %115 = vector.shape_cast %114 : vector<1x1x4x16xf32> to vector<4x16xf32>
    %116 = vector.shape_cast %113 : vector<4x16xf32> to vector<1x1x4x16xf32>
    tpu.vector_store %arg20[%c1, %c0_64, %c0_65, %c0_66], %116 {strides = array<i32>} : memref<4x3x4x16xf32, #tpu.memory_space<vmem>>, vector<1x1x4x16xf32>,
    %cst_67 = arith.constant dense<0.000000e+00> : vector<4xf32>
    %117 = vector.multi_reduction <add>, %113, %cst_67 [1] : vector<4x16xf32> to vector<4xf32>
    %118 = vector.shape_cast %117 : vector<4xf32> to vector<4x1xf32>
    %119 = tpu.reciprocal %118 {approx = true} : vector<4x1xf32> -> vector<4x1xf32>
    %120 = vector.broadcast %119 : vector<4x1xf32> to vector<4x16xf32>
    %121 = arith.mulf %113, %120 : vector<4x16xf32>
    %122 = arith.truncf %121 : vector<4x16xf32> to vector<4x16xbf16>
    %cst_68 = arith.constant dense<0.000000e+00> : vector<4x128xf32>
    %123 = tpu.matmul %122, %98, %cst_68 {dimension_numbers = #tpu.dot_dimension_numbers<[1], [0], [0], [1], [0, 0, 1, 1], [], []>} : vector<4x16xbf16>, vector<16x128xbf16>, vector<4x128xf32> -> vector<4x128xf32>
    %c4 = arith.constant 4 : index
    %c0_69 = arith.constant 0 : index
    %124 = vector.load %arg21[%c4, %c0_69] : memref<16x128xf32, #tpu.memory_space<vmem>>, vector<4x128xf32>
    tpu.vector_store %arg21[%c4, %c0_69], %123 {strides = array<i32>} : memref<16x128xf32, #tpu.memory_space<vmem>>, vector<4x128xf32>,
    %125 = vector.extract_strided_slice %66 {offsets = [8, 0], sizes = [4, 128], strides = [1, 1]} : vector<16x128xbf16> to vector<4x128xbf16>
    %126 = vector.extract_strided_slice %40 {offsets = [32, 0], sizes = [16, 128], strides = [1, 1]} : vector<64x128xbf16> to vector<16x128xbf16>
    %127 = vector.extract_strided_slice %42 {offsets = [32, 0], sizes = [16, 128], strides = [1, 1]} : vector<64x128xbf16> to vector<16x128xbf16>
    %cst_70 = arith.constant dense<0.000000e+00> : vector<4x16xf32>
    %128 = tpu.matmul %125, %126, %cst_70 {dimension_numbers = #tpu.dot_dimension_numbers<[1], [1], [0], [0], [0, 0, 1, 0], [], []>} : vector<4x128xbf16>, vector<16x128xbf16>, vector<4x16xf32> -> vector<4x16xf32>
    %cst_71 = arith.constant 0.0883883461 : f32
    %129 = vector.broadcast %cst_71 : f32 to vector<4x16xf32>
    %130 = arith.mulf %128, %129 : vector<4x16xf32>
    %cst_72 = arith.constant dense<0xFF800000> : vector<16xf32>
    %131 = vector.multi_reduction <maximumf>, %130, %cst_72 [0] : vector<4x16xf32> to vector<16xf32>
    %132 = vector.shape_cast %131 : vector<16xf32> to vector<1x16xf32>
    %133 = vector.broadcast %132 : vector<1x16xf32> to vector<4x16xf32>
    %134 = arith.subf %130, %133 : vector<4x16xf32>
    %135 = math.exp %134 : vector<4x16xf32>
    %cst_73 = arith.constant dense<0.000000e+00> : vector<16xf32>
    %136 = vector.multi_reduction <add>, %135, %cst_73 [0] : vector<4x16xf32> to vector<16xf32>
    %137 = vector.shape_cast %136 : vector<16xf32> to vector<1x16xf32>
    %138 = tpu.reciprocal %137 {approx = true} : vector<1x16xf32> -> vector<1x16xf32>
    %139 = vector.broadcast %138 : vector<1x16xf32> to vector<4x16xf32>
    %140 = arith.mulf %135, %139 : vector<4x16xf32>
    %cst_74 = arith.constant 9.99999993E-9 : f32
    %141 = vector.broadcast %cst_74 : f32 to vector<4x16xf32>
    %142 = arith.addf %140, %141 : vector<4x16xf32>
    %c2 = arith.constant 2 : index
    %c0_75 = arith.constant 0 : index
    %c0_76 = arith.constant 0 : index
    %c0_77 = arith.constant 0 : index
    %143 = vector.load %arg20[%c2, %c0_75, %c0_76, %c0_77] : memref<4x3x4x16xf32, #tpu.memory_space<vmem>>, vector<1x1x4x16xf32>
    %144 = vector.shape_cast %143 : vector<1x1x4x16xf32> to vector<4x16xf32>
    %145 = vector.shape_cast %142 : vector<4x16xf32> to vector<1x1x4x16xf32>
    tpu.vector_store %arg20[%c2, %c0_75, %c0_76, %c0_77], %145 {strides = array<i32>} : memref<4x3x4x16xf32, #tpu.memory_space<vmem>>, vector<1x1x4x16xf32>,
    %cst_78 = arith.constant dense<0.000000e+00> : vector<4xf32>
    %146 = vector.multi_reduction <add>, %142, %cst_78 [1] : vector<4x16xf32> to vector<4xf32>
    %147 = vector.shape_cast %146 : vector<4xf32> to vector<4x1xf32>
    %148 = tpu.reciprocal %147 {approx = true} : vector<4x1xf32> -> vector<4x1xf32>
    %149 = vector.broadcast %148 : vector<4x1xf32> to vector<4x16xf32>
    %150 = arith.mulf %142, %149 : vector<4x16xf32>
    %151 = arith.truncf %150 : vector<4x16xf32> to vector<4x16xbf16>
    %cst_79 = arith.constant dense<0.000000e+00> : vector<4x128xf32>
    %152 = tpu.matmul %151, %127, %cst_79 {dimension_numbers = #tpu.dot_dimension_numbers<[1], [0], [0], [1], [0, 0, 1, 1], [], []>} : vector<4x16xbf16>, vector<16x128xbf16>, vector<4x128xf32> -> vector<4x128xf32>
    %c8 = arith.constant 8 : index
    %c0_80 = arith.constant 0 : index
    %153 = vector.load %arg21[%c8, %c0_80] : memref<16x128xf32, #tpu.memory_space<vmem>>, vector<4x128xf32>
    tpu.vector_store %arg21[%c8, %c0_80], %152 {strides = array<i32>} : memref<16x128xf32, #tpu.memory_space<vmem>>, vector<4x128xf32>,
    %154 = vector.extract_strided_slice %66 {offsets = [12, 0], sizes = [4, 128], strides = [1, 1]} : vector<16x128xbf16> to vector<4x128xbf16>
    %155 = vector.extract_strided_slice %40 {offsets = [48, 0], sizes = [16, 128], strides = [1, 1]} : vector<64x128xbf16> to vector<16x128xbf16>
    %156 = vector.extract_strided_slice %42 {offsets = [48, 0], sizes = [16, 128], strides = [1, 1]} : vector<64x128xbf16> to vector<16x128xbf16>
    %cst_81 = arith.constant dense<0.000000e+00> : vector<4x16xf32>
    %157 = tpu.matmul %154, %155, %cst_81 {dimension_numbers = #tpu.dot_dimension_numbers<[1], [1], [0], [0], [0, 0, 1, 0], [], []>} : vector<4x128xbf16>, vector<16x128xbf16>, vector<4x16xf32> -> vector<4x16xf32>
    %cst_82 = arith.constant 0.0883883461 : f32
    %158 = vector.broadcast %cst_82 : f32 to vector<4x16xf32>
    %159 = arith.mulf %157, %158 : vector<4x16xf32>
    %cst_83 = arith.constant dense<0xFF800000> : vector<16xf32>
    %160 = vector.multi_reduction <maximumf>, %159, %cst_83 [0] : vector<4x16xf32> to vector<16xf32>
    %161 = vector.shape_cast %160 : vector<16xf32> to vector<1x16xf32>
    %162 = vector.broadcast %161 : vector<1x16xf32> to vector<4x16xf32>
    %163 = arith.subf %159, %162 : vector<4x16xf32>
    %164 = math.exp %163 : vector<4x16xf32>
    %cst_84 = arith.constant dense<0.000000e+00> : vector<16xf32>
    %165 = vector.multi_reduction <add>, %164, %cst_84 [0] : vector<4x16xf32> to vector<16xf32>
    %166 = vector.shape_cast %165 : vector<16xf32> to vector<1x16xf32>
    %167 = tpu.reciprocal %166 {approx = true} : vector<1x16xf32> -> vector<1x16xf32>
    %168 = vector.broadcast %167 : vector<1x16xf32> to vector<4x16xf32>
    %169 = arith.mulf %164, %168 : vector<4x16xf32>
    %cst_85 = arith.constant 9.99999993E-9 : f32
    %170 = vector.broadcast %cst_85 : f32 to vector<4x16xf32>
    %171 = arith.addf %169, %170 : vector<4x16xf32>
    %c3 = arith.constant 3 : index
    %c0_86 = arith.constant 0 : index
    %c0_87 = arith.constant 0 : index
    %c0_88 = arith.constant 0 : index
    %172 = vector.load %arg20[%c3, %c0_86, %c0_87, %c0_88] : memref<4x3x4x16xf32, #tpu.memory_space<vmem>>, vector<1x1x4x16xf32>
    %173 = vector.shape_cast %172 : vector<1x1x4x16xf32> to vector<4x16xf32>
    %174 = vector.shape_cast %171 : vector<4x16xf32> to vector<1x1x4x16xf32>
    tpu.vector_store %arg20[%c3, %c0_86, %c0_87, %c0_88], %174 {strides = array<i32>} : memref<4x3x4x16xf32, #tpu.memory_space<vmem>>, vector<1x1x4x16xf32>,
    %cst_89 = arith.constant dense<0.000000e+00> : vector<4xf32>
    %175 = vector.multi_reduction <add>, %171, %cst_89 [1] : vector<4x16xf32> to vector<4xf32>
    %176 = vector.shape_cast %175 : vector<4xf32> to vector<4x1xf32>
    %177 = tpu.reciprocal %176 {approx = true} : vector<4x1xf32> -> vector<4x1xf32>
    %178 = vector.broadcast %177 : vector<4x1xf32> to vector<4x16xf32>
    %179 = arith.mulf %171, %178 : vector<4x16xf32>
    %180 = arith.truncf %179 : vector<4x16xf32> to vector<4x16xbf16>
    %cst_90 = arith.constant dense<0.000000e+00> : vector<4x128xf32>
    %181 = tpu.matmul %180, %156, %cst_90 {dimension_numbers = #tpu.dot_dimension_numbers<[1], [0], [0], [1], [0, 0, 1, 1], [], []>} : vector<4x16xbf16>, vector<16x128xbf16>, vector<4x128xf32> -> vector<4x128xf32>
    %c12 = arith.constant 12 : index
    %c0_91 = arith.constant 0 : index
    %182 = vector.load %arg21[%c12, %c0_91] : memref<16x128xf32, #tpu.memory_space<vmem>>, vector<4x128xf32>
    tpu.vector_store %arg21[%c12, %c0_91], %181 {strides = array<i32>} : memref<16x128xf32, #tpu.memory_space<vmem>>, vector<4x128xf32>,
    %c0_92 = arith.constant 0 : index
    %c0_93 = arith.constant 0 : index
    %183 = vector.load %arg21[%c0_92, %c0_93] : memref<16x128xf32, #tpu.memory_space<vmem>>, vector<16x128xf32>
    %184 = arith.truncf %183 : vector<16x128xf32> to vector<16x128xbf16>
    %cst_94 = arith.constant dense<0.000000e+00> : vector<16x384xf32>
    %185 = tpu.matmul %184, %1, %cst_94 {dimension_numbers = #tpu.dot_dimension_numbers<[1], [0], [0], [1], [0, 0, 1, 1], [], []>} : vector<16x128xbf16>, vector<128x384xbf16>, vector<16x384xf32> -> vector<16x384xf32>
    %186 = vector.broadcast %3 : vector<1x384xf32> to vector<16x384xf32>
    %187 = arith.addf %185, %186 : vector<16x384xf32>
    %188 = arith.truncf %43 : vector<16x128xf32> to vector<16x128xbf16>
    %cst_95 = arith.constant dense<0.000000e+00> : vector<16x384xf32>
    %189 = tpu.matmul %188, %2, %cst_95 {dimension_numbers = #tpu.dot_dimension_numbers<[1], [0], [0], [1], [0, 0, 1, 1], [], []>} : vector<16x128xbf16>, vector<128x384xbf16>, vector<16x384xf32> -> vector<16x384xf32>
    %190 = vector.broadcast %4 : vector<1x384xf32> to vector<16x384xf32>
    %191 = arith.addf %189, %190 : vector<16x384xf32>
    %192 = vector.extract_strided_slice %187 {offsets = [0, 0], sizes = [16, 128], strides = [1, 1]} : vector<16x384xf32> to vector<16x128xf32>
    %193 = vector.extract_strided_slice %191 {offsets = [0, 0], sizes = [16, 128], strides = [1, 1]} : vector<16x384xf32> to vector<16x128xf32>
    %194 = arith.addf %192, %193 : vector<16x128xf32>
    %cst_96 = arith.constant 0.000000e+00 : f32
    %195 = vector.broadcast %cst_96 : f32 to vector<16x128xf32>
    %196 = arith.subf %195, %194 : vector<16x128xf32>
    %197 = math.exp %196 : vector<16x128xf32>
    %cst_97 = arith.constant 1.000000e+00 : f32
    %198 = vector.broadcast %cst_97 : f32 to vector<16x128xf32>
    %199 = arith.addf %198, %197 : vector<16x128xf32>
    %200 = tpu.reciprocal %199 {approx = true} : vector<16x128xf32> -> vector<16x128xf32>
    %201 = vector.extract_strided_slice %187 {offsets = [0, 128], sizes = [16, 128], strides = [1, 1]} : vector<16x384xf32> to vector<16x128xf32>
    %202 = vector.extract_strided_slice %191 {offsets = [0, 128], sizes = [16, 128], strides = [1, 1]} : vector<16x384xf32> to vector<16x128xf32>
    %203 = arith.addf %201, %202 : vector<16x128xf32>
    %cst_98 = arith.constant 0.000000e+00 : f32
    %204 = vector.broadcast %cst_98 : f32 to vector<16x128xf32>
    %205 = arith.subf %204, %203 : vector<16x128xf32>
    %206 = math.exp %205 : vector<16x128xf32>
    %cst_99 = arith.constant 1.000000e+00 : f32
    %207 = vector.broadcast %cst_99 : f32 to vector<16x128xf32>
    %208 = arith.addf %207, %206 : vector<16x128xf32>
    %209 = tpu.reciprocal %208 {approx = true} : vector<16x128xf32> -> vector<16x128xf32>
    %210 = vector.extract_strided_slice %187 {offsets = [0, 256], sizes = [16, 128], strides = [1, 1]} : vector<16x384xf32> to vector<16x128xf32>
    %211 = vector.extract_strided_slice %191 {offsets = [0, 256], sizes = [16, 128], strides = [1, 1]} : vector<16x384xf32> to vector<16x128xf32>
    %212 = arith.mulf %200, %211 : vector<16x128xf32>
    %213 = arith.addf %210, %212 : vector<16x128xf32>
    %214 = math.tanh %213 : vector<16x128xf32>
    %cst_100 = arith.constant 1.000000e+00 : f32
    %215 = vector.broadcast %cst_100 : f32 to vector<16x128xf32>
    %216 = arith.subf %215, %209 : vector<16x128xf32>
    %217 = arith.mulf %216, %214 : vector<16x128xf32>
    %218 = arith.mulf %209, %43 : vector<16x128xf32>
    %219 = arith.addf %217, %218 : vector<16x128xf32>
    %cst_101 = arith.constant dense<0.000000e+00> : vector<16xf32>
    %220 = vector.multi_reduction <add>, %219, %cst_101 [1] : vector<16x128xf32> to vector<16xf32>
    %221 = vector.shape_cast %220 : vector<16xf32> to vector<16x1xf32>
    %cst_102 = arith.constant 1.280000e+02 : f32
    %222 = vector.broadcast %cst_102 : f32 to vector<16x1xf32>
    %223 = arith.divf %221, %222 : vector<16x1xf32>
    %224 = vector.broadcast %223 : vector<16x1xf32> to vector<16x128xf32>
    %225 = arith.subf %219, %224 : vector<16x128xf32>
    %226 = arith.mulf %225, %225 : vector<16x128xf32>
    %cst_103 = arith.constant dense<0.000000e+00> : vector<16xf32>
    %227 = vector.multi_reduction <add>, %226, %cst_103 [1] : vector<16x128xf32> to vector<16xf32>
    %228 = vector.shape_cast %227 : vector<16xf32> to vector<16x1xf32>
    %cst_104 = arith.constant 1.280000e+02 : f32
    %229 = vector.broadcast %cst_104 : f32 to vector<16x1xf32>
    %230 = arith.divf %228, %229 : vector<16x1xf32>
    %cst_105 = arith.constant 9.99999974E-6 : f32
    %231 = vector.broadcast %cst_105 : f32 to vector<16x1xf32>
    %232 = arith.addf %230, %231 : vector<16x1xf32>
    %233 = math.rsqrt %232 : vector<16x1xf32>
    %234 = vector.broadcast %233 : vector<16x1xf32> to vector<16x128xf32>
    %235 = arith.mulf %225, %234 : vector<16x128xf32>
    %236 = vector.broadcast %11 : vector<1x128xf32> to vector<16x128xf32>
    %237 = arith.mulf %235, %236 : vector<16x128xf32>
    %238 = vector.broadcast %12 : vector<1x128xf32> to vector<16x128xf32>
    %239 = arith.addf %237, %238 : vector<16x128xf32>
    %240 = arith.truncf %239 : vector<16x128xf32> to vector<16x128xbf16>
    %cst_106 = arith.constant dense<0.000000e+00> : vector<16x128xf32>
    %241 = tpu.matmul %240, %5, %cst_106 {dimension_numbers = #tpu.dot_dimension_numbers<[1], [0], [0], [1], [0, 0, 1, 1], [], []>} : vector<16x128xbf16>, vector<128x128xbf16>, vector<16x128xf32> -> vector<16x128xf32>
    %242 = vector.broadcast %6 : vector<1x128xf32> to vector<16x128xf32>
    %243 = arith.addf %241, %242 : vector<16x128xf32>
    %cst_107 = arith.constant 0.000000e+00 : f32
    %244 = vector.broadcast %cst_107 : f32 to vector<16x128xf32>
    %245 = arith.maximumf %243, %244 : vector<16x128xf32>
    %246 = arith.truncf %245 : vector<16x128xf32> to vector<16x128xbf16>
    %cst_108 = arith.constant dense<0.000000e+00> : vector<16x128xf32>
    %247 = tpu.matmul %246, %7, %cst_108 {dimension_numbers = #tpu.dot_dimension_numbers<[1], [0], [0], [1], [0, 0, 1, 1], [], []>} : vector<16x128xbf16>, vector<128x128xbf16>, vector<16x128xf32> -> vector<16x128xf32>
    %248 = arith.addf %219, %247 : vector<16x128xf32>
    %249 = vector.broadcast %8 : vector<1x128xf32> to vector<16x128xf32>
    %250 = arith.addf %248, %249 : vector<16x128xf32>
    %cst_109 = arith.constant dense<0.000000e+00> : vector<16xf32>
    %251 = vector.multi_reduction <add>, %250, %cst_109 [1] : vector<16x128xf32> to vector<16xf32>
    %252 = vector.shape_cast %251 : vector<16xf32> to vector<16x1xf32>
    %cst_110 = arith.constant 1.280000e+02 : f32
    %253 = vector.broadcast %cst_110 : f32 to vector<16x1xf32>
    %254 = arith.divf %252, %253 : vector<16x1xf32>
    %255 = vector.broadcast %254 : vector<16x1xf32> to vector<16x128xf32>
    %256 = arith.subf %250, %255 : vector<16x128xf32>
    %257 = arith.mulf %256, %256 : vector<16x128xf32>
    %cst_111 = arith.constant dense<0.000000e+00> : vector<16xf32>
    %258 = vector.multi_reduction <add>, %257, %cst_111 [1] : vector<16x128xf32> to vector<16xf32>
    %259 = vector.shape_cast %258 : vector<16xf32> to vector<16x1xf32>
    %cst_112 = arith.constant 1.280000e+02 : f32
    %260 = vector.broadcast %cst_112 : f32 to vector<16x1xf32>
    %261 = arith.divf %259, %260 : vector<16x1xf32>
    %cst_113 = arith.constant 9.99999974E-6 : f32
    %262 = vector.broadcast %cst_113 : f32 to vector<16x1xf32>
    %263 = arith.addf %261, %262 : vector<16x1xf32>
    %264 = math.rsqrt %263 : vector<16x1xf32>
    %265 = vector.broadcast %264 : vector<16x1xf32> to vector<16x128xf32>
    %266 = arith.mulf %256, %265 : vector<16x128xf32>
    %267 = vector.broadcast %9 : vector<1x128xf32> to vector<16x128xf32>
    %268 = arith.mulf %266, %267 : vector<16x128xf32>
    %269 = vector.broadcast %10 : vector<1x128xf32> to vector<16x128xf32>
    %270 = arith.addf %268, %269 : vector<16x128xf32>
    %271 = arith.truncf %270 : vector<16x128xf32> to vector<16x128xbf16>
    %cst_114 = arith.constant dense<0.000000e+00> : vector<16x128xf32>
    %272 = tpu.matmul %271, %0, %cst_114 {dimension_numbers = #tpu.dot_dimension_numbers<[1], [0], [0], [1], [0, 0, 1, 1], [], []>} : vector<16x128xbf16>, vector<128x128xbf16>, vector<16x128xf32> -> vector<16x128xf32>
    %273 = arith.truncf %272 : vector<16x128xf32> to vector<16x128xbf16>
    %274 = vector.extract_strided_slice %273 {offsets = [0, 0], sizes = [4, 128], strides = [1, 1]} : vector<16x128xbf16> to vector<4x128xbf16>
    %275 = vector.extract_strided_slice %40 {offsets = [0, 0], sizes = [16, 128], strides = [1, 1]} : vector<64x128xbf16> to vector<16x128xbf16>
    %276 = vector.extract_strided_slice %42 {offsets = [0, 0], sizes = [16, 128], strides = [1, 1]} : vector<64x128xbf16> to vector<16x128xbf16>
    %cst_115 = arith.constant dense<0.000000e+00> : vector<4x16xf32>
    %277 = tpu.matmul %274, %275, %cst_115 {dimension_numbers = #tpu.dot_dimension_numbers<[1], [1], [0], [0], [0, 0, 1, 0], [], []>} : vector<4x128xbf16>, vector<16x128xbf16>, vector<4x16xf32> -> vector<4x16xf32>
    %cst_116 = arith.constant 0.0883883461 : f32
    %278 = vector.broadcast %cst_116 : f32 to vector<4x16xf32>
    %279 = arith.mulf %277, %278 : vector<4x16xf32>
    %cst_117 = arith.constant dense<0xFF800000> : vector<16xf32>
    %280 = vector.multi_reduction <maximumf>, %279, %cst_117 [0] : vector<4x16xf32> to vector<16xf32>
    %281 = vector.shape_cast %280 : vector<16xf32> to vector<1x16xf32>
    %282 = vector.broadcast %281 : vector<1x16xf32> to vector<4x16xf32>
    %283 = arith.subf %279, %282 : vector<4x16xf32>
    %284 = math.exp %283 : vector<4x16xf32>
    %cst_118 = arith.constant dense<0.000000e+00> : vector<16xf32>
    %285 = vector.multi_reduction <add>, %284, %cst_118 [0] : vector<4x16xf32> to vector<16xf32>
    %286 = vector.shape_cast %285 : vector<16xf32> to vector<1x16xf32>
    %287 = tpu.reciprocal %286 {approx = true} : vector<1x16xf32> -> vector<1x16xf32>
    %288 = vector.broadcast %287 : vector<1x16xf32> to vector<4x16xf32>
    %289 = arith.mulf %284, %288 : vector<4x16xf32>
    %cst_119 = arith.constant 9.99999993E-9 : f32
    %290 = vector.broadcast %cst_119 : f32 to vector<4x16xf32>
    %291 = arith.addf %289, %290 : vector<4x16xf32>
    %c0_120 = arith.constant 0 : index
    %c1_121 = arith.constant 1 : index
    %c0_122 = arith.constant 0 : index
    %c0_123 = arith.constant 0 : index
    %292 = vector.load %arg20[%c0_120, %c1_121, %c0_122, %c0_123] : memref<4x3x4x16xf32, #tpu.memory_space<vmem>>, vector<1x1x4x16xf32>
    %293 = vector.shape_cast %292 : vector<1x1x4x16xf32> to vector<4x16xf32>
    %294 = vector.shape_cast %291 : vector<4x16xf32> to vector<1x1x4x16xf32>
    tpu.vector_store %arg20[%c0_120, %c1_121, %c0_122, %c0_123], %294 {strides = array<i32>} : memref<4x3x4x16xf32, #tpu.memory_space<vmem>>, vector<1x1x4x16xf32>,
    %cst_124 = arith.constant dense<0.000000e+00> : vector<4xf32>
    %295 = vector.multi_reduction <add>, %291, %cst_124 [1] : vector<4x16xf32> to vector<4xf32>
    %296 = vector.shape_cast %295 : vector<4xf32> to vector<4x1xf32>
    %297 = tpu.reciprocal %296 {approx = true} : vector<4x1xf32> -> vector<4x1xf32>
    %298 = vector.broadcast %297 : vector<4x1xf32> to vector<4x16xf32>
    %299 = arith.mulf %291, %298 : vector<4x16xf32>
    %300 = arith.truncf %299 : vector<4x16xf32> to vector<4x16xbf16>
    %cst_125 = arith.constant dense<0.000000e+00> : vector<4x128xf32>
    %301 = tpu.matmul %300, %276, %cst_125 {dimension_numbers = #tpu.dot_dimension_numbers<[1], [0], [0], [1], [0, 0, 1, 1], [], []>} : vector<4x16xbf16>, vector<16x128xbf16>, vector<4x128xf32> -> vector<4x128xf32>
    %c0_126 = arith.constant 0 : index
    %c0_127 = arith.constant 0 : index
    %302 = vector.load %arg21[%c0_126, %c0_127] : memref<16x128xf32, #tpu.memory_space<vmem>>, vector<4x128xf32>
    tpu.vector_store %arg21[%c0_126, %c0_127], %301 {strides = array<i32>} : memref<16x128xf32, #tpu.memory_space<vmem>>, vector<4x128xf32>,
    %303 = vector.extract_strided_slice %273 {offsets = [4, 0], sizes = [4, 128], strides = [1, 1]} : vector<16x128xbf16> to vector<4x128xbf16>
    %304 = vector.extract_strided_slice %40 {offsets = [16, 0], sizes = [16, 128], strides = [1, 1]} : vector<64x128xbf16> to vector<16x128xbf16>
    %305 = vector.extract_strided_slice %42 {offsets = [16, 0], sizes = [16, 128], strides = [1, 1]} : vector<64x128xbf16> to vector<16x128xbf16>
    %cst_128 = arith.constant dense<0.000000e+00> : vector<4x16xf32>
    %306 = tpu.matmul %303, %304, %cst_128 {dimension_numbers = #tpu.dot_dimension_numbers<[1], [1], [0], [0], [0, 0, 1, 0], [], []>} : vector<4x128xbf16>, vector<16x128xbf16>, vector<4x16xf32> -> vector<4x16xf32>
    %cst_129 = arith.constant 0.0883883461 : f32
    %307 = vector.broadcast %cst_129 : f32 to vector<4x16xf32>
    %308 = arith.mulf %306, %307 : vector<4x16xf32>
    %cst_130 = arith.constant dense<0xFF800000> : vector<16xf32>
    %309 = vector.multi_reduction <maximumf>, %308, %cst_130 [0] : vector<4x16xf32> to vector<16xf32>
    %310 = vector.shape_cast %309 : vector<16xf32> to vector<1x16xf32>
    %311 = vector.broadcast %310 : vector<1x16xf32> to vector<4x16xf32>
    %312 = arith.subf %308, %311 : vector<4x16xf32>
    %313 = math.exp %312 : vector<4x16xf32>
    %cst_131 = arith.constant dense<0.000000e+00> : vector<16xf32>
    %314 = vector.multi_reduction <add>, %313, %cst_131 [0] : vector<4x16xf32> to vector<16xf32>
    %315 = vector.shape_cast %314 : vector<16xf32> to vector<1x16xf32>
    %316 = tpu.reciprocal %315 {approx = true} : vector<1x16xf32> -> vector<1x16xf32>
    %317 = vector.broadcast %316 : vector<1x16xf32> to vector<4x16xf32>
    %318 = arith.mulf %313, %317 : vector<4x16xf32>
    %cst_132 = arith.constant 9.99999993E-9 : f32
    %319 = vector.broadcast %cst_132 : f32 to vector<4x16xf32>
    %320 = arith.addf %318, %319 : vector<4x16xf32>
    %c1_133 = arith.constant 1 : index
    %c1_134 = arith.constant 1 : index
    %c0_135 = arith.constant 0 : index
    %c0_136 = arith.constant 0 : index
    %321 = vector.load %arg20[%c1_133, %c1_134, %c0_135, %c0_136] : memref<4x3x4x16xf32, #tpu.memory_space<vmem>>, vector<1x1x4x16xf32>
    %322 = vector.shape_cast %321 : vector<1x1x4x16xf32> to vector<4x16xf32>
    %323 = vector.shape_cast %320 : vector<4x16xf32> to vector<1x1x4x16xf32>
    tpu.vector_store %arg20[%c1_133, %c1_134, %c0_135, %c0_136], %323 {strides = array<i32>} : memref<4x3x4x16xf32, #tpu.memory_space<vmem>>, vector<1x1x4x16xf32>,
    %cst_137 = arith.constant dense<0.000000e+00> : vector<4xf32>
    %324 = vector.multi_reduction <add>, %320, %cst_137 [1] : vector<4x16xf32> to vector<4xf32>
    %325 = vector.shape_cast %324 : vector<4xf32> to vector<4x1xf32>
    %326 = tpu.reciprocal %325 {approx = true} : vector<4x1xf32> -> vector<4x1xf32>
    %327 = vector.broadcast %326 : vector<4x1xf32> to vector<4x16xf32>
    %328 = arith.mulf %320, %327 : vector<4x16xf32>
    %329 = arith.truncf %328 : vector<4x16xf32> to vector<4x16xbf16>
    %cst_138 = arith.constant dense<0.000000e+00> : vector<4x128xf32>
    %330 = tpu.matmul %329, %305, %cst_138 {dimension_numbers = #tpu.dot_dimension_numbers<[1], [0], [0], [1], [0, 0, 1, 1], [], []>} : vector<4x16xbf16>, vector<16x128xbf16>, vector<4x128xf32> -> vector<4x128xf32>
    %c4_139 = arith.constant 4 : index
    %c0_140 = arith.constant 0 : index
    %331 = vector.load %arg21[%c4_139, %c0_140] : memref<16x128xf32, #tpu.memory_space<vmem>>, vector<4x128xf32>
    tpu.vector_store %arg21[%c4_139, %c0_140], %330 {strides = array<i32>} : memref<16x128xf32, #tpu.memory_space<vmem>>, vector<4x128xf32>,
    %332 = vector.extract_strided_slice %273 {offsets = [8, 0], sizes = [4, 128], strides = [1, 1]} : vector<16x128xbf16> to vector<4x128xbf16>
    %333 = vector.extract_strided_slice %40 {offsets = [32, 0], sizes = [16, 128], strides = [1, 1]} : vector<64x128xbf16> to vector<16x128xbf16>
    %334 = vector.extract_strided_slice %42 {offsets = [32, 0], sizes = [16, 128], strides = [1, 1]} : vector<64x128xbf16> to vector<16x128xbf16>
    %cst_141 = arith.constant dense<0.000000e+00> : vector<4x16xf32>
    %335 = tpu.matmul %332, %333, %cst_141 {dimension_numbers = #tpu.dot_dimension_numbers<[1], [1], [0], [0], [0, 0, 1, 0], [], []>} : vector<4x128xbf16>, vector<16x128xbf16>, vector<4x16xf32> -> vector<4x16xf32>
    %cst_142 = arith.constant 0.0883883461 : f32
    %336 = vector.broadcast %cst_142 : f32 to vector<4x16xf32>
    %337 = arith.mulf %335, %336 : vector<4x16xf32>
    %cst_143 = arith.constant dense<0xFF800000> : vector<16xf32>
    %338 = vector.multi_reduction <maximumf>, %337, %cst_143 [0] : vector<4x16xf32> to vector<16xf32>
    %339 = vector.shape_cast %338 : vector<16xf32> to vector<1x16xf32>
    %340 = vector.broadcast %339 : vector<1x16xf32> to vector<4x16xf32>
    %341 = arith.subf %337, %340 : vector<4x16xf32>
    %342 = math.exp %341 : vector<4x16xf32>
    %cst_144 = arith.constant dense<0.000000e+00> : vector<16xf32>
    %343 = vector.multi_reduction <add>, %342, %cst_144 [0] : vector<4x16xf32> to vector<16xf32>
    %344 = vector.shape_cast %343 : vector<16xf32> to vector<1x16xf32>
    %345 = tpu.reciprocal %344 {approx = true} : vector<1x16xf32> -> vector<1x16xf32>
    %346 = vector.broadcast %345 : vector<1x16xf32> to vector<4x16xf32>
    %347 = arith.mulf %342, %346 : vector<4x16xf32>
    %cst_145 = arith.constant 9.99999993E-9 : f32
    %348 = vector.broadcast %cst_145 : f32 to vector<4x16xf32>
    %349 = arith.addf %347, %348 : vector<4x16xf32>
    %c2_146 = arith.constant 2 : index
    %c1_147 = arith.constant 1 : index
    %c0_148 = arith.constant 0 : index
    %c0_149 = arith.constant 0 : index
    %350 = vector.load %arg20[%c2_146, %c1_147, %c0_148, %c0_149] : memref<4x3x4x16xf32, #tpu.memory_space<vmem>>, vector<1x1x4x16xf32>
    %351 = vector.shape_cast %350 : vector<1x1x4x16xf32> to vector<4x16xf32>
    %352 = vector.shape_cast %349 : vector<4x16xf32> to vector<1x1x4x16xf32>
    tpu.vector_store %arg20[%c2_146, %c1_147, %c0_148, %c0_149], %352 {strides = array<i32>} : memref<4x3x4x16xf32, #tpu.memory_space<vmem>>, vector<1x1x4x16xf32>,
    %cst_150 = arith.constant dense<0.000000e+00> : vector<4xf32>
    %353 = vector.multi_reduction <add>, %349, %cst_150 [1] : vector<4x16xf32> to vector<4xf32>
    %354 = vector.shape_cast %353 : vector<4xf32> to vector<4x1xf32>
    %355 = tpu.reciprocal %354 {approx = true} : vector<4x1xf32> -> vector<4x1xf32>
    %356 = vector.broadcast %355 : vector<4x1xf32> to vector<4x16xf32>
    %357 = arith.mulf %349, %356 : vector<4x16xf32>
    %358 = arith.truncf %357 : vector<4x16xf32> to vector<4x16xbf16>
    %cst_151 = arith.constant dense<0.000000e+00> : vector<4x128xf32>
    %359 = tpu.matmul %358, %334, %cst_151 {dimension_numbers = #tpu.dot_dimension_numbers<[1], [0], [0], [1], [0, 0, 1, 1], [], []>} : vector<4x16xbf16>, vector<16x128xbf16>, vector<4x128xf32> -> vector<4x128xf32>
    %c8_152 = arith.constant 8 : index
    %c0_153 = arith.constant 0 : index
    %360 = vector.load %arg21[%c8_152, %c0_153] : memref<16x128xf32, #tpu.memory_space<vmem>>, vector<4x128xf32>
    tpu.vector_store %arg21[%c8_152, %c0_153], %359 {strides = array<i32>} : memref<16x128xf32, #tpu.memory_space<vmem>>, vector<4x128xf32>,
    %361 = vector.extract_strided_slice %273 {offsets = [12, 0], sizes = [4, 128], strides = [1, 1]} : vector<16x128xbf16> to vector<4x128xbf16>
    %362 = vector.extract_strided_slice %40 {offsets = [48, 0], sizes = [16, 128], strides = [1, 1]} : vector<64x128xbf16> to vector<16x128xbf16>
    %363 = vector.extract_strided_slice %42 {offsets = [48, 0], sizes = [16, 128], strides = [1, 1]} : vector<64x128xbf16> to vector<16x128xbf16>
    %cst_154 = arith.constant dense<0.000000e+00> : vector<4x16xf32>
    %364 = tpu.matmul %361, %362, %cst_154 {dimension_numbers = #tpu.dot_dimension_numbers<[1], [1], [0], [0], [0, 0, 1, 0], [], []>} : vector<4x128xbf16>, vector<16x128xbf16>, vector<4x16xf32> -> vector<4x16xf32>
    %cst_155 = arith.constant 0.0883883461 : f32
    %365 = vector.broadcast %cst_155 : f32 to vector<4x16xf32>
    %366 = arith.mulf %364, %365 : vector<4x16xf32>
    %cst_156 = arith.constant dense<0xFF800000> : vector<16xf32>
    %367 = vector.multi_reduction <maximumf>, %366, %cst_156 [0] : vector<4x16xf32> to vector<16xf32>
    %368 = vector.shape_cast %367 : vector<16xf32> to vector<1x16xf32>
    %369 = vector.broadcast %368 : vector<1x16xf32> to vector<4x16xf32>
    %370 = arith.subf %366, %369 : vector<4x16xf32>
    %371 = math.exp %370 : vector<4x16xf32>
    %cst_157 = arith.constant dense<0.000000e+00> : vector<16xf32>
    %372 = vector.multi_reduction <add>, %371, %cst_157 [0] : vector<4x16xf32> to vector<16xf32>
    %373 = vector.shape_cast %372 : vector<16xf32> to vector<1x16xf32>
    %374 = tpu.reciprocal %373 {approx = true} : vector<1x16xf32> -> vector<1x16xf32>
    %375 = vector.broadcast %374 : vector<1x16xf32> to vector<4x16xf32>
    %376 = arith.mulf %371, %375 : vector<4x16xf32>
    %cst_158 = arith.constant 9.99999993E-9 : f32
    %377 = vector.broadcast %cst_158 : f32 to vector<4x16xf32>
    %378 = arith.addf %376, %377 : vector<4x16xf32>
    %c3_159 = arith.constant 3 : index
    %c1_160 = arith.constant 1 : index
    %c0_161 = arith.constant 0 : index
    %c0_162 = arith.constant 0 : index
    %379 = vector.load %arg20[%c3_159, %c1_160, %c0_161, %c0_162] : memref<4x3x4x16xf32, #tpu.memory_space<vmem>>, vector<1x1x4x16xf32>
    %380 = vector.shape_cast %379 : vector<1x1x4x16xf32> to vector<4x16xf32>
    %381 = vector.shape_cast %378 : vector<4x16xf32> to vector<1x1x4x16xf32>
    tpu.vector_store %arg20[%c3_159, %c1_160, %c0_161, %c0_162], %381 {strides = array<i32>} : memref<4x3x4x16xf32, #tpu.memory_space<vmem>>, vector<1x1x4x16xf32>,
    %cst_163 = arith.constant dense<0.000000e+00> : vector<4xf32>
    %382 = vector.multi_reduction <add>, %378, %cst_163 [1] : vector<4x16xf32> to vector<4xf32>
    %383 = vector.shape_cast %382 : vector<4xf32> to vector<4x1xf32>
    %384 = tpu.reciprocal %383 {approx = true} : vector<4x1xf32> -> vector<4x1xf32>
    %385 = vector.broadcast %384 : vector<4x1xf32> to vector<4x16xf32>
    %386 = arith.mulf %378, %385 : vector<4x16xf32>
    %387 = arith.truncf %386 : vector<4x16xf32> to vector<4x16xbf16>
    %cst_164 = arith.constant dense<0.000000e+00> : vector<4x128xf32>
    %388 = tpu.matmul %387, %363, %cst_164 {dimension_numbers = #tpu.dot_dimension_numbers<[1], [0], [0], [1], [0, 0, 1, 1], [], []>} : vector<4x16xbf16>, vector<16x128xbf16>, vector<4x128xf32> -> vector<4x128xf32>
    %c12_165 = arith.constant 12 : index
    %c0_166 = arith.constant 0 : index
    %389 = vector.load %arg21[%c12_165, %c0_166] : memref<16x128xf32, #tpu.memory_space<vmem>>, vector<4x128xf32>
    tpu.vector_store %arg21[%c12_165, %c0_166], %388 {strides = array<i32>} : memref<16x128xf32, #tpu.memory_space<vmem>>, vector<4x128xf32>,
    %c0_167 = arith.constant 0 : index
    %c0_168 = arith.constant 0 : index
    %390 = vector.load %arg21[%c0_167, %c0_168] : memref<16x128xf32, #tpu.memory_space<vmem>>, vector<16x128xf32>
    %391 = arith.truncf %390 : vector<16x128xf32> to vector<16x128xbf16>
    %cst_169 = arith.constant dense<0.000000e+00> : vector<16x384xf32>
    %392 = tpu.matmul %391, %1, %cst_169 {dimension_numbers = #tpu.dot_dimension_numbers<[1], [0], [0], [1], [0, 0, 1, 1], [], []>} : vector<16x128xbf16>, vector<128x384xbf16>, vector<16x384xf32> -> vector<16x384xf32>
    %393 = vector.broadcast %3 : vector<1x384xf32> to vector<16x384xf32>
    %394 = arith.addf %392, %393 : vector<16x384xf32>
    %395 = arith.truncf %250 : vector<16x128xf32> to vector<16x128xbf16>
    %cst_170 = arith.constant dense<0.000000e+00> : vector<16x384xf32>
    %396 = tpu.matmul %395, %2, %cst_170 {dimension_numbers = #tpu.dot_dimension_numbers<[1], [0], [0], [1], [0, 0, 1, 1], [], []>} : vector<16x128xbf16>, vector<128x384xbf16>, vector<16x384xf32> -> vector<16x384xf32>
    %397 = vector.broadcast %4 : vector<1x384xf32> to vector<16x384xf32>
    %398 = arith.addf %396, %397 : vector<16x384xf32>
    %399 = vector.extract_strided_slice %394 {offsets = [0, 0], sizes = [16, 128], strides = [1, 1]} : vector<16x384xf32> to vector<16x128xf32>
    %400 = vector.extract_strided_slice %398 {offsets = [0, 0], sizes = [16, 128], strides = [1, 1]} : vector<16x384xf32> to vector<16x128xf32>
    %401 = arith.addf %399, %400 : vector<16x128xf32>
    %cst_171 = arith.constant 0.000000e+00 : f32
    %402 = vector.broadcast %cst_171 : f32 to vector<16x128xf32>
    %403 = arith.subf %402, %401 : vector<16x128xf32>
    %404 = math.exp %403 : vector<16x128xf32>
    %cst_172 = arith.constant 1.000000e+00 : f32
    %405 = vector.broadcast %cst_172 : f32 to vector<16x128xf32>
    %406 = arith.addf %405, %404 : vector<16x128xf32>
    %407 = tpu.reciprocal %406 {approx = true} : vector<16x128xf32> -> vector<16x128xf32>
    %408 = vector.extract_strided_slice %394 {offsets = [0, 128], sizes = [16, 128], strides = [1, 1]} : vector<16x384xf32> to vector<16x128xf32>
    %409 = vector.extract_strided_slice %398 {offsets = [0, 128], sizes = [16, 128], strides = [1, 1]} : vector<16x384xf32> to vector<16x128xf32>
    %410 = arith.addf %408, %409 : vector<16x128xf32>
    %cst_173 = arith.constant 0.000000e+00 : f32
    %411 = vector.broadcast %cst_173 : f32 to vector<16x128xf32>
    %412 = arith.subf %411, %410 : vector<16x128xf32>
    %413 = math.exp %412 : vector<16x128xf32>
    %cst_174 = arith.constant 1.000000e+00 : f32
    %414 = vector.broadcast %cst_174 : f32 to vector<16x128xf32>
    %415 = arith.addf %414, %413 : vector<16x128xf32>
    %416 = tpu.reciprocal %415 {approx = true} : vector<16x128xf32> -> vector<16x128xf32>
    %417 = vector.extract_strided_slice %394 {offsets = [0, 256], sizes = [16, 128], strides = [1, 1]} : vector<16x384xf32> to vector<16x128xf32>
    %418 = vector.extract_strided_slice %398 {offsets = [0, 256], sizes = [16, 128], strides = [1, 1]} : vector<16x384xf32> to vector<16x128xf32>
    %419 = arith.mulf %407, %418 : vector<16x128xf32>
    %420 = arith.addf %417, %419 : vector<16x128xf32>
    %421 = math.tanh %420 : vector<16x128xf32>
    %cst_175 = arith.constant 1.000000e+00 : f32
    %422 = vector.broadcast %cst_175 : f32 to vector<16x128xf32>
    %423 = arith.subf %422, %416 : vector<16x128xf32>
    %424 = arith.mulf %423, %421 : vector<16x128xf32>
    %425 = arith.mulf %416, %250 : vector<16x128xf32>
    %426 = arith.addf %424, %425 : vector<16x128xf32>
    %cst_176 = arith.constant dense<0.000000e+00> : vector<16xf32>
    %427 = vector.multi_reduction <add>, %426, %cst_176 [1] : vector<16x128xf32> to vector<16xf32>
    %428 = vector.shape_cast %427 : vector<16xf32> to vector<16x1xf32>
    %cst_177 = arith.constant 1.280000e+02 : f32
    %429 = vector.broadcast %cst_177 : f32 to vector<16x1xf32>
    %430 = arith.divf %428, %429 : vector<16x1xf32>
    %431 = vector.broadcast %430 : vector<16x1xf32> to vector<16x128xf32>
    %432 = arith.subf %426, %431 : vector<16x128xf32>
    %433 = arith.mulf %432, %432 : vector<16x128xf32>
    %cst_178 = arith.constant dense<0.000000e+00> : vector<16xf32>
    %434 = vector.multi_reduction <add>, %433, %cst_178 [1] : vector<16x128xf32> to vector<16xf32>
    %435 = vector.shape_cast %434 : vector<16xf32> to vector<16x1xf32>
    %cst_179 = arith.constant 1.280000e+02 : f32
    %436 = vector.broadcast %cst_179 : f32 to vector<16x1xf32>
    %437 = arith.divf %435, %436 : vector<16x1xf32>
    %cst_180 = arith.constant 9.99999974E-6 : f32
    %438 = vector.broadcast %cst_180 : f32 to vector<16x1xf32>
    %439 = arith.addf %437, %438 : vector<16x1xf32>
    %440 = math.rsqrt %439 : vector<16x1xf32>
    %441 = vector.broadcast %440 : vector<16x1xf32> to vector<16x128xf32>
    %442 = arith.mulf %432, %441 : vector<16x128xf32>
    %443 = vector.broadcast %11 : vector<1x128xf32> to vector<16x128xf32>
    %444 = arith.mulf %442, %443 : vector<16x128xf32>
    %445 = vector.broadcast %12 : vector<1x128xf32> to vector<16x128xf32>
    %446 = arith.addf %444, %445 : vector<16x128xf32>
    %447 = arith.truncf %446 : vector<16x128xf32> to vector<16x128xbf16>
    %cst_181 = arith.constant dense<0.000000e+00> : vector<16x128xf32>
    %448 = tpu.matmul %447, %5, %cst_181 {dimension_numbers = #tpu.dot_dimension_numbers<[1], [0], [0], [1], [0, 0, 1, 1], [], []>} : vector<16x128xbf16>, vector<128x128xbf16>, vector<16x128xf32> -> vector<16x128xf32>
    %449 = vector.broadcast %6 : vector<1x128xf32> to vector<16x128xf32>
    %450 = arith.addf %448, %449 : vector<16x128xf32>
    %cst_182 = arith.constant 0.000000e+00 : f32
    %451 = vector.broadcast %cst_182 : f32 to vector<16x128xf32>
    %452 = arith.maximumf %450, %451 : vector<16x128xf32>
    %453 = arith.truncf %452 : vector<16x128xf32> to vector<16x128xbf16>
    %cst_183 = arith.constant dense<0.000000e+00> : vector<16x128xf32>
    %454 = tpu.matmul %453, %7, %cst_183 {dimension_numbers = #tpu.dot_dimension_numbers<[1], [0], [0], [1], [0, 0, 1, 1], [], []>} : vector<16x128xbf16>, vector<128x128xbf16>, vector<16x128xf32> -> vector<16x128xf32>
    %455 = arith.addf %426, %454 : vector<16x128xf32>
    %456 = vector.broadcast %8 : vector<1x128xf32> to vector<16x128xf32>
    %457 = arith.addf %455, %456 : vector<16x128xf32>
    %cst_184 = arith.constant dense<0.000000e+00> : vector<16xf32>
    %458 = vector.multi_reduction <add>, %457, %cst_184 [1] : vector<16x128xf32> to vector<16xf32>
    %459 = vector.shape_cast %458 : vector<16xf32> to vector<16x1xf32>
    %cst_185 = arith.constant 1.280000e+02 : f32
    %460 = vector.broadcast %cst_185 : f32 to vector<16x1xf32>
    %461 = arith.divf %459, %460 : vector<16x1xf32>
    %462 = vector.broadcast %461 : vector<16x1xf32> to vector<16x128xf32>
    %463 = arith.subf %457, %462 : vector<16x128xf32>
    %464 = arith.mulf %463, %463 : vector<16x128xf32>
    %cst_186 = arith.constant dense<0.000000e+00> : vector<16xf32>
    %465 = vector.multi_reduction <add>, %464, %cst_186 [1] : vector<16x128xf32> to vector<16xf32>
    %466 = vector.shape_cast %465 : vector<16xf32> to vector<16x1xf32>
    %cst_187 = arith.constant 1.280000e+02 : f32
    %467 = vector.broadcast %cst_187 : f32 to vector<16x1xf32>
    %468 = arith.divf %466, %467 : vector<16x1xf32>
    %cst_188 = arith.constant 9.99999974E-6 : f32
    %469 = vector.broadcast %cst_188 : f32 to vector<16x1xf32>
    %470 = arith.addf %468, %469 : vector<16x1xf32>
    %471 = math.rsqrt %470 : vector<16x1xf32>
    %472 = vector.broadcast %471 : vector<16x1xf32> to vector<16x128xf32>
    %473 = arith.mulf %463, %472 : vector<16x128xf32>
    %474 = vector.broadcast %9 : vector<1x128xf32> to vector<16x128xf32>
    %475 = arith.mulf %473, %474 : vector<16x128xf32>
    %476 = vector.broadcast %10 : vector<1x128xf32> to vector<16x128xf32>
    %477 = arith.addf %475, %476 : vector<16x128xf32>
    %478 = arith.truncf %477 : vector<16x128xf32> to vector<16x128xbf16>
    %cst_189 = arith.constant dense<0.000000e+00> : vector<16x128xf32>
    %479 = tpu.matmul %478, %0, %cst_189 {dimension_numbers = #tpu.dot_dimension_numbers<[1], [0], [0], [1], [0, 0, 1, 1], [], []>} : vector<16x128xbf16>, vector<128x128xbf16>, vector<16x128xf32> -> vector<16x128xf32>
    %480 = arith.truncf %479 : vector<16x128xf32> to vector<16x128xbf16>
    %481 = vector.extract_strided_slice %480 {offsets = [0, 0], sizes = [4, 128], strides = [1, 1]} : vector<16x128xbf16> to vector<4x128xbf16>
    %482 = vector.extract_strided_slice %40 {offsets = [0, 0], sizes = [16, 128], strides = [1, 1]} : vector<64x128xbf16> to vector<16x128xbf16>
    %483 = vector.extract_strided_slice %42 {offsets = [0, 0], sizes = [16, 128], strides = [1, 1]} : vector<64x128xbf16> to vector<16x128xbf16>
    %cst_190 = arith.constant dense<0.000000e+00> : vector<4x16xf32>
    %484 = tpu.matmul %481, %482, %cst_190 {dimension_numbers = #tpu.dot_dimension_numbers<[1], [1], [0], [0], [0, 0, 1, 0], [], []>} : vector<4x128xbf16>, vector<16x128xbf16>, vector<4x16xf32> -> vector<4x16xf32>
    %cst_191 = arith.constant 0.0883883461 : f32
    %485 = vector.broadcast %cst_191 : f32 to vector<4x16xf32>
    %486 = arith.mulf %484, %485 : vector<4x16xf32>
    %cst_192 = arith.constant dense<0xFF800000> : vector<16xf32>
    %487 = vector.multi_reduction <maximumf>, %486, %cst_192 [0] : vector<4x16xf32> to vector<16xf32>
    %488 = vector.shape_cast %487 : vector<16xf32> to vector<1x16xf32>
    %489 = vector.broadcast %488 : vector<1x16xf32> to vector<4x16xf32>
    %490 = arith.subf %486, %489 : vector<4x16xf32>
    %491 = math.exp %490 : vector<4x16xf32>
    %cst_193 = arith.constant dense<0.000000e+00> : vector<16xf32>
    %492 = vector.multi_reduction <add>, %491, %cst_193 [0] : vector<4x16xf32> to vector<16xf32>
    %493 = vector.shape_cast %492 : vector<16xf32> to vector<1x16xf32>
    %494 = tpu.reciprocal %493 {approx = true} : vector<1x16xf32> -> vector<1x16xf32>
    %495 = vector.broadcast %494 : vector<1x16xf32> to vector<4x16xf32>
    %496 = arith.mulf %491, %495 : vector<4x16xf32>
    %cst_194 = arith.constant 9.99999993E-9 : f32
    %497 = vector.broadcast %cst_194 : f32 to vector<4x16xf32>
    %498 = arith.addf %496, %497 : vector<4x16xf32>
    %c0_195 = arith.constant 0 : index
    %c2_196 = arith.constant 2 : index
    %c0_197 = arith.constant 0 : index
    %c0_198 = arith.constant 0 : index
    %499 = vector.load %arg20[%c0_195, %c2_196, %c0_197, %c0_198] : memref<4x3x4x16xf32, #tpu.memory_space<vmem>>, vector<1x1x4x16xf32>
    %500 = vector.shape_cast %499 : vector<1x1x4x16xf32> to vector<4x16xf32>
    %501 = vector.shape_cast %498 : vector<4x16xf32> to vector<1x1x4x16xf32>
    tpu.vector_store %arg20[%c0_195, %c2_196, %c0_197, %c0_198], %501 {strides = array<i32>} : memref<4x3x4x16xf32, #tpu.memory_space<vmem>>, vector<1x1x4x16xf32>,
    %cst_199 = arith.constant dense<0.000000e+00> : vector<4xf32>
    %502 = vector.multi_reduction <add>, %498, %cst_199 [1] : vector<4x16xf32> to vector<4xf32>
    %503 = vector.shape_cast %502 : vector<4xf32> to vector<4x1xf32>
    %504 = tpu.reciprocal %503 {approx = true} : vector<4x1xf32> -> vector<4x1xf32>
    %505 = vector.broadcast %504 : vector<4x1xf32> to vector<4x16xf32>
    %506 = arith.mulf %498, %505 : vector<4x16xf32>
    %507 = arith.truncf %506 : vector<4x16xf32> to vector<4x16xbf16>
    %cst_200 = arith.constant dense<0.000000e+00> : vector<4x128xf32>
    %508 = tpu.matmul %507, %483, %cst_200 {dimension_numbers = #tpu.dot_dimension_numbers<[1], [0], [0], [1], [0, 0, 1, 1], [], []>} : vector<4x16xbf16>, vector<16x128xbf16>, vector<4x128xf32> -> vector<4x128xf32>
    %c0_201 = arith.constant 0 : index
    %c0_202 = arith.constant 0 : index
    %509 = vector.load %arg21[%c0_201, %c0_202] : memref<16x128xf32, #tpu.memory_space<vmem>>, vector<4x128xf32>
    tpu.vector_store %arg21[%c0_201, %c0_202], %508 {strides = array<i32>} : memref<16x128xf32, #tpu.memory_space<vmem>>, vector<4x128xf32>,
    %510 = vector.extract_strided_slice %480 {offsets = [4, 0], sizes = [4, 128], strides = [1, 1]} : vector<16x128xbf16> to vector<4x128xbf16>
    %511 = vector.extract_strided_slice %40 {offsets = [16, 0], sizes = [16, 128], strides = [1, 1]} : vector<64x128xbf16> to vector<16x128xbf16>
    %512 = vector.extract_strided_slice %42 {offsets = [16, 0], sizes = [16, 128], strides = [1, 1]} : vector<64x128xbf16> to vector<16x128xbf16>
    %cst_203 = arith.constant dense<0.000000e+00> : vector<4x16xf32>
    %513 = tpu.matmul %510, %511, %cst_203 {dimension_numbers = #tpu.dot_dimension_numbers<[1], [1], [0], [0], [0, 0, 1, 0], [], []>} : vector<4x128xbf16>, vector<16x128xbf16>, vector<4x16xf32> -> vector<4x16xf32>
    %cst_204 = arith.constant 0.0883883461 : f32
    %514 = vector.broadcast %cst_204 : f32 to vector<4x16xf32>
    %515 = arith.mulf %513, %514 : vector<4x16xf32>
    %cst_205 = arith.constant dense<0xFF800000> : vector<16xf32>
    %516 = vector.multi_reduction <maximumf>, %515, %cst_205 [0] : vector<4x16xf32> to vector<16xf32>
    %517 = vector.shape_cast %516 : vector<16xf32> to vector<1x16xf32>
    %518 = vector.broadcast %517 : vector<1x16xf32> to vector<4x16xf32>
    %519 = arith.subf %515, %518 : vector<4x16xf32>
    %520 = math.exp %519 : vector<4x16xf32>
    %cst_206 = arith.constant dense<0.000000e+00> : vector<16xf32>
    %521 = vector.multi_reduction <add>, %520, %cst_206 [0] : vector<4x16xf32> to vector<16xf32>
    %522 = vector.shape_cast %521 : vector<16xf32> to vector<1x16xf32>
    %523 = tpu.reciprocal %522 {approx = true} : vector<1x16xf32> -> vector<1x16xf32>
    %524 = vector.broadcast %523 : vector<1x16xf32> to vector<4x16xf32>
    %525 = arith.mulf %520, %524 : vector<4x16xf32>
    %cst_207 = arith.constant 9.99999993E-9 : f32
    %526 = vector.broadcast %cst_207 : f32 to vector<4x16xf32>
    %527 = arith.addf %525, %526 : vector<4x16xf32>
    %c1_208 = arith.constant 1 : index
    %c2_209 = arith.constant 2 : index
    %c0_210 = arith.constant 0 : index
    %c0_211 = arith.constant 0 : index
    %528 = vector.load %arg20[%c1_208, %c2_209, %c0_210, %c0_211] : memref<4x3x4x16xf32, #tpu.memory_space<vmem>>, vector<1x1x4x16xf32>
    %529 = vector.shape_cast %528 : vector<1x1x4x16xf32> to vector<4x16xf32>
    %530 = vector.shape_cast %527 : vector<4x16xf32> to vector<1x1x4x16xf32>
    tpu.vector_store %arg20[%c1_208, %c2_209, %c0_210, %c0_211], %530 {strides = array<i32>} : memref<4x3x4x16xf32, #tpu.memory_space<vmem>>, vector<1x1x4x16xf32>,
    %cst_212 = arith.constant dense<0.000000e+00> : vector<4xf32>
    %531 = vector.multi_reduction <add>, %527, %cst_212 [1] : vector<4x16xf32> to vector<4xf32>
    %532 = vector.shape_cast %531 : vector<4xf32> to vector<4x1xf32>
    %533 = tpu.reciprocal %532 {approx = true} : vector<4x1xf32> -> vector<4x1xf32>
    %534 = vector.broadcast %533 : vector<4x1xf32> to vector<4x16xf32>
    %535 = arith.mulf %527, %534 : vector<4x16xf32>
    %536 = arith.truncf %535 : vector<4x16xf32> to vector<4x16xbf16>
    %cst_213 = arith.constant dense<0.000000e+00> : vector<4x128xf32>
    %537 = tpu.matmul %536, %512, %cst_213 {dimension_numbers = #tpu.dot_dimension_numbers<[1], [0], [0], [1], [0, 0, 1, 1], [], []>} : vector<4x16xbf16>, vector<16x128xbf16>, vector<4x128xf32> -> vector<4x128xf32>
    %c4_214 = arith.constant 4 : index
    %c0_215 = arith.constant 0 : index
    %538 = vector.load %arg21[%c4_214, %c0_215] : memref<16x128xf32, #tpu.memory_space<vmem>>, vector<4x128xf32>
    tpu.vector_store %arg21[%c4_214, %c0_215], %537 {strides = array<i32>} : memref<16x128xf32, #tpu.memory_space<vmem>>, vector<4x128xf32>,
    %539 = vector.extract_strided_slice %480 {offsets = [8, 0], sizes = [4, 128], strides = [1, 1]} : vector<16x128xbf16> to vector<4x128xbf16>
    %540 = vector.extract_strided_slice %40 {offsets = [32, 0], sizes = [16, 128], strides = [1, 1]} : vector<64x128xbf16> to vector<16x128xbf16>
    %541 = vector.extract_strided_slice %42 {offsets = [32, 0], sizes = [16, 128], strides = [1, 1]} : vector<64x128xbf16> to vector<16x128xbf16>
    %cst_216 = arith.constant dense<0.000000e+00> : vector<4x16xf32>
    %542 = tpu.matmul %539, %540, %cst_216 {dimension_numbers = #tpu.dot_dimension_numbers<[1], [1], [0], [0], [0, 0, 1, 0], [], []>} : vector<4x128xbf16>, vector<16x128xbf16>, vector<4x16xf32> -> vector<4x16xf32>
    %cst_217 = arith.constant 0.0883883461 : f32
    %543 = vector.broadcast %cst_217 : f32 to vector<4x16xf32>
    %544 = arith.mulf %542, %543 : vector<4x16xf32>
    %cst_218 = arith.constant dense<0xFF800000> : vector<16xf32>
    %545 = vector.multi_reduction <maximumf>, %544, %cst_218 [0] : vector<4x16xf32> to vector<16xf32>
    %546 = vector.shape_cast %545 : vector<16xf32> to vector<1x16xf32>
    %547 = vector.broadcast %546 : vector<1x16xf32> to vector<4x16xf32>
    %548 = arith.subf %544, %547 : vector<4x16xf32>
    %549 = math.exp %548 : vector<4x16xf32>
    %cst_219 = arith.constant dense<0.000000e+00> : vector<16xf32>
    %550 = vector.multi_reduction <add>, %549, %cst_219 [0] : vector<4x16xf32> to vector<16xf32>
    %551 = vector.shape_cast %550 : vector<16xf32> to vector<1x16xf32>
    %552 = tpu.reciprocal %551 {approx = true} : vector<1x16xf32> -> vector<1x16xf32>
    %553 = vector.broadcast %552 : vector<1x16xf32> to vector<4x16xf32>
    %554 = arith.mulf %549, %553 : vector<4x16xf32>
    %cst_220 = arith.constant 9.99999993E-9 : f32
    %555 = vector.broadcast %cst_220 : f32 to vector<4x16xf32>
    %556 = arith.addf %554, %555 : vector<4x16xf32>
    %c2_221 = arith.constant 2 : index
    %c2_222 = arith.constant 2 : index
    %c0_223 = arith.constant 0 : index
    %c0_224 = arith.constant 0 : index
    %557 = vector.load %arg20[%c2_221, %c2_222, %c0_223, %c0_224] : memref<4x3x4x16xf32, #tpu.memory_space<vmem>>, vector<1x1x4x16xf32>
    %558 = vector.shape_cast %557 : vector<1x1x4x16xf32> to vector<4x16xf32>
    %559 = vector.shape_cast %556 : vector<4x16xf32> to vector<1x1x4x16xf32>
    tpu.vector_store %arg20[%c2_221, %c2_222, %c0_223, %c0_224], %559 {strides = array<i32>} : memref<4x3x4x16xf32, #tpu.memory_space<vmem>>, vector<1x1x4x16xf32>,
    %cst_225 = arith.constant dense<0.000000e+00> : vector<4xf32>
    %560 = vector.multi_reduction <add>, %556, %cst_225 [1] : vector<4x16xf32> to vector<4xf32>
    %561 = vector.shape_cast %560 : vector<4xf32> to vector<4x1xf32>
    %562 = tpu.reciprocal %561 {approx = true} : vector<4x1xf32> -> vector<4x1xf32>
    %563 = vector.broadcast %562 : vector<4x1xf32> to vector<4x16xf32>
    %564 = arith.mulf %556, %563 : vector<4x16xf32>
    %565 = arith.truncf %564 : vector<4x16xf32> to vector<4x16xbf16>
    %cst_226 = arith.constant dense<0.000000e+00> : vector<4x128xf32>
    %566 = tpu.matmul %565, %541, %cst_226 {dimension_numbers = #tpu.dot_dimension_numbers<[1], [0], [0], [1], [0, 0, 1, 1], [], []>} : vector<4x16xbf16>, vector<16x128xbf16>, vector<4x128xf32> -> vector<4x128xf32>
    %c8_227 = arith.constant 8 : index
    %c0_228 = arith.constant 0 : index
    %567 = vector.load %arg21[%c8_227, %c0_228] : memref<16x128xf32, #tpu.memory_space<vmem>>, vector<4x128xf32>
    tpu.vector_store %arg21[%c8_227, %c0_228], %566 {strides = array<i32>} : memref<16x128xf32, #tpu.memory_space<vmem>>, vector<4x128xf32>,
    %568 = vector.extract_strided_slice %480 {offsets = [12, 0], sizes = [4, 128], strides = [1, 1]} : vector<16x128xbf16> to vector<4x128xbf16>
    %569 = vector.extract_strided_slice %40 {offsets = [48, 0], sizes = [16, 128], strides = [1, 1]} : vector<64x128xbf16> to vector<16x128xbf16>
    %570 = vector.extract_strided_slice %42 {offsets = [48, 0], sizes = [16, 128], strides = [1, 1]} : vector<64x128xbf16> to vector<16x128xbf16>
    %cst_229 = arith.constant dense<0.000000e+00> : vector<4x16xf32>
    %571 = tpu.matmul %568, %569, %cst_229 {dimension_numbers = #tpu.dot_dimension_numbers<[1], [1], [0], [0], [0, 0, 1, 0], [], []>} : vector<4x128xbf16>, vector<16x128xbf16>, vector<4x16xf32> -> vector<4x16xf32>
    %cst_230 = arith.constant 0.0883883461 : f32
    %572 = vector.broadcast %cst_230 : f32 to vector<4x16xf32>
    %573 = arith.mulf %571, %572 : vector<4x16xf32>
    %cst_231 = arith.constant dense<0xFF800000> : vector<16xf32>
    %574 = vector.multi_reduction <maximumf>, %573, %cst_231 [0] : vector<4x16xf32> to vector<16xf32>
    %575 = vector.shape_cast %574 : vector<16xf32> to vector<1x16xf32>
    %576 = vector.broadcast %575 : vector<1x16xf32> to vector<4x16xf32>
    %577 = arith.subf %573, %576 : vector<4x16xf32>
    %578 = math.exp %577 : vector<4x16xf32>
    %cst_232 = arith.constant dense<0.000000e+00> : vector<16xf32>
    %579 = vector.multi_reduction <add>, %578, %cst_232 [0] : vector<4x16xf32> to vector<16xf32>
    %580 = vector.shape_cast %579 : vector<16xf32> to vector<1x16xf32>
    %581 = tpu.reciprocal %580 {approx = true} : vector<1x16xf32> -> vector<1x16xf32>
    %582 = vector.broadcast %581 : vector<1x16xf32> to vector<4x16xf32>
    %583 = arith.mulf %578, %582 : vector<4x16xf32>
    %cst_233 = arith.constant 9.99999993E-9 : f32
    %584 = vector.broadcast %cst_233 : f32 to vector<4x16xf32>
    %585 = arith.addf %583, %584 : vector<4x16xf32>
    %c3_234 = arith.constant 3 : index
    %c2_235 = arith.constant 2 : index
    %c0_236 = arith.constant 0 : index
    %c0_237 = arith.constant 0 : index
    %586 = vector.load %arg20[%c3_234, %c2_235, %c0_236, %c0_237] : memref<4x3x4x16xf32, #tpu.memory_space<vmem>>, vector<1x1x4x16xf32>
    %587 = vector.shape_cast %586 : vector<1x1x4x16xf32> to vector<4x16xf32>
    %588 = vector.shape_cast %585 : vector<4x16xf32> to vector<1x1x4x16xf32>
    tpu.vector_store %arg20[%c3_234, %c2_235, %c0_236, %c0_237], %588 {strides = array<i32>} : memref<4x3x4x16xf32, #tpu.memory_space<vmem>>, vector<1x1x4x16xf32>,
    %cst_238 = arith.constant dense<0.000000e+00> : vector<4xf32>
    %589 = vector.multi_reduction <add>, %585, %cst_238 [1] : vector<4x16xf32> to vector<4xf32>
    %590 = vector.shape_cast %589 : vector<4xf32> to vector<4x1xf32>
    %591 = tpu.reciprocal %590 {approx = true} : vector<4x1xf32> -> vector<4x1xf32>
    %592 = vector.broadcast %591 : vector<4x1xf32> to vector<4x16xf32>
    %593 = arith.mulf %585, %592 : vector<4x16xf32>
    %594 = arith.truncf %593 : vector<4x16xf32> to vector<4x16xbf16>
    %cst_239 = arith.constant dense<0.000000e+00> : vector<4x128xf32>
    %595 = tpu.matmul %594, %570, %cst_239 {dimension_numbers = #tpu.dot_dimension_numbers<[1], [0], [0], [1], [0, 0, 1, 1], [], []>} : vector<4x16xbf16>, vector<16x128xbf16>, vector<4x128xf32> -> vector<4x128xf32>
    %c12_240 = arith.constant 12 : index
    %c0_241 = arith.constant 0 : index
    %596 = vector.load %arg21[%c12_240, %c0_241] : memref<16x128xf32, #tpu.memory_space<vmem>>, vector<4x128xf32>
    tpu.vector_store %arg21[%c12_240, %c0_241], %595 {strides = array<i32>} : memref<16x128xf32, #tpu.memory_space<vmem>>, vector<4x128xf32>,
    %c0_242 = arith.constant 0 : index
    %c0_243 = arith.constant 0 : index
    %597 = vector.load %arg21[%c0_242, %c0_243] : memref<16x128xf32, #tpu.memory_space<vmem>>, vector<16x128xf32>
    %598 = arith.truncf %597 : vector<16x128xf32> to vector<16x128xbf16>
    %cst_244 = arith.constant dense<0.000000e+00> : vector<16x384xf32>
    %599 = tpu.matmul %598, %1, %cst_244 {dimension_numbers = #tpu.dot_dimension_numbers<[1], [0], [0], [1], [0, 0, 1, 1], [], []>} : vector<16x128xbf16>, vector<128x384xbf16>, vector<16x384xf32> -> vector<16x384xf32>
    %600 = vector.broadcast %3 : vector<1x384xf32> to vector<16x384xf32>
    %601 = arith.addf %599, %600 : vector<16x384xf32>
    %602 = arith.truncf %457 : vector<16x128xf32> to vector<16x128xbf16>
    %cst_245 = arith.constant dense<0.000000e+00> : vector<16x384xf32>
    %603 = tpu.matmul %602, %2, %cst_245 {dimension_numbers = #tpu.dot_dimension_numbers<[1], [0], [0], [1], [0, 0, 1, 1], [], []>} : vector<16x128xbf16>, vector<128x384xbf16>, vector<16x384xf32> -> vector<16x384xf32>
    %604 = vector.broadcast %4 : vector<1x384xf32> to vector<16x384xf32>
    %605 = arith.addf %603, %604 : vector<16x384xf32>
    %606 = vector.extract_strided_slice %601 {offsets = [0, 0], sizes = [16, 128], strides = [1, 1]} : vector<16x384xf32> to vector<16x128xf32>
    %607 = vector.extract_strided_slice %605 {offsets = [0, 0], sizes = [16, 128], strides = [1, 1]} : vector<16x384xf32> to vector<16x128xf32>
    %608 = arith.addf %606, %607 : vector<16x128xf32>
    %cst_246 = arith.constant 0.000000e+00 : f32
    %609 = vector.broadcast %cst_246 : f32 to vector<16x128xf32>
    %610 = arith.subf %609, %608 : vector<16x128xf32>
    %611 = math.exp %610 : vector<16x128xf32>
    %cst_247 = arith.constant 1.000000e+00 : f32
    %612 = vector.broadcast %cst_247 : f32 to vector<16x128xf32>
    %613 = arith.addf %612, %611 : vector<16x128xf32>
    %614 = tpu.reciprocal %613 {approx = true} : vector<16x128xf32> -> vector<16x128xf32>
    %615 = vector.extract_strided_slice %601 {offsets = [0, 128], sizes = [16, 128], strides = [1, 1]} : vector<16x384xf32> to vector<16x128xf32>
    %616 = vector.extract_strided_slice %605 {offsets = [0, 128], sizes = [16, 128], strides = [1, 1]} : vector<16x384xf32> to vector<16x128xf32>
    %617 = arith.addf %615, %616 : vector<16x128xf32>
    %cst_248 = arith.constant 0.000000e+00 : f32
    %618 = vector.broadcast %cst_248 : f32 to vector<16x128xf32>
    %619 = arith.subf %618, %617 : vector<16x128xf32>
    %620 = math.exp %619 : vector<16x128xf32>
    %cst_249 = arith.constant 1.000000e+00 : f32
    %621 = vector.broadcast %cst_249 : f32 to vector<16x128xf32>
    %622 = arith.addf %621, %620 : vector<16x128xf32>
    %623 = tpu.reciprocal %622 {approx = true} : vector<16x128xf32> -> vector<16x128xf32>
    %624 = vector.extract_strided_slice %601 {offsets = [0, 256], sizes = [16, 128], strides = [1, 1]} : vector<16x384xf32> to vector<16x128xf32>
    %625 = vector.extract_strided_slice %605 {offsets = [0, 256], sizes = [16, 128], strides = [1, 1]} : vector<16x384xf32> to vector<16x128xf32>
    %626 = arith.mulf %614, %625 : vector<16x128xf32>
    %627 = arith.addf %624, %626 : vector<16x128xf32>
    %628 = math.tanh %627 : vector<16x128xf32>
    %cst_250 = arith.constant 1.000000e+00 : f32
    %629 = vector.broadcast %cst_250 : f32 to vector<16x128xf32>
    %630 = arith.subf %629, %623 : vector<16x128xf32>
    %631 = arith.mulf %630, %628 : vector<16x128xf32>
    %632 = arith.mulf %623, %457 : vector<16x128xf32>
    %633 = arith.addf %631, %632 : vector<16x128xf32>
    %cst_251 = arith.constant dense<0.000000e+00> : vector<16xf32>
    %634 = vector.multi_reduction <add>, %633, %cst_251 [1] : vector<16x128xf32> to vector<16xf32>
    %635 = vector.shape_cast %634 : vector<16xf32> to vector<16x1xf32>
    %cst_252 = arith.constant 1.280000e+02 : f32
    %636 = vector.broadcast %cst_252 : f32 to vector<16x1xf32>
    %637 = arith.divf %635, %636 : vector<16x1xf32>
    %638 = vector.broadcast %637 : vector<16x1xf32> to vector<16x128xf32>
    %639 = arith.subf %633, %638 : vector<16x128xf32>
    %640 = arith.mulf %639, %639 : vector<16x128xf32>
    %cst_253 = arith.constant dense<0.000000e+00> : vector<16xf32>
    %641 = vector.multi_reduction <add>, %640, %cst_253 [1] : vector<16x128xf32> to vector<16xf32>
    %642 = vector.shape_cast %641 : vector<16xf32> to vector<16x1xf32>
    %cst_254 = arith.constant 1.280000e+02 : f32
    %643 = vector.broadcast %cst_254 : f32 to vector<16x1xf32>
    %644 = arith.divf %642, %643 : vector<16x1xf32>
    %cst_255 = arith.constant 9.99999974E-6 : f32
    %645 = vector.broadcast %cst_255 : f32 to vector<16x1xf32>
    %646 = arith.addf %644, %645 : vector<16x1xf32>
    %647 = math.rsqrt %646 : vector<16x1xf32>
    %648 = vector.broadcast %647 : vector<16x1xf32> to vector<16x128xf32>
    %649 = arith.mulf %639, %648 : vector<16x128xf32>
    %650 = vector.broadcast %11 : vector<1x128xf32> to vector<16x128xf32>
    %651 = arith.mulf %649, %650 : vector<16x128xf32>
    %652 = vector.broadcast %12 : vector<1x128xf32> to vector<16x128xf32>
    %653 = arith.addf %651, %652 : vector<16x128xf32>
    %654 = arith.truncf %653 : vector<16x128xf32> to vector<16x128xbf16>
    %cst_256 = arith.constant dense<0.000000e+00> : vector<16x128xf32>
    %655 = tpu.matmul %654, %5, %cst_256 {dimension_numbers = #tpu.dot_dimension_numbers<[1], [0], [0], [1], [0, 0, 1, 1], [], []>} : vector<16x128xbf16>, vector<128x128xbf16>, vector<16x128xf32> -> vector<16x128xf32>
    %656 = vector.broadcast %6 : vector<1x128xf32> to vector<16x128xf32>
    %657 = arith.addf %655, %656 : vector<16x128xf32>
    %cst_257 = arith.constant 0.000000e+00 : f32
    %658 = vector.broadcast %cst_257 : f32 to vector<16x128xf32>
    %659 = arith.maximumf %657, %658 : vector<16x128xf32>
    %660 = arith.truncf %659 : vector<16x128xf32> to vector<16x128xbf16>
    %cst_258 = arith.constant dense<0.000000e+00> : vector<16x128xf32>
    %661 = tpu.matmul %660, %7, %cst_258 {dimension_numbers = #tpu.dot_dimension_numbers<[1], [0], [0], [1], [0, 0, 1, 1], [], []>} : vector<16x128xbf16>, vector<128x128xbf16>, vector<16x128xf32> -> vector<16x128xf32>
    %662 = arith.addf %633, %661 : vector<16x128xf32>
    %663 = vector.broadcast %8 : vector<1x128xf32> to vector<16x128xf32>
    %664 = arith.addf %662, %663 : vector<16x128xf32>
    %c0_259 = arith.constant 0 : index
    %c0_260 = arith.constant 0 : index
    %665 = vector.load %arg19[%c0_259, %c0_260] : memref<16x128xf32, #tpu.memory_space<vmem>>, vector<16x128xf32>
    tpu.vector_store %arg19[%c0_259, %c0_260], %664 {strides = array<i32>} : memref<16x128xf32, #tpu.memory_space<vmem>>, vector<16x128xf32>,
    return
  }
  func.func @transform_0(%arg0: i32) -> (i32, i32) {
    %c0_i32 = arith.constant 0 : i32
    %c0_i32_0 = arith.constant 0 : i32
    return %arg0, %c0_i32 : i32, i32
  }
  func.func @transform_1(%arg0: i32) -> (i32, i32) {
    %c0_i32 = arith.constant 0 : i32
    %c0_i32_0 = arith.constant 0 : i32
    return %arg0, %c0_i32 : i32, i32
  }
  func.func @transform_2(%arg0: i32) -> (i32, i32) {
    %c0_i32 = arith.constant 0 : i32
    %c0_i32_0 = arith.constant 0 : i32
    %c0_i32_1 = arith.constant 0 : i32
    return %c0_i32, %c0_i32_0 : i32, i32
  }
  func.func @transform_3(%arg0: i32) -> (i32, i32) {
    %c0_i32 = arith.constant 0 : i32
    %c0_i32_0 = arith.constant 0 : i32
    %c0_i32_1 = arith.constant 0 : i32
    return %c0_i32, %c0_i32_0 : i32, i32
  }
  func.func @transform_4(%arg0: i32) -> (i32, i32) {
    %c0_i32 = arith.constant 0 : i32
    %c0_i32_0 = arith.constant 0 : i32
    %c0_i32_1 = arith.constant 0 : i32
    return %c0_i32, %c0_i32_0 : i32, i32
  }
  func.func @transform_5(%arg0: i32) -> (i32, i32) {
    %c0_i32 = arith.constant 0 : i32
    %c0_i32_0 = arith.constant 0 : i32
    %c0_i32_1 = arith.constant 0 : i32
    return %c0_i32, %c0_i32_0 : i32, i32
  }
  func.func @transform_6(%arg0: i32) -> (i32, i32) {
    %c0_i32 = arith.constant 0 : i32
    %c0_i32_0 = arith.constant 0 : i32
    %c0_i32_1 = arith.constant 0 : i32
    return %c0_i32, %c0_i32_0 : i32, i32
  }
  func.func @transform_7(%arg0: i32) -> (i32, i32) {
    %c0_i32 = arith.constant 0 : i32
    %c0_i32_0 = arith.constant 0 : i32
    %c0_i32_1 = arith.constant 0 : i32
    return %c0_i32, %c0_i32_0 : i32, i32
  }
  func.func @transform_8(%arg0: i32) -> (i32, i32) {
    %c0_i32 = arith.constant 0 : i32
    %c0_i32_0 = arith.constant 0 : i32
    %c0_i32_1 = arith.constant 0 : i32
    return %c0_i32, %c0_i32_0 : i32, i32
  }
  func.func @transform_9(%arg0: i32) -> (i32, i32) {
    %c0_i32 = arith.constant 0 : i32
    %c0_i32_0 = arith.constant 0 : i32
    %c0_i32_1 = arith.constant 0 : i32
    return %c0_i32, %c0_i32_0 : i32, i32
  }
  func.func @transform_10(%arg0: i32) -> (i32, i32) {
    %c0_i32 = arith.constant 0 : i32
    %c0_i32_0 = arith.constant 0 : i32
    %c0_i32_1 = arith.constant 0 : i32
    return %c0_i32, %c0_i32_0 : i32, i32
  }
  func.func @transform_11(%arg0: i32) -> (i32, i32) {
    %c0_i32 = arith.constant 0 : i32
    %c0_i32_0 = arith.constant 0 : i32
    %c0_i32_1 = arith.constant 0 : i32
    return %c0_i32, %c0_i32_0 : i32, i32
  }
  func.func @transform_12(%arg0: i32) -> (i32, i32) {
    %c0_i32 = arith.constant 0 : i32
    %c0_i32_0 = arith.constant 0 : i32
    %c0_i32_1 = arith.constant 0 : i32
    return %c0_i32, %c0_i32_0 : i32, i32
  }
  func.func @transform_13(%arg0: i32) -> (i32, i32) {
    %c0_i32 = arith.constant 0 : i32
    %c0_i32_0 = arith.constant 0 : i32
    %c0_i32_1 = arith.constant 0 : i32
    return %c0_i32, %c0_i32_0 : i32, i32
  }
  func.func @transform_14(%arg0: i32) -> (i32, i32) {
    %c0_i32 = arith.constant 0 : i32
    %c0_i32_0 = arith.constant 0 : i32
    %c0_i32_1 = arith.constant 0 : i32
    return %c0_i32, %c0_i32_0 : i32, i32
  }
  func.func @transform_15(%arg0: i32) -> (i32, i32) {
    %c0_i32 = arith.constant 0 : i32
    %c0_i32_0 = arith.constant 0 : i32
    %c0_i32_1 = arith.constant 0 : i32
    return %c0_i32, %c0_i32_0 : i32, i32
  }
  func.func @transform_16(%arg0: i32) -> (i32, i32) {
    %c0_i32 = arith.constant 0 : i32
    %c0_i32_0 = arith.constant 0 : i32
    %c0_i32_1 = arith.constant 0 : i32
    return %c0_i32, %c0_i32_0 : i32, i32
  }
  func.func @transform_17(%arg0: i32) -> (i32, i32) {
    %c0_i32 = arith.constant 0 : i32
    %c0_i32_0 = arith.constant 0 : i32
    %c0_i32_1 = arith.constant 0 : i32
    return %c0_i32, %c0_i32_0 : i32, i32
  }
  func.func @transform_18(%arg0: i32) -> (i32, i32) {
    %c0_i32 = arith.constant 0 : i32
    %c0_i32_0 = arith.constant 0 : i32
    return %arg0, %c0_i32 : i32, i32
  }
  func.func @transform_19(%arg0: i32) -> (i32, i32, i32, i32) {
    %c0_i32 = arith.constant 0 : i32
    %c0_i32_0 = arith.constant 0 : i32
    %c0_i32_1 = arith.constant 0 : i32
    %c0_i32_2 = arith.constant 0 : i32
    return %arg0, %c0_i32, %c0_i32_0, %c0_i32_1 : i32, i32, i32, i32
  }
}

</mosaic_0001>

<bundles_post_ra>
// kernel: tpu_custom_call.1
= control target key start
LH: loop header
LB: loop body
LE: loop exit
PB: predicated region body
PF: predicated region fallthrough
CT: control target
= control target key end

     0   :  { %s7634_s0 = inlined_call_operand.hbm [shape: f32[128,128], index: 0, kind: input, shape index: {}]   ;;  %s7635_s1 = inlined_call_operand.hbm [shape: f32[32,128], index: 1, kind: input, shape index: {}]   ;;  %s7636_s2 = inlined_call_operand.hbm [shape: bf16[128,128], index: 2, kind: input, shape index: {}]   ;;  %s7637_s3 = inlined_call_operand.hbm [shape: bf16[128,256], index: 3, kind: input, shape index: {}]   ;;  %s7638_s4 = inlined_call_operand.hbm [shape: bf16[128,384], index: 4, kind: input, shape index: {}]   ;;  %s7639_s5 = inlined_call_operand.hbm [shape: bf16[128,384], index: 5, kind: input, shape index: {}]   ;;  %s7640_s6 = inlined_call_operand.vmem [shape: f32[1,384], index: 6, kind: input, shape index: {}]   ;;  %s7641_s7 = inlined_call_operand.vmem [shape: f32[1,384], index: 7, kind: input, shape index: {}]   ;;  %s7642_s8 = inlined_call_operand.hbm [shape: bf16[128,128], index: 8, kind: input, shape index: {}]   ;;  %s7643_s9 = inlined_call_operand.vmem [shape: f32[1,128], index: 9, kind: input, shape index: {}]   ;;  %s7644_s10 = inlined_call_operand.hbm [shape: bf16[128,128], index: 10, kind: input, shape index: {}]   ;;  %s7645_s11 = inlined_call_operand.vmem [shape: f32[1,128], index: 11, kind: input, shape index: {}]   ;;  %s7646_s12 = inlined_call_operand.vmem [shape: f32[1,128], index: 12, kind: input, shape index: {}]   ;;  %s7647_s13 = inlined_call_operand.vmem [shape: f32[1,128], index: 13, kind: input, shape index: {}]   ;;  %s7648_s14 = inlined_call_operand.vmem [shape: f32[1,128], index: 14, kind: input, shape index: {}]   ;;  %s7649_s15 = inlined_call_operand.vmem [shape: f32[1,128], index: 15, kind: input, shape index: {}]   ;;  %s7650_s16 = inlined_call_operand.vmem [shape: f32[1,128], index: 16, kind: input, shape index: {}]   ;;  %s7651_s17 = inlined_call_operand.vmem [shape: f32[1,128], index: 17, kind: input, shape index: {}]   ;;  %s7652_s18 = inlined_call_operand.hbm [shape: f32[32,128], index: 18, kind: output, shape index: {0}]   ;;  %s7653_s19 = inlined_call_operand.hbm [shape: f32[8,3,4,16], index: 19, kind: output, shape index: {1}]  }
   0x1   :  { %7707 = sst [smem:[#allocation46_spill]] %s7634_s0 }
   0x2   :  { %7708 = sst [smem:[#allocation47_spill]] %s7635_s1 }
   0x3   :  { %7709 = sst [smem:[#allocation48_spill]] %s7636_s2 }
   0x4   :  { %7710 = sst [smem:[#allocation49_spill]] %s7637_s3 }
   0x5   :  { %7711 = sst [smem:[#allocation50_spill]] %s7638_s4 }
   0x6   :  { %7712 = sst [smem:[#allocation51_spill]] %s7639_s5 }
   0x7   :  { %7713 = sst [smem:[#allocation52_spill]] %s7640_s6 }
   0x8   :  { %7714 = sst [smem:[#allocation53_spill]] %s7641_s7 }
   0x9   :  { %7715 = sst [smem:[#allocation54_spill]] %s7642_s8 }
   0xa   :  { %7716 = sst [smem:[#allocation55_spill]] %s7643_s9 }
   0xb   :  { %7717 = sst [smem:[#allocation56_spill]] %s7644_s10 }
   0xc   :  { %7718 = sst [smem:[#allocation57_spill]] %s7645_s11 }
   0xd   :  { %7719 = sst [smem:[#allocation58_spill]] %s7650_s16 }
   0xe   :  { %7720 = sst [smem:[#allocation59_spill]] %s7651_s17 }
   0xf   :  { %7721 = sst [smem:[#allocation60_spill]] %s7652_s18 }
  0x10   :  { %7722 = sst [smem:[#allocation61_spill]] %s7653_s19 }
  0x11   :  { %25 = vsyncpa [#allocation4], 0 }
  0x12   :  { %27 = vsyncpa [#allocation4 + $0x1], 0 }
  0x13   :  { %28 = vsyncpa [#allocation7], 0 }
  0x14   :  { %30 = vsyncpa [#allocation7 + $0x1], 0 }
  0x15   :  { %31 = vsyncpa [#allocation10], 0 }
  0x16   :  { %32 = vsyncpa [#allocation13], 0 }
  0x17   :  { %33 = vsyncpa [#allocation16], 0 }
  0x18   :  { %34 = vsyncpa [#allocation5], 0 }
  0x19   :  { %36 = vsyncpa [#allocation5 + $0x1], 0 }
  0x1a   :  { %37 = vsyncpa [#allocation19], 0 }
  0x1b   :  { %39 = vsyncpa [#allocation19 + $0x1], 0  ;;  %s6233_s0 = smov 0   ;;  %s6235_s30 = smov 0  }
  0x1c   :  { %s6237_s20 = smov 0   ;;  %s6239_s21 = smov 0  }
  0x1d LB: > { %7723 = sst [smem:[#allocation28_spill]] %s6104_s20  ;;  %s6110_s1 = smov [#allocation8]   ;;  %s6108_s21 = sphi %s6239_s21, %s7806_s21   ;;  %s6104_s20 = sphi %s6237_s20, %s7803_s20   ;;  %s6100_s30 = sphi %s6235_s30, %s7805_s30   ;;  %s6096_s0 = sphi %s6233_s0, %s7804_s0  }
  0x1e   : > { %s502_s22 = sshll.u32 %s6110_s1, 4  ;;  %s6254_s2 = sadd.s32 4294967295, %s6108_s21   ;;  %s6259_s22 = int_to_ptr.vmem [resolvable:$true] %s502_s22 }
  0x1f   : > { %p4449_p0 = scmp.ge.s32.totalorder %s6108_s21, 1  ;;  %p7669_p1 = scmp.eq.s32.totalorder %s6254_s2, 0 }
  0x20   : > { %p490_p2 = scmp.lt.s32.totalorder %s6108_s21, 3  ;;  %s6111_s24 = smov [#allocation9]  }
  0x21   : > { %s515_s25 = sshll.u32 %s6111_s24, 4  ;;  %s7726_s28 = sld [smem:[#allocation48_spill]]  ;;  %s6274_s25 = int_to_ptr.vmem [resolvable:$true] %s515_s25 }
  0x22   : > { %p6261_p3 = pnand %p4449_p0, %p490_p2 }
  0x24   : > { %s7724_s23 = scalar_select %p6261_p3, 1, 0 }
  0x25   : > { %p5300_p5 = pneg %p6261_p3 }
  0x27   : > { %p6270_p6 = pnand %p5300_p5, %p7669_p1  ;;  %s5762_s29 = scalar_lea.hbm %s7726_s28, 1024 }
  0x28   : > { %p5763_p7 = scmp.ne.s32.totalorder %s7726_s28, %s5762_s29  ;;  %p5769_p11 = scmp.lt.u32.totalorder %s5762_s29, %s7726_s28 }
  0x29   : > { %p6284_p8 = pneg %p6270_p6 }
  0x2b   : > { %p5765_p9 = pnand %p6284_p8, %p5763_p7 }
  0x2d   : > { %p5766_p10 = pneg %p5765_p9 }
  0x2f   : > { %p5771_p12 = pnand %p5769_p11, %p5766_p10 }
  0x31   : > { %5774 = shalt.err (!%p5771_p12)
}
  0x32   : > { %s5775_s18 = scalar_lea.vmem %s6259_s22, 1024  ;;  %p5783_p5 = scmp.lt.s32.totalorder %s6259_s22, %s6259_s22 }
  0x33   : > { %p5776_p13 = scmp.ne.s32.totalorder %s6259_s22, %s5775_s18  ;;  %p5784_p4 = scmp.lt.s32.totalorder %s5775_s18, %s5775_s18 }
  0x35   : > { %p5778_p0 = pnand %p5776_p13, %p6284_p8  ;;  %p5785_p7 = por %p5784_p4, %p5783_p5 }
  0x37   : > { %p5779_p2 = pneg %p5778_p0 }
  0x39   : > { %p5786_p9 = pnand %p5785_p7, %p5779_p2 }
  0x3b   : > { %5789 = shalt.err (!%p5786_p9)
}
  0x3c   : > { %s7664_s26 = smov 64   ;;  %s7666_s11 = smov 4  }
  0x3d   : > { %5303 = dma.hbm_to_vmem [thread:$0]  (!%p6270_p6), %s7726_s28, 1024, %s6259_s22, [#allocation7], %s7664_s26, %s7664_s26, %s7666_s11  }
  0x3e   : > { %s7728_s9 = sld [smem:[#allocation49_spill]] }
  0x44   : > { %s5790_s18 = scalar_lea.hbm %s7728_s9, 2048 }
  0x45   : > { %p5791_p4 = scmp.ne.s32.totalorder %s7728_s9, %s5790_s18  ;;  %p5797_p12 = scmp.lt.u32.totalorder %s5790_s18, %s7728_s9 }
  0x47   : > { %p5793_p10 = pnand %p5791_p4, %p6284_p8 }
  0x49   : > { %p5794_p11 = pneg %p5793_p10 }
  0x4b   : > { %p5799_p13 = pnand %p5797_p12, %p5794_p11 }
  0x4d   : > { %5802 = shalt.err (!%p5799_p13)
}
  0x4e   : > { %s5803_s22 = scalar_lea.vmem %s6274_s25, 2048  ;;  %p5811_p7 = scmp.lt.s32.totalorder %s6274_s25, %s6274_s25 }
  0x4f   : > { %p5804_p0 = scmp.ne.s32.totalorder %s6274_s25, %s5803_s22  ;;  %p5812_p9 = scmp.lt.s32.totalorder %s5803_s22, %s5803_s22 }
  0x51   : > { %p5806_p2 = pnand %p5804_p0, %p6284_p8  ;;  %p5813_p4 = por %p5812_p9, %p5811_p7 }
  0x53   : > { %p5807_p5 = pneg %p5806_p2 }
  0x55   : > { %p5814_p10 = pnand %p5813_p4, %p5807_p5 }
  0x57   : > { %5817 = shalt.err (!%p5814_p10)
}
  0x58   : > { %s7671_s16 = smov 128   ;;  %s7673_s6 = smov 8  }
  0x59   : > { %5306 = dma.hbm_to_vmem [thread:$0]  (!%p6270_p6), %s7728_s9, 2048, %s6274_s25, [#allocation10], %s7671_s16, %s7671_s16, %s7673_s6  }
  0x5a   : > { %s6116_s27 = smov [#allocation12]   ;;  %s6117_s1 = smov [#allocation11]  }
  0x5b   : > { %s541_s29 = sshll.u32 %s6116_s27, 4  ;;  %s528_s24 = sshll.u32 %s6117_s1, 4  ;;  %s542_s29 = int_to_ptr.vmem [resolvable:$true] %s541_s29  ;;  %s6334_s24 = int_to_ptr.vmem [resolvable:$true] %s528_s24 }
  0x5c   : > { %s7729_s5 = sld [smem:[#allocation51_spill]] }
  0x62   : > { %s5818_s26 = scalar_lea.hbm %s7729_s5, 3072 }
  0x63   : > { %p5819_p11 = scmp.ne.s32.totalorder %s7729_s5, %s5818_s26  ;;  %p5825_p0 = scmp.lt.u32.totalorder %s5818_s26, %s7729_s5 }
  0x65   : > { %p5821_p12 = pnand %p5819_p11, %p6284_p8 }
  0x67   : > { %p5822_p13 = pneg %p5821_p12 }
  0x69   : > { %p5827_p2 = pnand %p5825_p0, %p5822_p13 }
  0x6b   : > { %5830 = shalt.err (!%p5827_p2)
}
  0x6c   : > { %s5831_s17 = scalar_lea.vmem %s542_s29, 3072  ;;  %p5839_p4 = scmp.lt.s32.totalorder %s542_s29, %s542_s29 }
  0x6d   : > { %p5832_p5 = scmp.ne.s32.totalorder %s542_s29, %s5831_s17  ;;  %p5840_p10 = scmp.lt.s32.totalorder %s5831_s17, %s5831_s17 }
  0x6f   : > { %p5834_p7 = pnand %p5832_p5, %p6284_p8  ;;  %p5841_p1 = por %p5840_p10, %p5839_p4 }
  0x71   : > { %p5835_p9 = pneg %p5834_p7 }
  0x73   : > { %p5842_p3 = pnand %p5841_p1, %p5835_p9 }
  0x75   : > { %5845 = shalt.err (!%p5842_p3)
}
  0x76   : > { %s6118_s28 = smov 192   ;;  %s6119_s11 = smov 12  }
  0x77   : > { %5312 = dma.hbm_to_vmem [thread:$0]  (!%p6270_p6), %s7729_s5, 3072, %s542_s29, [#allocation13], %s6118_s28, %s6118_s28, %s6119_s11  }
  0x78   : > { %s7730_s4 = sld [smem:[#allocation50_spill]] }
  0x7e   : > { %s5846_s22 = scalar_lea.hbm %s7730_s4, 3072 }
  0x7f   : > { %p5847_p11 = scmp.ne.s32.totalorder %s7730_s4, %s5846_s22  ;;  %p5853_p12 = scmp.lt.u32.totalorder %s5846_s22, %s7730_s4 }
  0x81   : > { %p5849_p1 = pnand %p5847_p11, %p6284_p8 }
  0x83   : > { %p5850_p3 = pneg %p5849_p1 }
  0x85   : > { %p5855_p13 = pnand %p5853_p12, %p5850_p3 }
  0x87   : > { %5858 = shalt.err (!%p5855_p13)
}
  0x88   : > { %s5859_s29 = scalar_lea.vmem %s6334_s24, 3072  ;;  %p5867_p7 = scmp.lt.s32.totalorder %s6334_s24, %s6334_s24 }
  0x89   : > { %p5860_p0 = scmp.ne.s32.totalorder %s6334_s24, %s5859_s29  ;;  %p5868_p9 = scmp.lt.s32.totalorder %s5859_s29, %s5859_s29 }
  0x8b   : > { %p5862_p2 = pnand %p5860_p0, %p6284_p8  ;;  %p5869_p4 = por %p5868_p9, %p5867_p7 }
  0x8d   : > { %p5863_p5 = pneg %p5862_p2 }
  0x8f   : > { %p5870_p10 = pnand %p5869_p4, %p5863_p5 }
  0x91   : > { %5873 = shalt.err (!%p5870_p10)
}
  0x92   : > { %5309 = dma.hbm_to_vmem [thread:$0]  (!%p6270_p6), %s7730_s4, 3072, %s6334_s24, [#allocation10], %s6118_s28, %s6118_s28, %s6119_s11  }
  0x93   : > { %s6120_s26 = smov [#allocation14]   ;;  %s6121_s18 = smov [#allocation15]  }
  0x94   : > { %s560_s1 = sshll.u32 %s6120_s26, 4  ;;  %s576_s22 = sshll.u32 %s6121_s18, 4  ;;  %s561_s1 = int_to_ptr.vmem [resolvable:$true] %s560_s1  ;;  %s6377_s22 = int_to_ptr.vmem [resolvable:$true] %s576_s22 }
  0x95   : > { %s7731_s8 = sld [smem:[#allocation54_spill]] }
  0x9b   : > { %s5874_s17 = scalar_lea.hbm %s7731_s8, 1024 }
  0x9c   : > { %p5875_p11 = scmp.ne.s32.totalorder %s7731_s8, %s5874_s17  ;;  %p5881_p12 = scmp.lt.u32.totalorder %s5874_s17, %s7731_s8 }
  0x9e   : > { %p5877_p1 = pnand %p5875_p11, %p6284_p8 }
  0xa0   : > { %p5878_p3 = pneg %p5877_p1 }
  0xa2   : > { %p5883_p13 = pnand %p5881_p12, %p5878_p3 }
  0xa4   : > { %5886 = shalt.err (!%p5883_p13)
}
  0xa5   : > { %s5887_s28 = scalar_lea.vmem %s561_s1, 1024  ;;  %p5895_p7 = scmp.lt.s32.totalorder %s561_s1, %s561_s1 }
  0xa6   : > { %p5888_p0 = scmp.ne.s32.totalorder %s561_s1, %s5887_s28  ;;  %p5896_p9 = scmp.lt.s32.totalorder %s5887_s28, %s5887_s28 }
  0xa8   : > { %p5890_p2 = pnand %p5888_p0, %p6284_p8  ;;  %p5897_p4 = por %p5896_p9, %p5895_p7 }
  0xaa   : > { %p5891_p5 = pneg %p5890_p2 }
  0xac   : > { %p5898_p10 = pnand %p5897_p4, %p5891_p5 }
  0xae   : > { %5901 = shalt.err (!%p5898_p10)
}
  0xaf   : > { %s7732_s6 = smov 4   ;;  %s7733_s11 = smov 64  }
  0xb0   : > { %5315 = dma.hbm_to_vmem [thread:$0]  (!%p6270_p6), %s7731_s8, 1024, %s561_s1, [#allocation13], %s7733_s11, %s7733_s11, %s7732_s6  }
  0xb1   : > { %s7734_s10 = sld [smem:[#allocation56_spill]] }
  0xb7   : > { %s5902_s25 = scalar_lea.hbm %s7734_s10, 1024 }
  0xb8   : > { %p5903_p11 = scmp.ne.s32.totalorder %s7734_s10, %s5902_s25  ;;  %p5909_p12 = scmp.lt.u32.totalorder %s5902_s25, %s7734_s10 }
  0xba   : > { %p5905_p1 = pnand %p5903_p11, %p6284_p8 }
  0xbc   : > { %p5906_p3 = pneg %p5905_p1 }
  0xbe   : > { %p5911_p13 = pnand %p5909_p12, %p5906_p3 }
  0xc0   : > { %5914 = shalt.err (!%p5911_p13)
}
  0xc1   : > { %s5915_s1 = scalar_lea.vmem %s6377_s22, 1024  ;;  %p5923_p7 = scmp.lt.s32.totalorder %s6377_s22, %s6377_s22 }
  0xc2   : > { %p5916_p0 = scmp.ne.s32.totalorder %s6377_s22, %s5915_s1  ;;  %p5924_p9 = scmp.lt.s32.totalorder %s5915_s1, %s5915_s1 }
  0xc4   : > { %p5918_p2 = pnand %p5916_p0, %p6284_p8  ;;  %p5925_p4 = por %p5924_p9, %p5923_p7 }
  0xc6   : > { %p5919_p5 = pneg %p5918_p2 }
  0xc8   : > { %p5926_p10 = pnand %p5925_p4, %p5919_p5 }
  0xca   : > { %5929 = shalt.err (!%p5926_p10)
}
  0xcb   : > { %5318 = dma.hbm_to_vmem [thread:$0]  (!%p6270_p6), %s7734_s10, 1024, %s6377_s22, [#allocation16], %s7733_s11, %s7733_s11, %s7732_s6  }
  0xcc   : > { %s4448_s19 = sadd.s32 4294967294, %s6108_s21   ;;  %s6428_s3 = sadd.s32 1, %s6108_s21  }
  0xcd   : > { %s49_s26 = ssub.s32 %s6108_s21, %s6428_s3  ;;  %s52_s18 = sadd.s32 1, %s6104_s20 }
  0xce   : > { %p50_p8 = scmp.eq.s32.totalorder %s49_s26, 0  ;;  %p59_p11 = scmp.ne.s32.totalorder %s6104_s20, %s6100_s30 }
  0xcf   : > { %p60_p1 = scmp.eq.s32.totalorder %s6108_s21, 0  ;;  %p65_p3 = scmp.ne.s32.totalorder %s6100_s30, %s6096_s0 }
  0xd0   : > { %s6439_s7 = scalar_select %p50_p8, %s6104_s20, %s52_s18  }
  0xd1   : > { %p6441_p12 = por %p60_p1, %p59_p11  ;;  %p7737_p13 = scmp.eq.s32.totalorder %s6254_s2, 0 }
  0xd2   : > { %7735 = sst [smem:[#allocation29_spill]] %s6439_s7  ;;  %p451_p0 = scmp.eq.s32.totalorder %s6254_s2, 1 }
  0xd3   : > { %p6447_p6 = por %p7737_p13, %p65_p3  ;;  %p457_p2 = scmp.eq.s32.totalorder %s4448_s19, 1 }
  0xd4   : > { %p5339_p5 = scmp.lt.s32.totalorder %s6108_s21, 2  ;;  %s6454_s6 = sand.u32 1, %s6104_s20  }
  0xd5   : > { %p6456_p7 = por %p451_p0, %p59_p11  ;;  %p6460_p9 = por %p457_p2, %p65_p3 }
  0xd6   : > { %s4457_s29 = sshll.u32 %s6454_s6, 6  ;;  %s4600_s16 = sshll.u32 %s6108_s21, 10 }
  0xd7   : > { %s7739_s11 = scalar_select %p6456_p7, 1, 0 }
  0xd8   : > { %s7740_s17 = scalar_select %p6460_p9, 1, 0 }
  0xd9   : > { %s7741_s28 = sld [smem:[#allocation46_spill]]  ;;  %s615_s19 = scalar_lea.vmem [#allocation3], %s4457_s29 }
  0xda   : > { %s622_s26 = sshll.u32 %s615_s19, 4  ;;  %p6475_p4 = pnand %p5339_p5, %p6441_p12  ;;  %s6471_s26 = int_to_ptr.vmem [resolvable:$true] %s622_s26 }
  0xdb   : > { %s4460_s5 = sshll.u32 %s6454_s6, 4  ;;  %s612_s24 = scalar_lea.sflag [#allocation4], %s6454_s6 }
  0xdc   : > { %p5932_p8 = pneg %p6475_p4 }
  0xdf   : > { %s6469_s27 = scalar_lea.hbm %s7741_s28, %s4600_s16  ;;  %s5935_s25 = scalar_lea.hbm %s7741_s28, 2048 }
  0xe0   : > { %s5930_s16 = scalar_lea.hbm %s6469_s27, 1024  ;;  %p5936_p3 = scmp.lt.u32.totalorder %s6469_s27, %s7741_s28 }
  0xe1   : > { %p5931_p10 = scmp.ne.s32.totalorder %s6469_s27, %s5930_s16  ;;  %p5937_p12 = scmp.lt.u32.totalorder %s5935_s25, %s5930_s16 }
  0xe2   : > { %p5939_p0 = scmp.lt.u32.totalorder %s5930_s16, %s6469_s27 }
  0xe3   : > { %p5933_p11 = pnand %p5932_p8, %p5931_p10  ;;  %p5938_p13 = por %p5937_p12, %p5936_p3 }
  0xe5   : > { %p5934_p1 = pneg %p5933_p11  ;;  %p5940_p2 = por %p5939_p0, %p5938_p13 }
  0xe7   : > { %p5941_p5 = pnand %p5940_p2, %p5934_p1 }
  0xe9   : > { %5944 = shalt.err (!%p5941_p5)
}
  0xea   : > { %s5945_s4 = scalar_lea.vmem %s6471_s26, 1024  ;;  %s6122_s29 = smov [#allocation3]  }
  0xeb   : > { %p5946_p10 = scmp.ne.s32.totalorder %s6471_s26, %s5945_s4  ;;  %s5950_s1 = sshll.u32 %s6122_s29, 4  ;;  %s5951_s1 = int_to_ptr.vmem [resolvable:$false] %s5950_s1 }
  0xec   : > { %s5952_s8 = scalar_lea.vmem %s5951_s1, 2048  ;;  %p5953_p7 = scmp.lt.s32.totalorder %s6471_s26, %s5951_s1 }
  0xed   : > { %p5948_p11 = pnand %p5946_p10, %p5932_p8  ;;  %p5954_p3 = scmp.lt.s32.totalorder %s5952_s8, %s5945_s4 }
  0xef   : > { %p5949_p9 = pneg %p5948_p11  ;;  %p5955_p12 = por %p5954_p3, %p5953_p7 }
  0xf1   : > { %p5956_p13 = pnand %p5955_p12, %p5949_p9 }
  0xf3   : > { %5959 = shalt.err (!%p5956_p13)
}
  0xf4   : > { %s7743_s16 = smov 8   ;;  %s7744_s25 = smov 128  }
  0xf5   : > { %5322 = dma.hbm_to_vmem [thread:$0]  (!%p6475_p4), %s6469_s27, 1024, %s6471_s26, %s612_s24, %s7744_s25, %s7744_s25, %s7743_s16  }
  0xf6   : > { %s4601_s19 = sshll.u32 %s6108_s21, 8  ;;  %s7745_s1 = sld [smem:[#allocation47_spill]] }
  0xf7   : > { %s636_s9 = scalar_lea.vmem [#allocation6], %s4460_s5  ;;  %s7746_s28 = sand.u32 1, %s6108_s21  }
  0xf8   : > { %s643_s10 = sshll.u32 %s636_s9, 4  ;;  %s6524_s7 = scalar_lea.sflag [#allocation7], %s7746_s28  ;;  %s6520_s10 = int_to_ptr.vmem [resolvable:$true] %s643_s10 }
  0xfc   : > { %s6516_s8 = scalar_lea.hbm %s7745_s1, %s4601_s19  ;;  %s5965_s6 = scalar_lea.hbm %s7745_s1, 512 }
  0xfd   : > { %s5960_s20 = scalar_lea.hbm %s6516_s8, 256  ;;  %p5966_p0 = scmp.lt.u32.totalorder %s6516_s8, %s7745_s1 }
  0xfe   : > { %p5961_p7 = scmp.ne.s32.totalorder %s6516_s8, %s5960_s20  ;;  %p5967_p2 = scmp.lt.u32.totalorder %s5965_s6, %s5960_s20 }
  0xff   : > { %p5969_p10 = scmp.lt.u32.totalorder %s5960_s20, %s6516_s8 }
 0x100   : > { %p5963_p9 = pnand %p5961_p7, %p5932_p8  ;;  %p5968_p5 = por %p5967_p2, %p5966_p0 }
 0x102   : > { %p5964_p1 = pneg %p5963_p9  ;;  %p5970_p11 = por %p5969_p10, %p5968_p5 }
 0x104   : > { %p5971_p3 = pnand %p5970_p11, %p5964_p1 }
 0x106   : > { %5974 = shalt.err (!%p5971_p3)
}
 0x107   : > { %s5975_s5 = scalar_lea.vmem %s6520_s10, 256  ;;  %s6123_s9 = smov [#allocation6]  }
 0x108   : > { %p5976_p12 = scmp.ne.s32.totalorder %s6520_s10, %s5975_s5  ;;  %s5980_s28 = sshll.u32 %s6123_s9, 4  ;;  %s5981_s28 = int_to_ptr.vmem [resolvable:$false] %s5980_s28 }
 0x109   : > { %s5982_s29 = scalar_lea.vmem %s5981_s28, 512  ;;  %p5983_p9 = scmp.lt.s32.totalorder %s6520_s10, %s5981_s28 }
 0x10a   : > { %p5978_p13 = pnand %p5976_p12, %p5932_p8  ;;  %p5984_p0 = scmp.lt.s32.totalorder %s5982_s29, %s5975_s5 }
 0x10c   : > { %p5979_p7 = pneg %p5978_p13  ;;  %p5985_p2 = por %p5984_p0, %p5983_p9 }
 0x10e   : > { %p5986_p5 = pnand %p5985_p2, %p5979_p7 }
 0x110   : > { %5989 = shalt.err (!%p5986_p5)
}
 0x111   : > { %5325 = dma.hbm_to_vmem [thread:$0]  (!%p6475_p4), %s6516_s8, 256, %s6520_s10, %s6524_s7, %s7744_s25, %s7744_s25, %s7743_s16  }
 0x112   : > { %p7747_p8 = scmp.ne.s32.totalorder %s7724_s23, 0 }
 0x114   : > { %655 = sbr.rel (%p7747_p8) target bundleno = 8361 (0x20a9), region = 92 }
 0x11b   : > { %s6556_s20 = sand.u32 1, %s6100_s30  }
 0x11c   : > { %s4464_s4 = sshll.u32 %s6556_s20, 6  ;;  %s658_s27 = scalar_lea.sflag [#allocation4], %s6556_s20 }
 0x11d   : > { %s6560_s26 = scalar_lea.vmem [#allocation3], %s4464_s4 }
 0x11e   : > { %6063 = dma.done.wait (%p6447_p6), %s658_s27, 1024  }
 0x11f   : > { %6065 = vsyncadd (%p6447_p6), %s658_s27, 4294966272  ;;  %s666_s10 = sand.u32 1, %s6254_s2   ;;  %s4465_s23 = sshll.u32 %s6556_s20, 4 }
 0x120   : > { %s667_s7 = scalar_lea.sflag [#allocation7], %s666_s10  ;;  %s6570_s18 = scalar_lea.vmem [#allocation6], %s4465_s23 }
 0x121   : > { %6067 = dma.done.wait (%p6447_p6), %s667_s7, 256  }
 0x122   : > { %6069 = vsyncadd (%p6447_p6), %s667_s7, 4294967040  ;;  %p7748_p4 = scmp.eq.s32.totalorder %s6254_s2, 0 }
 0x124   : > { %6071 = dma.done.wait (%p7748_p4), [#allocation7], 1024   ;;  %p7749_p1 = pmov %p7748_p4 }
 0x126   : > { %6073 = vsyncadd (%p7749_p1), [#allocation7], 4294966272  ;;  %p7750_p10 = pmov %p7749_p1 }
 0x127   : > { %p7751_p11 = pmov %p7749_p1 }
 0x128   : > { %6075 = dma.done.wait (%p7750_p10), [#allocation10], 5120  }
 0x129   : > { %6077 = vsyncadd (%p7751_p11), [#allocation10], 4294962176  ;;  %p7752_p3 = pmov %p7749_p1 }
 0x12a   : > { %p7753_p12 = pmov %p7749_p1 }
 0x12b   : > { %6079 = dma.done.wait (%p7752_p3), [#allocation13], 4096  }
 0x12c   : > { %6081 = vsyncadd (%p7753_p12), [#allocation13], 4294963200  ;;  %p7754_p6 = pmov %p7749_p1 }
 0x12d   : > { %p7755_p13 = pmov %p7749_p1 }
 0x12e   : > { %6083 = dma.done.wait (%p7754_p6), [#allocation16], 1024  }
 0x12f   : > { %6085 = vsyncadd (%p7755_p13), [#allocation16], 4294966272  ;;  %v884_v0 = vld [vmem:[%s6560_s26] sm:$0xff]  ;;  %v885_v2 = vld [vmem:[%s6560_s26 + $0x8] sm:$0xff]  ;;  %v7690_v7 = vmov 0.0   ;;  %v7679_v43 = vmov 0  }
 0x130   : > { %v1192_v1 = vld [vmem:[%s6570_s18] sm:$0xff]  ;;  %894 = vadd.xlane.f32.xlu0 %v884_v0  ;;  %v1193_v3 = vld [vmem:[%s6570_s18 + $0x8] sm:$0xff]  ;;  %4786 = vmatprep.subr.bf16.mxu1 %v7690_v7  ;;  %vm6126_vm0 = vmmov 0   ;;  %vm1364_vm1 = vcmask 125952   ;;  %s5266_s9 = smul.u32 48, %s6556_s20  ;;  %vm1392_vm2 = vcmask 130048  }
 0x131   : > { %1194 = vadd.xlane.f32.xlu1 %v1192_v1  ;;  %v5398_v4 = vld [vmem:[#allocation9 + $0x4] ss:$8 sps:$4 sm:$0xff]   ;;  %v5400_v5 = vld [vmem:[#allocation9] ss:$8 sps:$4 sm:$0xff]   ;;  %v5401_v6 = vld [vmem:[#allocation9 + $0x14] ss:$8 sps:$4 sm:$0xff]   ;;  %1143 = vmatprep.mubr.bf16.mxu0 %v7679_v43 }
 0x132   : > { %1111 = vmatprep.subr.bf16.mxu0 %v5398_v4  ;;  %v6614_v24 = vld [vmem:[%s6560_s26 + $0x10] sm:$0xff]  ;;  %v6618_v25 = vld [vmem:[%s6560_s26 + $0x18] sm:$0xff]  ;;  %v6621_v26 = vld [vmem:[%s6560_s26 + $0x20] sm:$0xff]  ;;  %4802 = vmatprep.mubr.msk.bf16.mxu1 %vm6126_vm0, %v7690_v7  ;;  %s6759_s28 = scalar_lea.vmem [#allocation18], %s5266_s9  ;;  %s7757_s27 = sld [smem:[#allocation53_spill]] }
 0x133   : > { %1112 = vmatpush1.bf16.msra.mxu0 %v5400_v5  ;;  %v5403_v27 = vld [vmem:[#allocation9 + $0x10] ss:$8 sps:$4 sm:$0xff]   ;;  %v5404_v28 = vld [vmem:[#allocation8] sm:$0xff]   ;;  %v6626_v29 = vld [vmem:[%s6560_s26 + $0x28] sm:$0xff]  ;;  %s7758_s7 = sld [smem:[#allocation52_spill]]  ;;  %s7762_s16 = sld [smem:[#allocation58_spill]] }
 0x134   : > { %896 = vadd.xlane.f32.xlu0 %v885_v2  ;;  %1113 = vmatprep.subr.bf16.mxu0 %v5401_v6  ;;  %v5405_v30 = vld [vmem:[#allocation9 + $0x24] ss:$8 sps:$4 sm:$0xff]   ;;  %v5407_v31 = vld [vmem:[#allocation9 + $0x20] ss:$8 sps:$4 sm:$0xff]   ;;  %v6631_v33 = vld [vmem:[%s6560_s26 + $0x30] sm:$0xff]  ;;  %s7764_s6 = sld [smem:[#allocation59_spill]] }
 0x135   : > { %1196 = vadd.xlane.f32.xlu1 %v1193_v3  ;;  %4787 = vmatpush3.bf16.msra.mxu1 %v5404_v28  ;;  %v5408_v32 = vld [vmem:[#allocation8 + $0x8] sm:$0xff]   ;;  %v6634_v34 = vld [vmem:[%s6560_s26 + $0x38] sm:$0xff]  ;;  %v5412_v37 = vld [vmem:[#allocation8 + $0x10] sm:$0xff]   ;;  %s7774_s5 = sld [smem:[#allocation55_spill]]  ;;  %s7776_s4 = sld [smem:[#allocation57_spill]] }
 0x136   : > { %4788 = vmatprep.subr.bf16.mxu1 %v7690_v7  ;;  %v5409_v35 = vld [vmem:[#allocation9 + $0x34] ss:$8 sps:$4 sm:$0xff]   ;;  %v5411_v36 = vld [vmem:[#allocation9 + $0x30] ss:$8 sps:$4 sm:$0xff]   ;;  %v5413_v38 = vld [vmem:[#allocation9 + $0x44] ss:$8 sps:$4 sm:$0xff]  }
 0x137   : > { %1114 = vmatpush1.bf16.msra.mxu0 %v5403_v27  ;;  %v5415_v39 = vld [vmem:[#allocation9 + $0x40] ss:$8 sps:$4 sm:$0xff]   ;;  %v5416_v40 = vld [vmem:[#allocation8 + $0x18] sm:$0xff]   ;;  %v5421_v45 = vld [vmem:[#allocation9 + $0x64] ss:$8 sps:$4 sm:$0xff]   ;;  %s5267_s9 = smul.u32 768, %s6254_s2 }
 0x138   : > { %1115 = vmatprep.subr.bf16.mxu0 %v5405_v30  ;;  %v5417_v41 = vld [vmem:[#allocation9 + $0x54] ss:$8 sps:$4 sm:$0xff]   ;;  %v5419_v42 = vld [vmem:[#allocation9 + $0x50] ss:$8 sps:$4 sm:$0xff]   ;;  %v5420_v44 = vld [vmem:[#allocation8 + $0x20] sm:$0xff]   ;;  %s7797_s26 = sld [smem:[#allocation61_spill]] }
 0x139   : > { %4789 = vmatpush3.bf16.msra.mxu1 %v5408_v32  ;;  %v5423_v46 = vld [vmem:[#allocation9 + $0x60] ss:$8 sps:$4 sm:$0xff]   ;;  %v5425_v48 = vld [vmem:[#allocation9 + $0x74] ss:$8 sps:$4 sm:$0xff]   ;;  %v5427_v49 = vld [vmem:[#allocation9 + $0x70] ss:$8 sps:$4 sm:$0xff]  }
 0x13a   : > { %4790 = vmatprep.subr.bf16.mxu1 %v7690_v7  ;;  %v5424_v47 = vld [vmem:[#allocation8 + $0x28] sm:$0xff]   ;;  %v5428_v50 = vld [vmem:[#allocation8 + $0x30] sm:$0xff]   ;;  %v5429_v51 = vld [vmem:[#allocation8 + $0x38] sm:$0xff]   ;;  %p7798_p9 = scmp.ne.s32.totalorder %s7739_s11, 0  ;;  %s6127_s25 = smov [#allocation18]  }
 0x13b   : > { %1116 = vmatpush1.bf16.msra.mxu0 %v5407_v31  ;;  %v4491_v31 = vld [vmem:[%s7648_s14] ss:$0 sm:$0xff]  ;;  %s5994_s8 = sshll.u32 %s6127_s25, 4  ;;  %s5995_s8 = int_to_ptr.vmem [resolvable:$false] %s5994_s8 }
 0x13c   : > { %1117 = vmatprep.subr.bf16.mxu0 %v5409_v35  ;;  %s5996_s24 = scalar_lea.vmem %s5995_s8, 1536 }
 0x13d   : > { %4791 = vmatpush3.bf16.msra.mxu1 %v5412_v37 }
 0x13e   : > { %4792 = vmatprep.subr.bf16.mxu1 %v7690_v7  ;;  %s7548_s10 = scalar_lea.hbm %s7797_s26, %s5267_s9 }
 0x13f   : > { %1118 = vmatpush1.bf16.msra.mxu0 %v5411_v36 }
 0x140   : > { %1119 = vmatprep.subr.bf16.mxu0 %v5413_v38 }
 0x141   : > { %4793 = vmatpush3.bf16.msra.mxu1 %v5416_v40 }
 0x142   : > { %4794 = vmatprep.subr.bf16.mxu1 %v7690_v7 }
 0x143   : > { %1120 = vmatpush1.bf16.msra.mxu0 %v5415_v39 }
 0x144   : > { %1121 = vmatprep.subr.bf16.mxu0 %v5417_v41 }
 0x145   : > { %4795 = vmatpush3.bf16.msra.mxu1 %v5420_v44 }
 0x146   : > { %4796 = vmatprep.subr.bf16.mxu1 %v7690_v7 }
 0x147   : > { %1122 = vmatpush1.bf16.msra.mxu0 %v5419_v42 }
 0x148   : > { %1123 = vmatprep.subr.bf16.mxu0 %v5421_v45 }
 0x149   : > { %4797 = vmatpush3.bf16.msra.mxu1 %v5424_v47 }
 0x14a   : > { %4798 = vmatprep.subr.bf16.mxu1 %v7690_v7 }
 0x14b   : > { %1124 = vmatpush1.bf16.msra.mxu0 %v5423_v46 }
 0x14c   : > { %1125 = vmatprep.subr.bf16.mxu0 %v5425_v48 }
 0x14d   : > { %4799 = vmatpush3.bf16.msra.mxu1 %v5428_v50 }
 0x14e   : > { %4800 = vmatprep.subr.bf16.mxu1 %v7690_v7 }
 0x14f   : > { %1126 = vmatpush1.bf16.msra.mxu0 %v5427_v49 }
 0x150   : > { %4824 = vmatprep.subr.bf16.mxu0 %v7690_v7 }
 0x151   : > { %4801 = vmatpush3.bf16.msra.mxu1 %v5429_v51 }
 0x152   : > { %4806 = vmatprep.subr.bf16.mxu1 %v7690_v7 }
 0x1bd   : > { %v895_v8 = vpop.xlane.xlu0 %894 }
 0x1be   : > { %v1195_v9 = vpop.xlane.xlu1 %1194  ;;  %v911_v10 = vmul.f32 0.0078125, %v895_v8 }
 0x1bf   : > { %v1198_v11 = vmul.f32 0.0078125, %v1195_v9 }
 0x1c0   : > { %v6597_v12 = vsub.f32 %v884_v0, %v911_v10 }
 0x1c1   : > { %v6599_v13 = vsub.f32 %v1192_v1, %v1198_v11  ;;  %v897_v14 = vpop.xlane.xlu0 %896 }
 0x1c2   : > { %v1197_v15 = vpop.xlane.xlu1 %1196  ;;  %v912_v16 = vmul.f32 0.0078125, %v897_v14  ;;  %v927_v17 = vmul.f32 %v6597_v12, %v6597_v12  ;;  %v6663_v14 = vld [vmem:[%s7646_s12] ss:$0 sm:$0xff] }
 0x1c3   : > { %v1199_v18 = vmul.f32 0.0078125, %v1197_v15  ;;  %v1202_v21 = vmul.f32 %v6599_v13, %v6599_v13 }
 0x1c4   : > { %v6603_v19 = vsub.f32 %v885_v2, %v912_v16  ;;  %935 = vadd.xlane.f32.xlu0 %v927_v17 }
 0x1c5   : > { %v6605_v20 = vsub.f32 %v1193_v3, %v1199_v18 }
 0x1c6   : > { %v928_v22 = vmul.f32 %v6603_v19, %v6603_v19 }
 0x1c7   : > { %v1203_v23 = vmul.f32 %v6605_v20, %v6605_v20 }
 0x1c8   : > { %1204 = vadd.xlane.f32.xlu0 %v1202_v21  ;;  %937 = vadd.xlane.f32.xlu1 %v928_v22 }
 0x1cc   : > { %1206 = vadd.xlane.f32.xlu1 %v1203_v23  ;;  %898 = vadd.xlane.f32.xlu0 %v6614_v24 }
 0x1d0   : > { %900 = vadd.xlane.f32.xlu1 %v6618_v25  ;;  %902 = vadd.xlane.f32.xlu0 %v6621_v26 }
 0x1d4   : > { %904 = vadd.xlane.f32.xlu1 %v6626_v29  ;;  %906 = vadd.xlane.f32.xlu0 %v6631_v33 }
 0x1d8   : > { %908 = vadd.xlane.f32.xlu1 %v6634_v34 }
 0x251   : > { %v936_v52 = vpop.xlane.xlu0 %935 }
 0x252   : > { %v951_v53 = vmul.f32 0.0078125, %v936_v52 }
 0x254   : > { %v959_v54 = vadd.f32 1e-05, %v951_v53 }
 0x255   : > { %v938_v55 = vpop.xlane.xlu1 %937  ;;  %v1205_v56 = vpop.xlane.xlu0 %1204 }
 0x256   : > { %5510 = vrsqrt.f32 %v959_v54  ;;  %v952_v57 = vmul.f32 0.0078125, %v938_v55  ;;  %v1208_v58 = vmul.f32 0.0078125, %v1205_v56 }
 0x258   : > { %v960_v59 = vadd.f32 1e-05, %v952_v57  ;;  %v1210_v60 = vadd.f32 1e-05, %v1208_v58 }
 0x259   : > { %v1207_v61 = vpop.xlane.xlu1 %1206  ;;  %v899_v62 = vpop.xlane.xlu0 %898 }
 0x25a   : > { %5512 = vrsqrt.f32 %v960_v59  ;;  %v1209_v63 = vmul.f32 0.0078125, %v1207_v61  ;;  %v913_v0 = vmul.f32 0.0078125, %v899_v62 }
 0x25b   : > { %5514 = vrsqrt.f32 %v1210_v60 }
 0x25c   : > { %v1211_v1 = vadd.f32 1e-05, %v1209_v63  ;;  %v6650_v2 = vsub.f32 %v6614_v24, %v913_v0 }
 0x25d   : > { %v901_v3 = vpop.xlane.xlu1 %900  ;;  %v903_v4 = vpop.xlane.xlu0 %902 }
 0x25e   : > { %5516 = vrsqrt.f32 %v1211_v1  ;;  %v914_v5 = vmul.f32 0.0078125, %v901_v3  ;;  %v929_v6 = vmul.f32 %v6650_v2, %v6650_v2  ;;  %v915_v8 = vmul.f32 0.0078125, %v903_v4 }
 0x260   : > { %v5511_v9 = vpop.eup %5510  ;;  %v6655_v10 = vsub.f32 %v6618_v25, %v914_v5  ;;  %939 = vadd.xlane.f32.xlu0 %v929_v6  ;;  %v6658_v11 = vsub.f32 %v6621_v26, %v915_v8 }
 0x261   : > { %v975_v15 = vmul.f32 %v5511_v9, %v6597_v12  ;;  %v905_v16 = vpop.xlane.xlu1 %904  ;;  %v907_v25 = vpop.xlane.xlu0 %906  ;;  %v6677_v12 = vld [vmem:[%s7647_s13] ss:$0 sm:$0xff] }
 0x262   : > { %v930_v17 = vmul.f32 %v6655_v10, %v6655_v10  ;;  %v916_v18 = vmul.f32 0.0078125, %v905_v16  ;;  %v931_v21 = vmul.f32 %v6658_v11, %v6658_v11  ;;  %v917_v30 = vmul.f32 0.0078125, %v907_v25 }
 0x263   : > { %v989_v23 = vmul.f32 %v6663_v14, %v975_v15 }
 0x264   : > { %v5513_v22 = vpop.eup %5512  ;;  %941 = vadd.xlane.f32.xlu1 %v930_v17  ;;  %v6672_v24 = vsub.f32 %v6626_v29, %v916_v18  ;;  %943 = vadd.xlane.f32.xlu0 %v931_v21  ;;  %v6688_v37 = vsub.f32 %v6631_v33, %v917_v30  ;;  %v4492_v33 = vld [vmem:[%s7649_s15] ss:$0 sm:$0xff] }
 0x265   : > { %v5515_v26 = vpop.eup %5514  ;;  %v976_v27 = vmul.f32 %v5513_v22, %v6603_v19  ;;  %v909_v28 = vpop.xlane.xlu1 %908  ;;  %v1003_v19 = vadd.f32 %v6677_v12, %v989_v23 }
 0x266   : > { %v1214_v32 = vmul.f32 %v5515_v26, %v6599_v13  ;;  %v932_v29 = vmul.f32 %v6672_v24, %v6672_v24  ;;  %v918_v35 = vmul.f32 0.0078125, %v909_v28  ;;  %v933_v42 = vmul.f32 %v6688_v37, %v6688_v37 }
 0x267   : > { %v990_v36 = vmul.f32 %v6663_v14, %v976_v27 }
 0x268   : > { %v5517_v38 = vpop.eup %5516  ;;  %945 = vadd.xlane.f32.xlu1 %v932_v29  ;;  %v6692_v39 = vsub.f32 %v6634_v34, %v918_v35  ;;  %v1222_v41 = vmul.f32 %v4491_v31, %v1214_v32  ;;  %947 = vadd.xlane.f32.xlu0 %v933_v42 }
 0x269   : > { %v1004_v40 = vadd.f32 %v6677_v12, %v990_v36  ;;  %v1215_v13 = vmul.f32 %v5517_v38, %v6605_v20 }
 0x26a   : > { %v934_v44 = vmul.f32 %v6692_v39, %v6692_v39  ;;  %v1230_v34 = vadd.f32 %v4492_v33, %v1222_v41 }
 0x26b   : > { %v1011_v45 = vpack.c.bf16 %v1004_v40, %v1003_v19  ;;  %v1223_v46 = vmul.f32 %v4491_v31, %v1215_v13 }
 0x26c   : > { %949 = vadd.xlane.f32.xlu1 %v934_v44 }
 0x26d   : > { %1144 = vmatmul.mubr.bf16.vlgmr.msra.gmra.mrb[0].mxu0 %v1011_v45  ;;  %v1231_v47 = vadd.f32 %v4492_v33, %v1223_v46 }
 0x26e   : > { %1153 = vmatprep.mubr.bf16.mxu0 %v7679_v43 }
 0x26f   : > { %v1232_v20 = vpack.c.bf16 %v1231_v47, %v1230_v34 }
 0x271   : > { %4803 = vmatmul.mubr.bf16.vlgmr.msra.gmra.mrb[0].mxu1 %v1232_v20 }
 0x272   : > { %4808 = vmatprep.mubr.msk.bf16.mxu1 %vm6126_vm0, %v7690_v7 }
 0x2ed   : > { %v940_v48 = vpop.xlane.xlu0 %939 }
 0x2ee   : > { %v953_v49 = vmul.f32 0.0078125, %v940_v48 }
 0x2f0   : > { %v961_v50 = vadd.f32 1e-05, %v953_v49 }
 0x2f1   : > { %v942_v51 = vpop.xlane.xlu1 %941  ;;  %v944_v52 = vpop.xlane.xlu0 %943 }
 0x2f2   : > { %v954_v53 = vmul.f32 0.0078125, %v942_v51  ;;  %5518 = vrsqrt.f32 %v961_v50  ;;  %v955_v54 = vmul.f32 0.0078125, %v944_v52 }
 0x2f4   : > { %v962_v55 = vadd.f32 1e-05, %v954_v53  ;;  %v963_v56 = vadd.f32 1e-05, %v955_v54 }
 0x2f5   : > { %v946_v57 = vpop.xlane.xlu1 %945  ;;  %v948_v60 = vpop.xlane.xlu0 %947 }
 0x2f6   : > { %5520 = vrsqrt.f32 %v962_v55  ;;  %v956_v58 = vmul.f32 0.0078125, %v946_v57  ;;  %v957_v62 = vmul.f32 0.0078125, %v948_v60 }
 0x2f7   : > { %5522 = vrsqrt.f32 %v963_v56 }
 0x2f8   : > { %v964_v59 = vadd.f32 1e-05, %v956_v58  ;;  %v965_v0 = vadd.f32 1e-05, %v957_v62 }
 0x2f9   : > { %v950_v61 = vpop.xlane.xlu1 %949 }
 0x2fa   : > { %5524 = vrsqrt.f32 %v964_v59  ;;  %v958_v63 = vmul.f32 0.0078125, %v950_v61 }
 0x2fb   : > { %5526 = vrsqrt.f32 %v965_v0 }
 0x2fc   : > { %v5519_v1 = vpop.eup %5518  ;;  %v966_v3 = vadd.f32 1e-05, %v958_v63 }
 0x2fd   : > { %v977_v4 = vmul.f32 %v5519_v1, %v6650_v2 }
 0x2fe   : > { %5528 = vrsqrt.f32 %v966_v3 }
 0x2ff   : > { %v991_v5 = vmul.f32 %v6663_v14, %v977_v4 }
 0x300   : > { %v5521_v6 = vpop.eup %5520 }
 0x301   : > { %v5523_v8 = vpop.eup %5522  ;;  %v978_v9 = vmul.f32 %v5521_v6, %v6655_v10  ;;  %v1005_v17 = vadd.f32 %v6677_v12, %v991_v5 }
 0x302   : > { %v979_v15 = vmul.f32 %v5523_v8, %v6658_v11 }
 0x303   : > { %v992_v16 = vmul.f32 %v6663_v14, %v978_v9 }
 0x304   : > { %v5525_v18 = vpop.eup %5524  ;;  %v993_v2 = vmul.f32 %v6663_v14, %v979_v15 }
 0x305   : > { %v1006_v21 = vadd.f32 %v6677_v12, %v992_v16  ;;  %v980_v22 = vmul.f32 %v5525_v18, %v6672_v24  ;;  %v5527_v23 = vpop.eup %5526 }
 0x306   : > { %v1007_v10 = vadd.f32 %v6677_v12, %v993_v2  ;;  %v981_v28 = vmul.f32 %v5527_v23, %v6688_v37 }
 0x307   : > { %v1012_v25 = vpack.c.bf16 %v1006_v21, %v1005_v17  ;;  %v994_v26 = vmul.f32 %v6663_v14, %v980_v22 }
 0x308   : > { %v5529_v27 = vpop.eup %5528  ;;  %v995_v24 = vmul.f32 %v6663_v14, %v981_v28 }
 0x309   : > { %1154 = vmatmul.mubr.bf16.gmra.mrb[4].mxu0 %v1012_v25  ;;  %v1008_v11 = vadd.f32 %v6677_v12, %v994_v26  ;;  %v982_v30 = vmul.f32 %v5529_v27, %v6692_v39 }
 0x30a   : > { %1163 = vmatprep.mubr.bf16.mxu0 %v7679_v43  ;;  %v1009_v29 = vadd.f32 %v6677_v12, %v995_v24 }
 0x30b   : > { %v1013_v31 = vpack.c.bf16 %v1008_v11, %v1007_v10  ;;  %v996_v32 = vmul.f32 %v6663_v14, %v982_v30 }
 0x30d   : > { %v1010_v35 = vadd.f32 %v6677_v12, %v996_v32 }
 0x30f   : > { %v1014_v36 = vpack.c.bf16 %v1010_v35, %v1009_v29 }
 0x311   : > { %1164 = vmatmul.mubr.bf16.gmra.mrb[8].mxu0 %v1013_v31 }
 0x312   : > { %1173 = vmatprep.mubr.bf16.mxu0 %v7679_v43 }
 0x319   : > { %1174 = vmatmul.mubr.bf16.gmra.mrb[12].mxu0 %v1014_v36 }
 0x31a   : > { %4826 = vmatprep.mubr.msk.bf16.mxu0 %vm6126_vm0, %v7690_v7 }
 0x340   : > { %v1145_v37 = vpop.f32.mrb[0].mxu0 }
 0x341   : > { %v1147_v38 = vpop.f32.mrb[1].mxu0 }
 0x342   : > { %v1149_v19 = vpop.f32.mrb[2].mxu0 }
 0x343   : > { %v6728_v39 = vpack.c.bf16 %v1149_v19, %v1145_v37  ;;  %v1151_v40 = vpop.f32.mrb[3].mxu0 }
 0x344   : > { %v6730_v13 = vpack.c.bf16 %v1151_v40, %v1147_v38  ;;  %v1315_v14 = vpop.f32.mrb[0].mxu1 }
 0x345   : > { %7756 = vst [vmem:[#allocation30_spill] sm:$0xff] %v6728_v39  ;;  %v4804_v41 = vpop.f32.mrb[1].mxu1  ;;  %4807 = vmatpush3.bf16.xpose.msra.mxu1 %v6728_v39 }
 0x346   : > { %v1318_v12 = vpop.f32.mrb[2].mxu1  ;;  %4812 = vmatprep.subr.bf16.mxu1 %v7690_v7 }
 0x347   : > { %v6734_v42 = vpack.c.bf16 %v1318_v12, %v1315_v14  ;;  %v4805_v33 = vpop.f32.mrb[3].mxu1 }
 0x349   : > { %v1438_v29 = vrot.slane %v6734_v42, 2  ;;  %v1553_v35 = vrot.slane %v6734_v42, 4  ;;  %v1668_v36 = vrot.slane %v6734_v42, 6 }
 0x34c   : > { %4809 = vmatmul.mubr.bf16.vlgmr.msra.gmra.mrb[4].mxu1 %v6734_v42 }
 0x34d   : > { %4813 = vmatpush3.bf16.msra.mxu1 %v6730_v13  ;;  %4814 = vmatprep.mubr.msk.bf16.mxu1 %vm6126_vm0, %v7690_v7 }
 0x34e   : > { %4818 = vmatprep.subr.bf16.mxu1 %v7690_v7 }
 0x3dc   : > { %v1155_v44 = vpop.f32.mrb[4].mxu0 }
 0x3dd   : > { %v1157_v45 = vpop.f32.mrb[5].mxu0 }
 0x3de   : > { %v1159_v46 = vpop.f32.mrb[6].mxu0 }
 0x3df   : > { %v6741_v34 = vpack.c.bf16 %v1159_v46, %v1155_v44  ;;  %v1161_v47 = vpop.f32.mrb[7].mxu0 }
 0x3e0   : > { %v6743_v20 = vpack.c.bf16 %v1161_v47, %v1157_v45 }
 0x3e2   : > { %4825 = vmatpush3.bf16.msra.mxu0 %v6743_v20 }
 0x3e3   : > { %4836 = vmatprep.subr.bf16.mxu0 %v7690_v7 }
 0x3e4   : > { %v1165_v48 = vpop.f32.mrb[8].mxu0 }
 0x3e5   : > { %v1167_v49 = vpop.f32.mrb[9].mxu0 }
 0x3e6   : > { %v1169_v50 = vpop.f32.mrb[10].mxu0 }
 0x3e7   : > { %v6747_v51 = vpack.c.bf16 %v1169_v50, %v1165_v48  ;;  %v1171_v52 = vpop.f32.mrb[11].mxu0 }
 0x3e8   : > { %v6749_v53 = vpack.c.bf16 %v1171_v52, %v1167_v49 }
 0x3ec   : > { %v1175_v54 = vpop.f32.mrb[12].mxu0 }
 0x3ed   : > { %v1177_v55 = vpop.f32.mrb[13].mxu0 }
 0x3ee   : > { %v1179_v56 = vpop.f32.mrb[14].mxu0 }
 0x3ef   : > { %v6751_v57 = vpack.c.bf16 %v1179_v56, %v1175_v54  ;;  %v1181_v58 = vpop.f32.mrb[15].mxu0 }
 0x3f0   : > { %v6753_v59 = vpack.c.bf16 %v1181_v58, %v1177_v55 }
 0x41f   : > { %v1357_v60 = vpop.f32.mrb[4].mxu1 }
 0x420   : > { %v1363_v61 = vmul.f32 0.088388346, %v1357_v60  ;;  %v4810_v62 = vpop.f32.mrb[5].mxu1 }
 0x421   : > { %v1360_v63 = vpop.f32.mrb[6].mxu1 }
 0x422   : > { %v1365_v0 = vsel %vm1364_vm1, %v1363_v61, -inf  ;;  %v4811_v1 = vpop.f32.mrb[7].mxu1 }
 0x423   : > { %v1366_v3 = vrot.slane %v1365_v0, 4 }
 0x425   : > { %v1367_v4 = vmax.f32 %v1365_v0, %v1366_v3 }
 0x427   : > { %v1368_v5 = vrot.slane %v1367_v4, 2 }
 0x429   : > { %v1369_v6 = vmax.f32 %v1367_v4, %v1368_v5 }
 0x42b   : > { %v1370_v8 = vrot.slane %v1369_v6, 1 }
 0x42d   : > { %v1371_v9 = vmax.f32 %v1369_v6, %v1370_v8 }
 0x42f   : > { %v1372_v15 = vsub.f32 %v1363_v61, %v1371_v9 }
 0x431   : > { %v1373_v16 = vmul.f32 1.442695, %v1372_v15 }
 0x433   : > { %5530 = vpow2.f32 %v1373_v16 }
 0x43d   : > { %v5531_v17 = vpop.eup %5530 }
 0x43e   : > { %v1375_v18 = vsel %vm1364_vm1, %v5531_v17, 0.0 }
 0x43f   : > { %v1376_v21 = vrot.slane %v1375_v18, 4 }
 0x441   : > { %v1377_v22 = vadd.f32 %v1376_v21, %v1375_v18 }
 0x443   : > { %v1378_v2 = vrot.slane %v1377_v22, 2 }
 0x445   : > { %v1379_v23 = vadd.f32 %v1378_v2, %v1377_v22 }
 0x447   : > { %v1380_v25 = vrot.slane %v1379_v23, 1 }
 0x449   : > { %v1381_v26 = vadd.f32 %v1380_v25, %v1379_v23 }
 0x44b   : > { %5532 = vrcp.f32 %v1381_v26 }
 0x455   : > { %v5533_v27 = vpop.eup %5532 }
 0x456   : > { %v1383_v10 = vmul.f32 %v5533_v27, %v5531_v17 }
 0x458   : > { %v1384_v11 = vadd.f32 1e-08, %v1383_v10 }
 0x45a   : > { %v1386_v28 = vsel %vm1364_vm1, %v1384_v11, 0.0  ;;  %1385 = vst.msk [vmem:[%s6759_s28] sm:$0xf] %vm1364_vm1, %v1384_v11 }
 0x45b   : > { %1387 = vadd.xlane.f32.xlu0 %v1386_v28 }
 0x4e8   : > { %v1388_v30 = vpop.xlane.xlu0 %1387 }
 0x4e9   : > { %5534 = vrcp.f32 %v1388_v30 }
 0x4f3   : > { %v5535_v31 = vpop.eup %5534 }
 0x4f4   : > { %v1390_v24 = vmul.f32 %v5535_v31, %v1384_v11 }
 0x4f6   : > { %v1391_v32 = vpack.c.bf16 %v1390_v24, %v1390_v24 }
 0x4f8   : > { %4815 = vmatmul.mubr.msk.bf16.vlgmr.msra.gmra.mrb[8].mxu1 %vm1392_vm2, %v1391_v32 }
 0x4f9   : > { %4819 = vmatpush3.bf16.xpose.msra.mxu1 %v6741_v34  ;;  %4820 = vmatprep.mubr.msk.bf16.mxu1 %vm6126_vm0, %v7690_v7 }
 0x4fa   : > { %4830 = vmatprep.subr.bf16.mxu1 %v7690_v7 }
 0x500   : > { %4821 = vmatmul.mubr.bf16.vlgmr.msra.gmra.mrb[12].mxu1 %v1438_v29 }
 0x501   : > { %4831 = vmatpush3.bf16.xpose.msra.mxu1 %v6747_v51  ;;  %4832 = vmatprep.mubr.msk.bf16.mxu1 %vm6126_vm0, %v7690_v7 }
 0x502   : > { %4842 = vmatprep.subr.bf16.mxu1 %v7690_v7 }
 0x508   : > { %4833 = vmatmul.mubr.bf16.vlgmr.msra.gmra.mrb[16].mxu1 %v1553_v35 }
 0x509   : > { %4843 = vmatpush3.bf16.xpose.msra.mxu1 %v6751_v57  ;;  %4844 = vmatprep.mubr.msk.bf16.mxu1 %vm6126_vm0, %v7690_v7 }
 0x510   : > { %4845 = vmatmul.mubr.bf16.vlgmr.msra.gmra.mrb[20].mxu1 %v1668_v36 }
 0x511   : > { %1962 = vmatprep.mubr.bf16.mxu1 %v7679_v43 }
 0x5cb   : > { %v1430_v37 = vpop.f32.mrb[8].mxu1 }
 0x5cc   : > { %1436 = vst [vmem:[#allocation2] sm:$0xf] %v1430_v37  ;;  %v4816_v38 = vpop.f32.mrb[9].mxu1 }
 0x5cd   : > { %v1433_v19 = vpop.f32.mrb[10].mxu1 }
 0x5ce   : > { %v4817_v40 = vpop.f32.mrb[11].mxu1 }
 0x5d3   : > { %v1474_v14 = vpop.f32.mrb[12].mxu1 }
 0x5d4   : > { %v1480_v41 = vmul.f32 0.088388346, %v1474_v14  ;;  %v4822_v12 = vpop.f32.mrb[13].mxu1 }
 0x5d5   : > { %v1477_v33 = vpop.f32.mrb[14].mxu1 }
 0x5d6   : > { %v1481_v44 = vsel %vm1364_vm1, %v1480_v41, -inf  ;;  %v4823_v45 = vpop.f32.mrb[15].mxu1 }
 0x5d7   : > { %v1482_v46 = vrot.slane %v1481_v44, 4 }
 0x5d9   : > { %v1483_v47 = vmax.f32 %v1481_v44, %v1482_v46 }
 0x5db   : > { %v1484_v48 = vrot.slane %v1483_v47, 2  ;;  %v1589_v49 = vpop.f32.mrb[16].mxu1 }
 0x5dc   : > { %v1595_v42 = vmul.f32 0.088388346, %v1589_v49  ;;  %v4834_v50 = vpop.f32.mrb[17].mxu1 }
 0x5dd   : > { %v1485_v52 = vmax.f32 %v1483_v47, %v1484_v48  ;;  %v1592_v54 = vpop.f32.mrb[18].mxu1 }
 0x5de   : > { %v1596_v55 = vsel %vm1364_vm1, %v1595_v42, -inf  ;;  %v4835_v56 = vpop.f32.mrb[19].mxu1 }
 0x5df   : > { %v1486_v58 = vrot.slane %v1485_v52, 1  ;;  %v1597_v60 = vrot.slane %v1596_v55, 4 }
 0x5e1   : > { %v1487_v61 = vmax.f32 %v1485_v52, %v1486_v58  ;;  %v1598_v62 = vmax.f32 %v1596_v55, %v1597_v60 }
 0x5e3   : > { %v1488_v63 = vsub.f32 %v1480_v41, %v1487_v61  ;;  %v1599_v0 = vrot.slane %v1598_v62, 2  ;;  %v1704_v1 = vpop.f32.mrb[20].mxu1 }
 0x5e4   : > { %v1710_v3 = vmul.f32 0.088388346, %v1704_v1  ;;  %v4846_v4 = vpop.f32.mrb[21].mxu1 }
 0x5e5   : > { %v1489_v5 = vmul.f32 1.442695, %v1488_v63  ;;  %v1600_v6 = vmax.f32 %v1598_v62, %v1599_v0  ;;  %v1707_v8 = vpop.f32.mrb[22].mxu1  ;;  %v6794_v4 = vld [vmem:[#allocation11] ss:$12 sps:$4 sm:$0xff]  }
 0x5e6   : > { %v1711_v9 = vsel %vm1364_vm1, %v1710_v3, -inf  ;;  %v4847_v15 = vpop.f32.mrb[23].mxu1  ;;  %v6802_v8 = vld [vmem:[#allocation11 + $0x18] ss:$12 sps:$4 sm:$0xff]  }
 0x5e7   : > { %5536 = vpow2.f32 %v1489_v5  ;;  %v1601_v16 = vrot.slane %v1600_v6, 1  ;;  %v1712_v17 = vrot.slane %v1711_v9, 4  ;;  %v6796_v5 = vld [vmem:[#allocation11 + $0x4] ss:$12 sps:$4 sm:$0xff]  }
 0x5e8   : > { %1930 = vmatprep.subr.bf16.mxu1 %v6796_v5 }
 0x5e9   : > { %v1602_v18 = vmax.f32 %v1600_v6, %v1601_v16  ;;  %v1713_v21 = vmax.f32 %v1711_v9, %v1712_v17  ;;  %v6798_v6 = vld [vmem:[#allocation11 + $0x1c] ss:$12 sps:$4 sm:$0xff]   ;;  %1931 = vmatpush1.bf16.msra.mxu1 %v6794_v4 }
 0x5ea   : > { %1932 = vmatprep.subr.bf16.mxu1 %v6798_v6 }
 0x5eb   : > { %v1603_v22 = vsub.f32 %v1595_v42, %v1602_v18  ;;  %v1714_v2 = vrot.slane %v1713_v21, 2 }
 0x5ed   : > { %v1604_v23 = vmul.f32 1.442695, %v1603_v22  ;;  %v1715_v25 = vmax.f32 %v1713_v21, %v1714_v2  ;;  %1933 = vmatpush1.bf16.msra.mxu1 %v6802_v8 }
 0x5ef   : > { %5538 = vpow2.f32 %v1604_v23  ;;  %v1716_v26 = vrot.slane %v1715_v25, 1 }
 0x5f1   : > { %v5537_v27 = vpop.eup %5536  ;;  %v1717_v10 = vmax.f32 %v1715_v25, %v1716_v26 }
 0x5f2   : > { %v1491_v11 = vsel %vm1364_vm1, %v5537_v27, 0.0 }
 0x5f3   : > { %v1492_v28 = vrot.slane %v1491_v11, 4  ;;  %v1718_v30 = vsub.f32 %v1710_v3, %v1717_v10 }
 0x5f5   : > { %v1493_v31 = vadd.f32 %v1492_v28, %v1491_v11  ;;  %v1719_v24 = vmul.f32 1.442695, %v1718_v30  ;;  %v5437_v11 = vld [vmem:[#allocation11 + $0x20] ss:$12 sps:$4 sm:$0xff]   ;;  %v6822_v30 = vld [vmem:[#allocation11 + $0x30] ss:$12 sps:$4 sm:$0xff]  }
 0x5f6   : > { %v6820_v28 = vld [vmem:[#allocation11 + $0x34] ss:$12 sps:$4 sm:$0xff]  }
 0x5f7   : > { %v1494_v32 = vrot.slane %v1493_v31, 2  ;;  %5540 = vpow2.f32 %v1719_v24  ;;  %1934 = vmatprep.subr.bf16.mxu1 %v6820_v28  ;;  %v6826_v24 = vld [vmem:[#allocation11 + $0x4c] ss:$12 sps:$4 sm:$0xff]  }
 0x5f8   : > { %1935 = vmatpush1.bf16.msra.mxu1 %v6822_v30 }
 0x5f9   : > { %v5539_v29 = vpop.eup %5538  ;;  %v1495_v35 = vadd.f32 %v1494_v32, %v1493_v31  ;;  %v5441_v31 = vld [vmem:[#allocation11 + $0x38] ss:$12 sps:$4 sm:$0xff]   ;;  %v6829_v32 = vld [vmem:[#allocation11 + $0x48] ss:$12 sps:$4 sm:$0xff]   ;;  %1936 = vmatprep.subr.bf16.mxu1 %v6826_v24 }
 0x5fa   : > { %v1606_v36 = vsel %vm1364_vm1, %v5539_v29, 0.0 }
 0x5fb   : > { %v1607_v37 = vrot.slane %v1606_v36, 4  ;;  %v1496_v38 = vrot.slane %v1495_v35, 1 }
 0x5fc   : > { %1937 = vmatpush1.bf16.msra.mxu1 %v6829_v32 }
 0x5fd   : > { %v1608_v19 = vadd.f32 %v1607_v37, %v1606_v36  ;;  %v1497_v40 = vadd.f32 %v1496_v38, %v1495_v35  ;;  %v6834_v35 = vld [vmem:[#allocation11 + $0x64] ss:$12 sps:$4 sm:$0xff]   ;;  %v6836_v36 = vld [vmem:[#allocation11 + $0x60] ss:$12 sps:$4 sm:$0xff]   ;;  %v5449_v37 = vld [vmem:[#allocation11 + $0x68] ss:$12 sps:$4 sm:$0xff]  }
 0x5fe   : > { %1938 = vmatprep.subr.bf16.mxu1 %v6834_v35  ;;  %v6840_v38 = vld [vmem:[#allocation11 + $0x7c] ss:$12 sps:$4 sm:$0xff]  }
 0x5ff   : > { %v1609_v14 = vrot.slane %v1608_v19, 2  ;;  %5542 = vrcp.f32 %v1497_v40  ;;  %v5453_v40 = vld [vmem:[#allocation11 + $0x80] ss:$12 sps:$4 sm:$0xff]  }
 0x600   : > { %1939 = vmatpush1.bf16.msra.mxu1 %v6836_v36 }
 0x601   : > { %v5541_v41 = vpop.eup %5540  ;;  %v1610_v12 = vadd.f32 %v1609_v14, %v1608_v19  ;;  %v6843_v19 = vld [vmem:[#allocation11 + $0x78] ss:$12 sps:$4 sm:$0xff]   ;;  %1940 = vmatprep.subr.bf16.mxu1 %v6840_v38  ;;  %v6848_v14 = vld [vmem:[#allocation11 + $0x94] ss:$12 sps:$4 sm:$0xff]  }
 0x602   : > { %v1721_v33 = vsel %vm1364_vm1, %v5541_v41, 0.0 }
 0x603   : > { %v1722_v44 = vrot.slane %v1721_v33, 4  ;;  %v1611_v45 = vrot.slane %v1610_v12, 1 }
 0x604   : > { %1941 = vmatpush1.bf16.msra.mxu1 %v6843_v19 }
 0x605   : > { %v1723_v46 = vadd.f32 %v1722_v44, %v1721_v33  ;;  %v1612_v47 = vadd.f32 %v1611_v45, %v1610_v12  ;;  %1942 = vmatprep.subr.bf16.mxu1 %v6848_v14  ;;  %v5457_v12 = vld [vmem:[#allocation11 + $0x98] ss:$12 sps:$4 sm:$0xff]   ;;  %v6857_v44 = vld [vmem:[#allocation11 + $0xa8] ss:$12 sps:$4 sm:$0xff]   ;;  %v5461_v45 = vld [vmem:[#allocation11 + $0xb0] ss:$12 sps:$4 sm:$0xff]  }
 0x606   : > { %v6854_v33 = vld [vmem:[#allocation11 + $0xac] ss:$12 sps:$4 sm:$0xff]  }
 0x607   : > { %v1724_v48 = vrot.slane %v1723_v46, 2  ;;  %5544 = vrcp.f32 %v1612_v47 }
 0x609   : > { %v5543_v49 = vpop.eup %5542  ;;  %v1725_v42 = vadd.f32 %v1724_v48, %v1723_v46  ;;  %v6860_v46 = vld [vmem:[#allocation12 + $0x4] ss:$12 sps:$4 sm:$0xff]  }
 0x60a   : > { %v1499_v50 = vmul.f32 %v5543_v49, %v5537_v27  ;;  %v5433_v27 = vld [vmem:[#allocation11 + $0x8] ss:$12 sps:$4 sm:$0xff]  }
 0x60b   : > { %v1726_v52 = vrot.slane %v1725_v42, 1 }
 0x60c   : > { %v1500_v54 = vadd.f32 1e-08, %v1499_v50 }
 0x60d   : > { %v1727_v55 = vadd.f32 %v1726_v52, %v1725_v42 }
 0x60e   : > { %v1503_v56 = vsel %vm1364_vm1, %v1500_v54, 0.0  ;;  %4502 = vst.msk [vmem:[%s6759_s28 + $0xc] sm:$0xf] %vm1364_vm1, %v1500_v54 }
 0x60f   : > { %1504 = vadd.xlane.f32.xlu1 %v1503_v56  ;;  %5546 = vrcp.f32 %v1727_v55 }
 0x611   : > { %v5545_v58 = vpop.eup %5544 }
 0x612   : > { %v1614_v60 = vmul.f32 %v5545_v58, %v5539_v29  ;;  %v5445_v29 = vld [vmem:[#allocation11 + $0x50] ss:$12 sps:$4 sm:$0xff]  }
 0x614   : > { %v1615_v61 = vadd.f32 1e-08, %v1614_v60 }
 0x616   : > { %v1618_v62 = vsel %vm1364_vm1, %v1615_v61, 0.0  ;;  %4504 = vst.msk [vmem:[%s6759_s28 + $0x18] sm:$0xf] %vm1364_vm1, %v1615_v61 }
 0x617   : > { %1619 = vadd.xlane.f32.xlu0 %v1618_v62  ;;  %v5462_v62 = vld [vmem:[#allocation12] ss:$12 sps:$4 sm:$0xff]  }
 0x619   : > { %v5547_v63 = vpop.eup %5546 }
 0x61a   : > { %v1729_v0 = vmul.f32 %v5547_v63, %v5541_v41  ;;  %v6850_v41 = vld [vmem:[#allocation11 + $0x90] ss:$12 sps:$4 sm:$0xff]  }
 0x61b   : > { %1943 = vmatpush1.bf16.msra.mxu1 %v6850_v41 }
 0x61c   : > { %v1730_v1 = vadd.f32 1e-08, %v1729_v0  ;;  %1944 = vmatprep.subr.bf16.mxu1 %v6854_v33 }
 0x61e   : > { %v1733_v3 = vsel %vm1364_vm1, %v1730_v1, 0.0  ;;  %4506 = vst.msk [vmem:[%s6759_s28 + $0x24] sm:$0xf] %vm1364_vm1, %v1730_v1 }
 0x61f   : > { %1734 = vadd.xlane.f32.xlu1 %v1733_v3  ;;  %1945 = vmatpush1.bf16.msra.mxu1 %v6857_v44 }
 0x620   : > { %2159 = vmatprep.subr.bf16.mxu1 %v6860_v46 }
 0x69c   : > { %v1505_v9 = vpop.xlane.xlu1 %1504 }
 0x69d   : > { %5548 = vrcp.f32 %v1505_v9  ;;  %v5467_v9 = vld [vmem:[#allocation12 + $0x1c] ss:$12 sps:$4 sm:$0xff]  }
 0x6a4   : > { %v1620_v15 = vpop.xlane.xlu0 %1619 }
 0x6a5   : > { %5550 = vrcp.f32 %v1620_v15  ;;  %v5465_v15 = vld [vmem:[#allocation12 + $0x18] ss:$12 sps:$4 sm:$0xff]  }
 0x6a7   : > { %v5549_v16 = vpop.eup %5548 }
 0x6a8   : > { %v1507_v17 = vmul.f32 %v5549_v16, %v1500_v54  ;;  %v5487_v16 = vld [vmem:[#allocation12 + $0x20] ss:$12 sps:$4 sm:$0xff]  }
 0x6aa   : > { %v1508_v18 = vpack.c.bf16 %v1507_v17, %v1507_v17  ;;  %v5470_v17 = vld [vmem:[#allocation12 + $0x34] ss:$12 sps:$4 sm:$0xff]  }
 0x6ac   : > { %4827 = vmatmul.mubr.msk.bf16.vlgmr.msra.gmra.mrb[16].mxu0 %vm1392_vm2, %v1508_v18  ;;  %v1735_v21 = vpop.xlane.xlu1 %1734  ;;  %v5468_v18 = vld [vmem:[#allocation12 + $0x30] ss:$12 sps:$4 sm:$0xff]  }
 0x6ad   : > { %4837 = vmatpush3.bf16.msra.mxu0 %v6749_v53  ;;  %5552 = vrcp.f32 %v1735_v21  ;;  %4838 = vmatprep.mubr.msk.bf16.mxu0 %vm6126_vm0, %v7690_v7  ;;  %v5488_v21 = vld [vmem:[#allocation12 + $0x38] ss:$12 sps:$4 sm:$0xff]  }
 0x6ae   : > { %4848 = vmatprep.subr.bf16.mxu0 %v7690_v7 }
 0x6af   : > { %v5551_v22 = vpop.eup %5550 }
 0x6b0   : > { %v1622_v2 = vmul.f32 %v5551_v22, %v1615_v61  ;;  %v5473_v22 = vld [vmem:[#allocation12 + $0x4c] ss:$12 sps:$4 sm:$0xff]  }
 0x6b2   : > { %v1623_v23 = vpack.c.bf16 %v1622_v2, %v1622_v2  ;;  %v5471_v2 = vld [vmem:[#allocation12 + $0x48] ss:$12 sps:$4 sm:$0xff]  }
 0x6b4   : > { %4839 = vmatmul.mubr.msk.bf16.vlgmr.msra.gmra.mrb[20].mxu0 %vm1392_vm2, %v1623_v23  ;;  %v5489_v23 = vld [vmem:[#allocation12 + $0x50] ss:$12 sps:$4 sm:$0xff]  }
 0x6b5   : > { %4849 = vmatpush3.bf16.msra.mxu0 %v6753_v59  ;;  %4850 = vmatprep.mubr.msk.bf16.mxu0 %vm6126_vm0, %v7690_v7 }
 0x6b6   : > { %4854 = vmatprep.subr.bf16.mxu0 %v7690_v7 }
 0x6b7   : > { %v5553_v25 = vpop.eup %5552 }
 0x6b8   : > { %v1737_v26 = vmul.f32 %v5553_v25, %v1730_v1  ;;  %v5483_v1 = vld [vmem:[#allocation12 + $0x8] ss:$12 sps:$4 sm:$0xff]   ;;  %v5476_v25 = vld [vmem:[#allocation12 + $0x64] ss:$12 sps:$4 sm:$0xff]  }
 0x6ba   : > { %v1738_v10 = vpack.c.bf16 %v1737_v26, %v1737_v26  ;;  %v5474_v26 = vld [vmem:[#allocation12 + $0x60] ss:$12 sps:$4 sm:$0xff]  }
 0x6bc   : > { %4851 = vmatmul.mubr.msk.bf16.vlgmr.msra.gmra.mrb[24].mxu0 %vm1392_vm2, %v1738_v10  ;;  %v5479_v10 = vld [vmem:[#allocation12 + $0x7c] ss:$12 sps:$4 sm:$0xff]  }
 0x6bd   : > { %4855 = vmatpush3.bf16.msra.mxu0 %v5433_v27  ;;  %4870 = vmatprep.mubr.msk.bf16.mxu0 %vm6126_vm0, %v7690_v7  ;;  %v5490_v27 = vld [vmem:[#allocation12 + $0x68] ss:$12 sps:$4 sm:$0xff]  }
 0x6be   : > { %4856 = vmatprep.subr.bf16.mxu0 %v7690_v7 }
 0x6c1   : > { %4857 = vmatpush3.bf16.msra.mxu0 %v5437_v11  ;;  %v5477_v11 = vld [vmem:[#allocation12 + $0x78] ss:$12 sps:$4 sm:$0xff]  }
 0x6c2   : > { %4858 = vmatprep.subr.bf16.mxu0 %v7690_v7 }
 0x6c5   : > { %4859 = vmatpush3.bf16.msra.mxu0 %v5441_v31  ;;  %v5491_v31 = vld [vmem:[#allocation12 + $0x80] ss:$12 sps:$4 sm:$0xff]  }
 0x6c6   : > { %4860 = vmatprep.subr.bf16.mxu0 %v7690_v7 }
 0x6c9   : > { %4861 = vmatpush3.bf16.msra.mxu0 %v5445_v29  ;;  %v5482_v29 = vld [vmem:[#allocation12 + $0x94] ss:$12 sps:$4 sm:$0xff]  }
 0x6ca   : > { %4862 = vmatprep.subr.bf16.mxu0 %v7690_v7 }
 0x6cd   : > { %4863 = vmatpush3.bf16.msra.mxu0 %v5449_v37  ;;  %v5480_v37 = vld [vmem:[#allocation12 + $0x90] ss:$12 sps:$4 sm:$0xff]  }
 0x6ce   : > { %4864 = vmatprep.subr.bf16.mxu0 %v7690_v7 }
 0x6d1   : > { %4865 = vmatpush3.bf16.msra.mxu0 %v5453_v40  ;;  %v6874_v40 = vld [vmem:[#allocation12 + $0x98] ss:$12 sps:$4 sm:$0xff]  }
 0x6d2   : > { %4866 = vmatprep.subr.bf16.mxu0 %v7690_v7 }
 0x6d5   : > { %4867 = vmatpush3.bf16.msra.mxu0 %v5457_v12  ;;  %v6876_v12 = vld [vmem:[#allocation12 + $0xac] ss:$12 sps:$4 sm:$0xff]  }
 0x6d6   : > { %4868 = vmatprep.subr.bf16.mxu0 %v7690_v7 }
 0x6d9   : > { %4869 = vmatpush3.bf16.msra.mxu0 %v5461_v45  ;;  %v6879_v45 = vld [vmem:[#allocation12 + $0xa8] ss:$12 sps:$4 sm:$0xff]  }
 0x6da   : > { %4874 = vmatprep.subr.bf16.mxu0 %v7690_v7 }
 0x77f   : > { %v1546_v47 = vpop.f32.mrb[16].mxu0 }
 0x780   : > { %1552 = vst [vmem:[#allocation2 + $0x4] sm:$0xf] %v1546_v47  ;;  %v4828_v48 = vpop.f32.mrb[17].mxu0  ;;  %v6882_v47 = vld [vmem:[#allocation12 + $0xb0] ss:$12 sps:$4 sm:$0xff]  }
 0x781   : > { %v1549_v49 = vpop.f32.mrb[18].mxu0  ;;  %v6887_v48 = vld [vmem:[%s6570_s18] sm:$0xff] }
 0x782   : > { %v4829_v42 = vpop.f32.mrb[19].mxu0  ;;  %v6890_v49 = vld [vmem:[%s6570_s18 + $0x8] sm:$0xff]  ;;  %s4233_s18 = scalar_lea.sflag [#allocation19], %s6556_s20 }
 0x783   : > { %v2014_v42 = vpack.c.bf16 %v6890_v49, %v6887_v48 }
 0x787   : > { %v1661_v50 = vpop.f32.mrb[20].mxu0  ;;  %v1783_v63 = vld [vmem:[#allocation2] sm:$0xff] }
 0x788   : > { %1667 = vst [vmem:[#allocation2 + $0x8] sm:$0xf] %v1661_v50  ;;  %v4840_v52 = vpop.f32.mrb[21].mxu0 }
 0x789   : > { %v1664_v54 = vpop.f32.mrb[22].mxu0 }
 0x78a   : > { %v4841_v55 = vpop.f32.mrb[23].mxu0 }
 0x78f   : > { %v1776_v56 = vpop.f32.mrb[24].mxu0 }
 0x790   : > { %1782 = vst [vmem:[#allocation2 + $0xc] sm:$0xf] %v1776_v56  ;;  %v4852_v58 = vpop.f32.mrb[25].mxu0  ;;  %v1787_v56 = vlaneseq }
 0x791   : > { %v1779_v60 = vpop.f32.mrb[26].mxu0 }
 0x792   : > { %v4853_v61 = vpop.f32.mrb[27].mxu0  ;;  %v1788_v58 = vshrl.u32 %v1787_v56, 7 }
 0x793   : > { %v845_v61 = vld [vmem:[%s7757_s27] sm:$0x7] }
 0x794   : > { %v1789_v60 = vsub.s32 0, %v1788_v58 }
 0x797   : > { %v1784_v0 = vld [vmem:[#allocation2 + $0x8] sm:$0xff] }
 0x798   : > { %v1785_v3 = vpack.c.bf16 %v1784_v0, %v1783_v63  ;;  %v844_v63 = vld [vmem:[%s7758_s7] sm:$0x7]  ;;  %s4263_s7 = sshll.u32 %s6759_s28, 4  ;;  %s7551_s7 = int_to_ptr.vmem [resolvable:$true] %s4263_s7 }
 0x799   : > { %v1790_v0 = vrot.slane %v844_v63, %v1789_v60  ;;  %s5990_s22 = scalar_lea.vmem %s7551_s7, 768  ;;  %p5997_p5 = scmp.lt.s32.totalorder %s7551_s7, %s5995_s8 }
 0x79a   : > { %1963 = vmatmul.mubr.bf16.vlgmr.msra.gmra.mrb[24].mxu1 %v1785_v3  ;;  %4871 = vmatmul.mubr.bf16.vlgmr.msra.gmra.mrb[28].mxu0 %v1785_v3  ;;  %p5991_p7 = scmp.ne.s32.totalorder %s7551_s7, %s5990_s22  ;;  %p5998_p8 = scmp.lt.s32.totalorder %s5996_s24, %s5990_s22 }
 0x79b   : > { %2160 = vmatpush1.bf16.msra.mxu1 %v5462_v62  ;;  %4875 = vmatpush3.bf16.msra.mxu0 %v5483_v1  ;;  %v1793_v62 = vsub.s32 1, %v1788_v58  ;;  %v2019_v1 = vrot.slane %v845_v61, %v1789_v60 }
 0x79c   : > { %2161 = vmatprep.subr.bf16.mxu1 %v5467_v9  ;;  %4876 = vmatprep.subr.bf16.mxu0 %v7690_v7  ;;  %p5992_p0 = pnand %p5991_p7, %p7798_p9  ;;  %p5999_p4 = por %p5998_p8, %p5997_p5 }
 0x79d   : > { %2191 = vmatprep.mubr.bf16.mxu1 %v7679_v43  ;;  %4890 = vmatprep.mubr.msk.bf16.mxu0 %vm6126_vm0, %v7690_v7  ;;  %v1794_v3 = vrot.slane %v844_v63, %v1793_v62  ;;  %v2023_v9 = vrot.slane %v845_v61, %v1793_v62 }
 0x79e   : > { %p5993_p2 = pneg %p5992_p0 }
 0x79f   : > { %2162 = vmatpush1.bf16.msra.mxu1 %v5465_v15  ;;  %4877 = vmatpush3.bf16.msra.mxu0 %v5487_v16  ;;  %v6908_v15 = vadd.f32 %v2019_v1, %v1790_v0  ;;  %v6910_v16 = vadd.f32 %v2023_v9, %v1794_v3 }
 0x7a0   : > { %2163 = vmatprep.subr.bf16.mxu1 %v5470_v17  ;;  %4878 = vmatprep.subr.bf16.mxu0 %v7690_v7  ;;  %p6000_p1 = pnand %p5999_p4, %p5993_p2 }
 0x7a1   : > { %7759 = vst [vmem:[#allocation31_spill] sm:$0xff] %v6910_v16 }
 0x7a3   : > { %2164 = vmatpush1.bf16.msra.mxu1 %v5468_v18  ;;  %4879 = vmatpush3.bf16.msra.mxu0 %v5488_v21 }
 0x7a4   : > { %2165 = vmatprep.subr.bf16.mxu1 %v5473_v22  ;;  %4880 = vmatprep.subr.bf16.mxu0 %v7690_v7 }
 0x7a7   : > { %2166 = vmatpush1.bf16.msra.mxu1 %v5471_v2  ;;  %4881 = vmatpush3.bf16.msra.mxu0 %v5489_v23 }
 0x7a8   : > { %2167 = vmatprep.subr.bf16.mxu1 %v5476_v25  ;;  %4882 = vmatprep.subr.bf16.mxu0 %v7690_v7 }
 0x7ab   : > { %2168 = vmatpush1.bf16.msra.mxu1 %v5474_v26  ;;  %4883 = vmatpush3.bf16.msra.mxu0 %v5490_v27 }
 0x7ac   : > { %2169 = vmatprep.subr.bf16.mxu1 %v5479_v10  ;;  %4884 = vmatprep.subr.bf16.mxu0 %v7690_v7 }
 0x7af   : > { %2170 = vmatpush1.bf16.msra.mxu1 %v5477_v11  ;;  %4885 = vmatpush3.bf16.msra.mxu0 %v5491_v31 }
 0x7b0   : > { %2171 = vmatprep.subr.bf16.mxu1 %v5482_v29  ;;  %4886 = vmatprep.subr.bf16.mxu0 %v7690_v7 }
 0x7b3   : > { %2172 = vmatpush1.bf16.msra.mxu1 %v5480_v37  ;;  %4887 = vmatpush3.bf16.msra.mxu0 %v6874_v40 }
 0x7b4   : > { %2173 = vmatprep.subr.bf16.mxu1 %v6876_v12  ;;  %4888 = vmatprep.subr.bf16.mxu0 %v7690_v7 }
 0x7b7   : > { %2174 = vmatpush1.bf16.msra.mxu1 %v6879_v45  ;;  %4889 = vmatpush3.bf16.msra.mxu0 %v6882_v47 }
 0x7b8   : > { %4894 = vmatprep.subr.bf16.mxu1 %v7690_v7  ;;  %4914 = vmatprep.subr.bf16.mxu0 %v7690_v7 }
 0x7ba   : > { %2192 = vmatmul.mubr.bf16.vlgmr.msra.gmra.mrb[24].mxu1 %v2014_v42  ;;  %4891 = vmatmul.mubr.bf16.vlgmr.msra.gmra.mrb[32].mxu0 %v2014_v42 }
 0x7bb   : > { %4910 = vmatprep.mubr.msk.bf16.mxu1 %vm6126_vm0, %v7690_v7  ;;  %4930 = vmatprep.mubr.msk.bf16.mxu0 %vm6126_vm0, %v7690_v7 }
 0x86d   : > { %v2007_v50 = vpop.f32.mrb[28].mxu0 }
 0x86e   : > { %v4872_v52 = vpop.f32.mrb[29].mxu0 }
 0x86f   : > { %v2010_v54 = vpop.f32.mrb[30].mxu0 }
 0x870   : > { %v4873_v55 = vpop.f32.mrb[31].mxu0 }
 0x88d   : > { %v2193_v17 = vpop.f32.mrb[24].mxu1  ;;  %v2236_v18 = vpop.f32.mrb[32].mxu0 }
 0x88e   : > { %v5231_v21 = vadd.f32 %v6908_v15, %v2193_v17  ;;  %v2195_v22 = vpop.f32.mrb[25].mxu1  ;;  %v4892_v2 = vpop.f32.mrb[33].mxu0  ;;  %v1797_v17 = vsub.s32 2, %v1788_v58 }
 0x88f   : > { %v5233_v23 = vadd.f32 %v6910_v16, %v2195_v22  ;;  %v2197_v25 = vpop.f32.mrb[26].mxu1  ;;  %v2239_v26 = vpop.f32.mrb[34].mxu0 }
 0x890   : > { %v2245_v27 = vsub.f32 0.0, %v5231_v21  ;;  %v5235_v10 = vadd.f32 %v6908_v15, %v2197_v25  ;;  %v2199_v11 = vpop.f32.mrb[27].mxu1  ;;  %v4893_v31 = vpop.f32.mrb[35].mxu0  ;;  %v6916_v21 = vrot.slane %v845_v61, %v1797_v17 }
 0x891   : > { %v5237_v29 = vadd.f32 %v6910_v16, %v2199_v11  ;;  %v2257_v52 = vsub.f32 0.0, %v5233_v23  ;;  %v6918_v23 = vrot.slane %v844_v63, %v1797_v17  ;;  %v6932_v17 = vld [vmem:[#allocation14] sm:$0xff]  }
 0x892   : > { %v2247_v37 = vmul.f32 1.442695, %v2245_v27  ;;  %v2246_v42 = vsub.f32 0.0, %v5235_v10  ;;  %7760 = vst [vmem:[#allocation32_spill] sm:$0xff] %v6916_v21  ;;  %v2237_v27 = vadd.f32 %v2236_v18, %v6916_v21  ;;  %4895 = vmatpush3.bf16.msra.mxu1 %v6932_v17 }
 0x893   : > { %v2258_v56 = vsub.f32 0.0, %v5237_v29  ;;  %v2259_v60 = vmul.f32 1.442695, %v2257_v52  ;;  %7761 = vst [vmem:[#allocation33_spill] sm:$0xff] %v6918_v23  ;;  %v2008_v31 = vadd.f32 %v2007_v50, %v6918_v23  ;;  %v2011_v58 = vadd.f32 %v2010_v54, %v6918_v23  ;;  %4896 = vmatprep.subr.bf16.mxu1 %v7690_v7 }
 0x894   : > { %5554 = vpow2.f32 %v2247_v37  ;;  %v2249_v55 = vmul.f32 1.442695, %v2246_v42  ;;  %v2240_v37 = vadd.f32 %v2239_v26, %v6916_v21 }
 0x895   : > { %v2261_v62 = vmul.f32 1.442695, %v2258_v56 }
 0x896   : > { %5556 = vpow2.f32 %v2249_v55 }
 0x897   : > { %5558 = vpow2.f32 %v2259_v60 }
 0x898   : > { %5560 = vpow2.f32 %v2261_v62 }
 0x89e   : > { %v5555_v0 = vpop.eup %5554 }
 0x89f   : > { %v2251_v1 = vadd.f32 1.0, %v5555_v0 }
 0x8a0   : > { %v5557_v3 = vpop.eup %5556 }
 0x8a1   : > { %5562 = vrcp.f32 %v2251_v1  ;;  %v2252_v9 = vadd.f32 1.0, %v5557_v3  ;;  %v5559_v22 = vpop.eup %5558 }
 0x8a2   : > { %v5561_v2 = vpop.eup %5560  ;;  %v2263_v25 = vadd.f32 1.0, %v5559_v22  ;;  %v6935_v22 = vld [vmem:[#allocation14 + $0x8] sm:$0xff]  }
 0x8a3   : > { %5564 = vrcp.f32 %v2252_v9  ;;  %v2264_v10 = vadd.f32 1.0, %v5561_v2  ;;  %4897 = vmatpush3.bf16.msra.mxu1 %v6935_v22 }
 0x8a4   : > { %5566 = vrcp.f32 %v2263_v25  ;;  %4898 = vmatprep.subr.bf16.mxu1 %v7690_v7 }
 0x8a5   : > { %5568 = vrcp.f32 %v2264_v10 }
 0x8ab   : > { %v5563_v11 = vpop.eup %5562 }
 0x8ac   : > { %v2267_v29 = vmul.f32 %v5563_v11, %v2237_v27 }
 0x8ad   : > { %v5565_v42 = vpop.eup %5564 }
 0x8ae   : > { %v2269_v61 = vadd.f32 %v2267_v29, %v2008_v31  ;;  %v2268_v52 = vmul.f32 %v5565_v42, %v2240_v37  ;;  %v5567_v55 = vpop.eup %5566  ;;  %v6942_v29 = vld [vmem:[#allocation14 + $0x10] sm:$0xff]   ;;  %v6946_v37 = vld [vmem:[#allocation14 + $0x18] sm:$0xff]   ;;  %v6950_v42 = vld [vmem:[#allocation14 + $0x20] sm:$0xff]  }
 0x8af   : > { %v5569_v56 = vpop.eup %5568  ;;  %v2273_v18 = vsub.f32 1.0, %v5567_v55  ;;  %v2277_v50 = vmul.f32 %v6887_v48, %v5567_v55  ;;  %4899 = vmatpush3.bf16.msra.mxu1 %v6942_v29  ;;  %v6969_v55 = vld [vmem:[#allocation15 + $0x8] sm:$0xff]  }
 0x8b0   : > { %5570 = vtanh.f32 %v2269_v61  ;;  %v2270_v63 = vadd.f32 %v2268_v52, %v2011_v58  ;;  %v2274_v0 = vsub.f32 1.0, %v5569_v56  ;;  %v2278_v54 = vmul.f32 %v6890_v49, %v5569_v56  ;;  %4900 = vmatprep.subr.bf16.mxu1 %v7690_v7  ;;  %v6954_v58 = vld [vmem:[#allocation14 + $0x28] sm:$0xff]   ;;  %v6958_v61 = vld [vmem:[#allocation14 + $0x30] sm:$0xff]   ;;  %v6961_v52 = vld [vmem:[#allocation14 + $0x38] sm:$0xff]  }
 0x8b1   : > { %v6973_v56 = vld [vmem:[#allocation15 + $0x10] sm:$0xff]  }
 0x8b2   : > { %5572 = vtanh.f32 %v2270_v63  ;;  %v6966_v63 = vld [vmem:[#allocation15] sm:$0xff]  }
 0x8b3   : > { %4901 = vmatpush3.bf16.msra.mxu1 %v6946_v37  ;;  %4915 = vmatpush3.bf16.msra.mxu0 %v6966_v63 }
 0x8b4   : > { %4902 = vmatprep.subr.bf16.mxu1 %v7690_v7  ;;  %4916 = vmatprep.subr.bf16.mxu0 %v7690_v7 }
 0x8b7   : > { %4903 = vmatpush3.bf16.msra.mxu1 %v6950_v42  ;;  %4917 = vmatpush3.bf16.msra.mxu0 %v6969_v55 }
 0x8b8   : > { %4904 = vmatprep.subr.bf16.mxu1 %v7690_v7  ;;  %4918 = vmatprep.subr.bf16.mxu0 %v7690_v7 }
 0x8ba   : > { %v5571_v60 = vpop.eup %5570 }
 0x8bb   : > { %v2275_v62 = vmul.f32 %v5571_v60, %v2273_v18  ;;  %4905 = vmatpush3.bf16.msra.mxu1 %v6954_v58  ;;  %4919 = vmatpush3.bf16.msra.mxu0 %v6973_v56  ;;  %v6977_v18 = vld [vmem:[#allocation15 + $0x18] sm:$0xff]   ;;  %v6981_v60 = vld [vmem:[#allocation15 + $0x20] sm:$0xff]  }
 0x8bc   : > { %v5573_v1 = vpop.eup %5572  ;;  %4906 = vmatprep.subr.bf16.mxu1 %v7690_v7  ;;  %4920 = vmatprep.subr.bf16.mxu0 %v7690_v7 }
 0x8bd   : > { %v6925_v3 = vadd.f32 %v2277_v50, %v2275_v62  ;;  %v2276_v26 = vmul.f32 %v5573_v1, %v2274_v0  ;;  %v6985_v62 = vld [vmem:[#allocation15 + $0x28] sm:$0xff]   ;;  %v6989_v50 = vld [vmem:[#allocation15 + $0x30] sm:$0xff]  }
 0x8bf   : > { %2281 = vadd.xlane.f32.xlu0 %v6925_v3  ;;  %v6929_v9 = vadd.f32 %v2278_v54, %v2276_v26  ;;  %4907 = vmatpush3.bf16.msra.mxu1 %v6958_v61 }
 0x8c0   : > { %4908 = vmatprep.subr.bf16.mxu1 %v7690_v7  ;;  %4921 = vmatpush3.bf16.msra.mxu0 %v6977_v18 }
 0x8c1   : > { %2283 = vadd.xlane.f32.xlu1 %v6929_v9  ;;  %4922 = vmatprep.subr.bf16.mxu0 %v7690_v7 }
 0x8c3   : > { %4909 = vmatpush3.bf16.msra.mxu1 %v6961_v52 }
 0x8c4   : > { %4934 = vmatprep.subr.bf16.mxu1 %v7690_v7  ;;  %4923 = vmatpush3.bf16.msra.mxu0 %v6981_v60 }
 0x8c5   : > { %4924 = vmatprep.subr.bf16.mxu0 %v7690_v7 }
 0x8c8   : > { %4925 = vmatpush3.bf16.msra.mxu0 %v6985_v62 }
 0x8c9   : > { %4926 = vmatprep.subr.bf16.mxu0 %v7690_v7 }
 0x8cc   : > { %4927 = vmatpush3.bf16.msra.mxu0 %v6989_v50 }
 0x8cd   : > { %4928 = vmatprep.subr.bf16.mxu0 %v7690_v7 }
 0x94c   : > { %v2282_v48 = vpop.xlane.xlu0 %2281 }
 0x94d   : > { %v2285_v49 = vmul.f32 0.0078125, %v2282_v48 }
 0x94e   : > { %v2284_v2 = vpop.xlane.xlu1 %2283 }
 0x94f   : > { %v2287_v25 = vsub.f32 %v6925_v3, %v2285_v49  ;;  %v2286_v27 = vmul.f32 0.0078125, %v2284_v2 }
 0x951   : > { %v2288_v10 = vsub.f32 %v6929_v9, %v2286_v27  ;;  %v2289_v11 = vmul.f32 %v2287_v25, %v2287_v25  ;;  %v6997_v27 = vld [vmem:[%s7762_s16] ss:$0 sm:$0xff] }
 0x952   : > { %7763 = vst [vmem:[#allocation34_spill] sm:$0xff] %v6997_v27 }
 0x953   : > { %2291 = vadd.xlane.f32.xlu0 %v2289_v11  ;;  %v2290_v31 = vmul.f32 %v2288_v10, %v2288_v10 }
 0x955   : > { %2293 = vadd.xlane.f32.xlu1 %v2290_v31 }
 0x9e0   : > { %v2292_v0 = vpop.xlane.xlu0 %2291 }
 0x9e1   : > { %v2295_v1 = vmul.f32 0.0078125, %v2292_v0  ;;  %v7003_v0 = vld [vmem:[%s7764_s6] ss:$0 sm:$0xff] }
 0x9e2   : > { %v2294_v26 = vpop.xlane.xlu1 %2293  ;;  %7765 = vst [vmem:[#allocation35_spill] sm:$0xff] %v7003_v0 }
 0x9e3   : > { %v2297_v54 = vadd.f32 1e-05, %v2295_v1  ;;  %v2296_v48 = vmul.f32 0.0078125, %v2294_v26 }
 0x9e5   : > { %5574 = vrsqrt.f32 %v2297_v54  ;;  %v2298_v49 = vadd.f32 1e-05, %v2296_v48 }
 0x9e7   : > { %5576 = vrsqrt.f32 %v2298_v49  ;;  %v7008_v49 = vld [vmem:[#allocation8] sm:$0xff]  }
 0x9e8   : > { %7766 = vst [vmem:[#allocation36_spill] sm:$0xff] %v7008_v49 }
 0x9ef   : > { %v5575_v2 = vpop.eup %5574 }
 0x9f0   : > { %v2301_v11 = vmul.f32 %v5575_v2, %v2287_v25  ;;  %v7014_v25 = vld [vmem:[#allocation8 + $0x8] sm:$0xff]  }
 0x9f1   : > { %v5577_v31 = vpop.eup %5576  ;;  %7767 = vst [vmem:[#allocation37_spill] sm:$0xff] %v7014_v25  ;;  %v7030_v2 = vld [vmem:[#allocation8 + $0x28] sm:$0xff]  }
 0x9f2   : > { %v2302_v43 = vmul.f32 %v5577_v31, %v2288_v10  ;;  %v2309_v23 = vmul.f32 %v6997_v27, %v2301_v11  ;;  %v7026_v10 = vld [vmem:[#allocation8 + $0x20] sm:$0xff]   ;;  %7771 = vst [vmem:[#allocation41_spill] sm:$0xff] %v7030_v2  ;;  %v7034_v11 = vld [vmem:[#allocation8 + $0x30] sm:$0xff]   ;;  %v7038_v31 = vld [vmem:[#allocation8 + $0x38] sm:$0xff]  }
 0x9f3   : > { %7770 = vst [vmem:[#allocation40_spill] sm:$0xff] %v7026_v10  ;;  %7772 = vst [vmem:[#allocation42_spill] sm:$0xff] %v7034_v11 }
 0x9f4   : > { %v2310_v1 = vmul.f32 %v6997_v27, %v2302_v43  ;;  %v2317_v26 = vadd.f32 %v7003_v0, %v2309_v23  ;;  %v7018_v43 = vld [vmem:[#allocation8 + $0x10] sm:$0xff]   ;;  %v7022_v23 = vld [vmem:[#allocation8 + $0x18] sm:$0xff]   ;;  %7773 = vst [vmem:[#allocation43_spill] sm:$0xff] %v7038_v31 }
 0x9f5   : > { %7768 = vst [vmem:[#allocation38_spill] sm:$0xff] %v7018_v43  ;;  %7769 = vst [vmem:[#allocation39_spill] sm:$0xff] %v7022_v23 }
 0x9f6   : > { %v2318_v54 = vadd.f32 %v7003_v0, %v2310_v1  ;;  %v7042_v1 = vld [vmem:[#allocation15 + $0x38] sm:$0xff]  }
 0x9f7   : > { %4929 = vmatpush3.bf16.msra.mxu0 %v7042_v1 }
 0x9f8   : > { %v2319_v48 = vpack.c.bf16 %v2318_v54, %v2317_v26  ;;  %4954 = vmatprep.subr.bf16.mxu0 %v7690_v7  ;;  %v7049_v26 = vld [vmem:[%s7774_s5] ss:$0 sm:$0xff] }
 0x9f9   : > { %7775 = vst [vmem:[#allocation44_spill] sm:$0xff] %v7049_v26 }
 0x9fa   : > { %4911 = vmatmul.mubr.bf16.vlgmr.msra.gmra.mrb[28].mxu1 %v2319_v48 }
 0x9fb   : > { %4935 = vmatpush3.bf16.msra.mxu1 %v7008_v49  ;;  %4950 = vmatprep.mubr.msk.bf16.mxu1 %vm6126_vm0, %v7690_v7 }
 0x9fc   : > { %4936 = vmatprep.subr.bf16.mxu1 %v7690_v7 }
 0x9ff   : > { %4937 = vmatpush3.bf16.msra.mxu1 %v7014_v25 }
 0xa00   : > { %4938 = vmatprep.subr.bf16.mxu1 %v7690_v7 }
 0xa03   : > { %4939 = vmatpush3.bf16.msra.mxu1 %v7018_v43 }
 0xa04   : > { %4940 = vmatprep.subr.bf16.mxu1 %v7690_v7 }
 0xa07   : > { %4941 = vmatpush3.bf16.msra.mxu1 %v7022_v23 }
 0xa08   : > { %4942 = vmatprep.subr.bf16.mxu1 %v7690_v7 }
 0xa0b   : > { %4943 = vmatpush3.bf16.msra.mxu1 %v7026_v10 }
 0xa0c   : > { %4944 = vmatprep.subr.bf16.mxu1 %v7690_v7 }
 0xa0f   : > { %4945 = vmatpush3.bf16.msra.mxu1 %v7030_v2 }
 0xa10   : > { %4946 = vmatprep.subr.bf16.mxu1 %v7690_v7 }
 0xa13   : > { %4947 = vmatpush3.bf16.msra.mxu1 %v7034_v11 }
 0xa14   : > { %4948 = vmatprep.subr.bf16.mxu1 %v7690_v7 }
 0xa17   : > { %4949 = vmatpush3.bf16.msra.mxu1 %v7038_v31 }
 0xa18   : > { %4978 = vmatprep.subr.bf16.mxu1 %v7690_v7 }
 0xacd   : > { %v2408_v54 = vpop.f32.mrb[28].mxu1 }
 0xace   : > { %v2409_v48 = vadd.f32 %v7049_v26, %v2408_v54  ;;  %v4912_v11 = vpop.f32.mrb[29].mxu1  ;;  %v7060_v54 = vld [vmem:[%s7776_s4] ss:$0 sm:$0xff] }
 0xacf   : > { %v2411_v2 = vpop.f32.mrb[30].mxu1  ;;  %7777 = vst [vmem:[#allocation45_spill] sm:$0xff] %v7060_v54 }
 0xad0   : > { %v2412_v31 = vadd.f32 %v7049_v26, %v2411_v2  ;;  %v4913_v10 = vpop.f32.mrb[31].mxu1  ;;  %v2415_v23 = vmax.f32 %v2409_v48, 0.0 }
 0xad2   : > { %v2416_v43 = vmax.f32 %v2412_v31, 0.0 }
 0xad4   : > { %v2417_v25 = vpack.c.bf16 %v2416_v43, %v2415_v23 }
 0xad6   : > { %4931 = vmatmul.mubr.bf16.vlgmr.msra.gmra.mrb[36].mxu0 %v2417_v25 }
 0xad7   : > { %4955 = vmatpush3.bf16.xpose.msra.mxu0 %v6728_v39  ;;  %4956 = vmatprep.mubr.msk.bf16.mxu0 %vm6126_vm0, %v7690_v7 }
 0xad8   : > { %4960 = vmatprep.subr.bf16.mxu0 %v7690_v7 }
 0xba9   : > { %v2500_v11 = vpop.f32.mrb[36].mxu0 }
 0xbaa   : > { %v2507_v2 = vadd.f32 %v2500_v11, %v6925_v3  ;;  %v4932_v10 = vpop.f32.mrb[37].mxu0 }
 0xbab   : > { %v2503_v48 = vpop.f32.mrb[38].mxu0 }
 0xbac   : > { %v7064_v43 = vadd.f32 %v7060_v54, %v2507_v2  ;;  %v2508_v25 = vadd.f32 %v2503_v48, %v6929_v9  ;;  %v4933_v23 = vpop.f32.mrb[39].mxu0 }
 0xbae   : > { %v7068_v31 = vadd.f32 %v7060_v54, %v2508_v25  ;;  %2517 = vadd.xlane.f32.xlu0 %v7064_v43 }
 0xbb0   : > { %2519 = vadd.xlane.f32.xlu1 %v7068_v31 }
 0xc3b   : > { %v2518_v7 = vpop.xlane.xlu0 %2517 }
 0xc3c   : > { %v2521_v39 = vmul.f32 0.0078125, %v2518_v7 }
 0xc3d   : > { %v2520_v26 = vpop.xlane.xlu1 %2519 }
 0xc3e   : > { %v2523_v3 = vsub.f32 %v7064_v43, %v2521_v39  ;;  %v2522_v11 = vmul.f32 0.0078125, %v2520_v26  ;;  %v7077_v39 = vld [vmem:[%s7648_s14] ss:$0 sm:$0xff] }
 0xc40   : > { %v2524_v10 = vsub.f32 %v7068_v31, %v2522_v11  ;;  %v2525_v2 = vmul.f32 %v2523_v3, %v2523_v3  ;;  %v7084_v11 = vld [vmem:[%s7649_s15] ss:$0 sm:$0xff] }
 0xc42   : > { %2527 = vadd.xlane.f32.xlu0 %v2525_v2  ;;  %v2526_v49 = vmul.f32 %v2524_v10, %v2524_v10 }
 0xc44   : > { %2529 = vadd.xlane.f32.xlu1 %v2526_v49 }
 0xccf   : > { %v2528_v9 = vpop.xlane.xlu0 %2527 }
 0xcd0   : > { %v2531_v48 = vmul.f32 0.0078125, %v2528_v9 }
 0xcd1   : > { %v2530_v25 = vpop.xlane.xlu1 %2529 }
 0xcd2   : > { %v2533_v23 = vadd.f32 1e-05, %v2531_v48  ;;  %v2532_v54 = vmul.f32 0.0078125, %v2530_v25 }
 0xcd4   : > { %5578 = vrsqrt.f32 %v2533_v23  ;;  %v2534_v0 = vadd.f32 1e-05, %v2532_v54  ;;  %v7779_v23 = vmov 0  }
 0xcd6   : > { %5580 = vrsqrt.f32 %v2534_v0 }
 0xcde   : > { %v5579_v27 = vpop.eup %5578 }
 0xcdf   : > { %v2537_v7 = vmul.f32 %v5579_v27, %v2523_v3 }
 0xce0   : > { %v5581_v21 = vpop.eup %5580 }
 0xce1   : > { %v2538_v16 = vmul.f32 %v5581_v21, %v2524_v10  ;;  %v2539_v26 = vmul.f32 %v7077_v39, %v2537_v7  ;;  %v7778_v21 = vmov 0.0  }
 0xce3   : > { %v2540_v49 = vmul.f32 %v7077_v39, %v2538_v16  ;;  %v2541_v0 = vadd.f32 %v7084_v11, %v2539_v26 }
 0xce5   : > { %v2542_v27 = vadd.f32 %v7084_v11, %v2540_v49 }
 0xce7   : > { %v2543_v54 = vpack.c.bf16 %v2542_v27, %v2541_v0 }
 0xce9   : > { %4951 = vmatmul.mubr.bf16.vlgmr.msra.gmra.mrb[32].mxu1 %v2543_v54 }
 0xcea   : > { %4979 = vmatpush3.bf16.xpose.msra.mxu1 %v6747_v51  ;;  %4980 = vmatprep.mubr.msk.bf16.mxu1 %vm6126_vm0, %v7778_v21 }
 0xceb   : > { %4990 = vmatprep.subr.bf16.mxu1 %v7778_v21 }
 0xdbc   : > { %v2578_v3 = vpop.f32.mrb[32].mxu1 }
 0xdbd   : > { %v4952_v16 = vpop.f32.mrb[33].mxu1 }
 0xdbe   : > { %v2581_v10 = vpop.f32.mrb[34].mxu1 }
 0xdbf   : > { %v7092_v2 = vpack.c.bf16 %v2581_v10, %v2578_v3  ;;  %v4953_v9 = vpop.f32.mrb[35].mxu1 }
 0xdc1   : > { %4957 = vmatmul.mubr.bf16.vlgmr.msra.gmra.mrb[40].mxu0 %v7092_v2  ;;  %v2815_v48 = vrot.slane %v7092_v2, 4  ;;  %v2930_v25 = vrot.slane %v7092_v2, 6 }
 0xdc2   : > { %4961 = vmatpush3.bf16.msra.mxu0 %v6730_v13  ;;  %4962 = vmatprep.mubr.msk.bf16.mxu0 %vm6126_vm0, %v7778_v21 }
 0xdc3   : > { %4981 = vmatmul.mubr.bf16.vlgmr.msra.gmra.mrb[36].mxu1 %v2815_v48  ;;  %4966 = vmatprep.subr.bf16.mxu0 %v7778_v21 }
 0xdc4   : > { %4991 = vmatpush3.bf16.xpose.msra.mxu1 %v6751_v57  ;;  %4992 = vmatprep.mubr.msk.bf16.mxu1 %vm6126_vm0, %v7778_v21 }
 0xdc5   : > { %3048 = vmatprep.subr.bf16.mxu1 %v6796_v5 }
 0xdcb   : > { %4993 = vmatmul.mubr.bf16.vlgmr.msra.gmra.mrb[40].mxu1 %v2930_v25 }
 0xdcc   : > { %3049 = vmatpush1.bf16.msra.mxu1 %v6794_v4  ;;  %3080 = vmatprep.mubr.bf16.mxu1 %v7779_v23 }
 0xdcd   : > { %3050 = vmatprep.subr.bf16.mxu1 %v6798_v6 }
 0xdd0   : > { %3051 = vmatpush1.bf16.msra.mxu1 %v6802_v8 }
 0xdd1   : > { %3052 = vmatprep.subr.bf16.mxu1 %v6820_v28 }
 0xdd4   : > { %3053 = vmatpush1.bf16.msra.mxu1 %v6822_v30 }
 0xdd5   : > { %3054 = vmatprep.subr.bf16.mxu1 %v6826_v24 }
 0xdd8   : > { %3055 = vmatpush1.bf16.msra.mxu1 %v6829_v32 }
 0xdd9   : > { %3056 = vmatprep.subr.bf16.mxu1 %v6834_v35 }
 0xddc   : > { %3057 = vmatpush1.bf16.msra.mxu1 %v6836_v36 }
 0xddd   : > { %3058 = vmatprep.subr.bf16.mxu1 %v6840_v38 }
 0xde0   : > { %3059 = vmatpush1.bf16.msra.mxu1 %v6843_v19 }
 0xde1   : > { %3060 = vmatprep.subr.bf16.mxu1 %v6848_v14 }
 0xde4   : > { %3061 = vmatpush1.bf16.msra.mxu1 %v6850_v41 }
 0xde5   : > { %3062 = vmatprep.subr.bf16.mxu1 %v6854_v33 }
 0xde8   : > { %3063 = vmatpush1.bf16.msra.mxu1 %v6857_v44 }
 0xde9   : > { %3133 = vmatprep.subr.bf16.mxu1 %v6860_v46 }
 0xe94   : > { %v2620_v4 = vpop.f32.mrb[40].mxu0 }
 0xe95   : > { %v2626_v5 = vmul.f32 0.088388346, %v2620_v4  ;;  %v4958_v6 = vpop.f32.mrb[41].mxu0 }
 0xe96   : > { %v2623_v8 = vpop.f32.mrb[42].mxu0  ;;  %v2851_v28 = vpop.f32.mrb[36].mxu1 }
 0xe97   : > { %v2627_v30 = vsel %vm1364_vm1, %v2626_v5, -inf  ;;  %v2857_v24 = vmul.f32 0.088388346, %v2851_v28  ;;  %v4959_v32 = vpop.f32.mrb[43].mxu0  ;;  %v4982_v35 = vpop.f32.mrb[37].mxu1 }
 0xe98   : > { %v2628_v36 = vrot.slane %v2627_v30, 4  ;;  %v2854_v38 = vpop.f32.mrb[38].mxu1 }
 0xe99   : > { %v2858_v19 = vsel %vm1364_vm1, %v2857_v24, -inf  ;;  %v4983_v14 = vpop.f32.mrb[39].mxu1 }
 0xe9a   : > { %v2629_v41 = vmax.f32 %v2627_v30, %v2628_v36  ;;  %v2859_v33 = vrot.slane %v2858_v19, 4 }
 0xe9c   : > { %v2630_v44 = vrot.slane %v2629_v41, 2  ;;  %v2860_v7 = vmax.f32 %v2858_v19, %v2859_v33 }
 0xe9e   : > { %v2631_v46 = vmax.f32 %v2629_v41, %v2630_v44  ;;  %v2861_v26 = vrot.slane %v2860_v7, 2  ;;  %v2966_v49 = vpop.f32.mrb[40].mxu1 }
 0xe9f   : > { %v2972_v0 = vmul.f32 0.088388346, %v2966_v49  ;;  %v4994_v27 = vpop.f32.mrb[41].mxu1 }
 0xea0   : > { %v2632_v54 = vrot.slane %v2631_v46, 1  ;;  %v2862_v3 = vmax.f32 %v2860_v7, %v2861_v26  ;;  %v2969_v16 = vpop.f32.mrb[42].mxu1 }
 0xea1   : > { %v2973_v10 = vsel %vm1364_vm1, %v2972_v0, -inf  ;;  %v4995_v9 = vpop.f32.mrb[43].mxu1 }
 0xea2   : > { %v2633_v48 = vmax.f32 %v2631_v46, %v2632_v54  ;;  %v2863_v25 = vrot.slane %v2862_v3, 1  ;;  %v2974_v4 = vrot.slane %v2973_v10, 4 }
 0xea4   : > { %v2634_v6 = vsub.f32 %v2626_v5, %v2633_v48  ;;  %v2864_v8 = vmax.f32 %v2862_v3, %v2863_v25  ;;  %v2975_v28 = vmax.f32 %v2973_v10, %v2974_v4 }
 0xea6   : > { %v2635_v30 = vmul.f32 1.442695, %v2634_v6  ;;  %v2865_v32 = vsub.f32 %v2857_v24, %v2864_v8  ;;  %v2976_v35 = vrot.slane %v2975_v28, 2 }
 0xea8   : > { %5582 = vpow2.f32 %v2635_v30  ;;  %v2866_v36 = vmul.f32 1.442695, %v2865_v32  ;;  %v2977_v38 = vmax.f32 %v2975_v28, %v2976_v35 }
 0xeaa   : > { %5584 = vpow2.f32 %v2866_v36  ;;  %v2978_v19 = vrot.slane %v2977_v38, 1 }
 0xeac   : > { %v2979_v14 = vmax.f32 %v2977_v38, %v2978_v19 }
 0xeae   : > { %v2980_v41 = vsub.f32 %v2972_v0, %v2979_v14 }
 0xeb0   : > { %v2981_v33 = vmul.f32 1.442695, %v2980_v41 }
 0xeb2   : > { %v5583_v44 = vpop.eup %5582  ;;  %5586 = vpow2.f32 %v2981_v33 }
 0xeb3   : > { %v2637_v7 = vsel %vm1364_vm1, %v5583_v44, 0.0 }
 0xeb4   : > { %v5585_v46 = vpop.eup %5584  ;;  %v2638_v26 = vrot.slane %v2637_v7, 4 }
 0xeb5   : > { %v2868_v5 = vsel %vm1364_vm1, %v5585_v46, 0.0 }
 0xeb6   : > { %v2639_v49 = vadd.f32 %v2638_v26, %v2637_v7  ;;  %v2869_v27 = vrot.slane %v2868_v5, 4 }
 0xeb8   : > { %v2640_v24 = vrot.slane %v2639_v49, 2  ;;  %v2870_v54 = vadd.f32 %v2869_v27, %v2868_v5 }
 0xeba   : > { %v2641_v3 = vadd.f32 %v2640_v24, %v2639_v49  ;;  %v2871_v16 = vrot.slane %v2870_v54, 2 }
 0xebc   : > { %v5587_v10 = vpop.eup %5586  ;;  %v2872_v9 = vadd.f32 %v2871_v16, %v2870_v54  ;;  %v2642_v48 = vrot.slane %v2641_v3, 1  ;;  %v2700_v16 = vrot.slane %v7092_v2, 2 }
 0xebd   : > { %v2983_v0 = vsel %vm1364_vm1, %v5587_v10, 0.0 }
 0xebe   : > { %v2984_v25 = vrot.slane %v2983_v0, 4  ;;  %v2643_v4 = vadd.f32 %v2642_v48, %v2641_v3  ;;  %v2873_v6 = vrot.slane %v2872_v9, 1 }
 0xec0   : > { %v2985_v8 = vadd.f32 %v2984_v25, %v2983_v0  ;;  %5588 = vrcp.f32 %v2643_v4  ;;  %v2874_v28 = vadd.f32 %v2873_v6, %v2872_v9 }
 0xec2   : > { %v2986_v30 = vrot.slane %v2985_v8, 2  ;;  %5590 = vrcp.f32 %v2874_v28 }
 0xec4   : > { %v2987_v32 = vadd.f32 %v2986_v30, %v2985_v8 }
 0xec6   : > { %v2988_v35 = vrot.slane %v2987_v32, 1 }
 0xec8   : > { %v2989_v36 = vadd.f32 %v2988_v35, %v2987_v32 }
 0xeca   : > { %v5589_v38 = vpop.eup %5588  ;;  %5592 = vrcp.f32 %v2989_v36 }
 0xecb   : > { %v2645_v19 = vmul.f32 %v5589_v38, %v5583_v44 }
 0xecc   : > { %v5591_v14 = vpop.eup %5590 }
 0xecd   : > { %v2646_v41 = vadd.f32 1e-08, %v2645_v19  ;;  %v2876_v33 = vmul.f32 %v5591_v14, %v5585_v46 }
 0xecf   : > { %v2649_v7 = vsel %vm1364_vm1, %v2646_v41, 0.0  ;;  %4576 = vst.msk [vmem:[%s6759_s28 + $0x4] sm:$0xf] %vm1364_vm1, %v2646_v41  ;;  %v7131_v26 = vadd.f32 1e-08, %v2876_v33 }
 0xed0   : > { %2650 = vadd.xlane.f32.xlu0 %v2649_v7 }
 0xed1   : > { %4580 = vst.msk [vmem:[%s6759_s28 + $0x1c] sm:$0xf] %vm1364_vm1, %v7131_v26  ;;  %v2880_v5 = vsel %vm1364_vm1, %v7131_v26, 0.0 }
 0xed4   : > { %v5593_v49 = vpop.eup %5592  ;;  %2881 = vadd.xlane.f32.xlu0 %v2880_v5 }
 0xed5   : > { %v2991_v27 = vmul.f32 %v5593_v49, %v5587_v10 }
 0xed7   : > { %v7138_v44 = vadd.f32 1e-08, %v2991_v27 }
 0xed9   : > { %4582 = vst.msk [vmem:[%s6759_s28 + $0x28] sm:$0xf] %vm1364_vm1, %v7138_v44 }
 0xf5d   : > { %v2651_v46 = vpop.xlane.xlu0 %2650 }
 0xf5e   : > { %5594 = vrcp.f32 %v2651_v46 }
 0xf68   : > { %v5595_v24 = vpop.eup %5594 }
 0xf69   : > { %v2653_v54 = vmul.f32 %v5595_v24, %v2646_v41 }
 0xf6b   : > { %v2654_v3 = vpack.c.bf16 %v2653_v54, %v2653_v54 }
 0xf6d   : > { %4963 = vmatmul.mubr.msk.bf16.vlgmr.msra.gmra.mrb[44].mxu0 %vm1392_vm2, %v2654_v3 }
 0xf6e   : > { %4967 = vmatpush3.bf16.xpose.msra.mxu0 %v6741_v34  ;;  %4968 = vmatprep.mubr.msk.bf16.mxu0 %vm6126_vm0, %v7778_v21 }
 0xf6f   : > { %4972 = vmatprep.subr.bf16.mxu0 %v7778_v21 }
 0xf75   : > { %4969 = vmatmul.mubr.bf16.vlgmr.msra.gmra.mrb[48].mxu0 %v2700_v16 }
 0xf76   : > { %4973 = vmatpush3.bf16.msra.mxu0 %v6743_v20  ;;  %4974 = vmatprep.mubr.msk.bf16.mxu0 %vm6126_vm0, %v7778_v21 }
 0xf77   : > { %4984 = vmatprep.subr.bf16.mxu0 %v7778_v21 }
0x1040   : > { %v2692_v10 = vpop.f32.mrb[44].mxu0 }
0x1041   : > { %2698 = vst [vmem:[#allocation2] sm:$0xf] %v2692_v10  ;;  %v4964_v9 = vpop.f32.mrb[45].mxu0 }
0x1042   : > { %v2695_v48 = vpop.f32.mrb[46].mxu0 }
0x1043   : > { %v4965_v0 = vpop.f32.mrb[47].mxu0  ;;  %v2995_v48 = vsel %vm1364_vm1, %v7138_v44, 0.0 }
0x1048   : > { %v2736_v25 = vpop.f32.mrb[48].mxu0 }
0x1049   : > { %v2742_v4 = vmul.f32 0.088388346, %v2736_v25  ;;  %v4970_v6 = vpop.f32.mrb[49].mxu0  ;;  %v2882_v25 = vpop.xlane.xlu0 %2881 }
0x104a   : > { %v2739_v8 = vpop.f32.mrb[50].mxu0 }
0x104b   : > { %v2743_v28 = vsel %vm1364_vm1, %v2742_v4, -inf  ;;  %v4971_v2 = vpop.f32.mrb[51].mxu0 }
0x104c   : > { %v2744_v30 = vrot.slane %v2743_v28, 4 }
0x104e   : > { %v2745_v32 = vmax.f32 %v2743_v28, %v2744_v30 }
0x1050   : > { %v2746_v35 = vrot.slane %v2745_v32, 2 }
0x1052   : > { %v2747_v36 = vmax.f32 %v2745_v32, %v2746_v35 }
0x1054   : > { %v2748_v38 = vrot.slane %v2747_v36, 1 }
0x1056   : > { %v2749_v19 = vmax.f32 %v2747_v36, %v2748_v38 }
0x1058   : > { %v2750_v14 = vsub.f32 %v2742_v4, %v2749_v19  ;;  %v7173_v19 = vld [vmem:[#allocation11 + $0x8] ss:$12 sps:$4 sm:$0xff]  }
0x105a   : > { %v2751_v41 = vmul.f32 1.442695, %v2750_v14  ;;  %v7187_v14 = vld [vmem:[#allocation11 + $0x50] ss:$12 sps:$4 sm:$0xff]  }
0x105c   : > { %5596 = vpow2.f32 %v2751_v41  ;;  %v7191_v41 = vld [vmem:[#allocation11 + $0x68] ss:$12 sps:$4 sm:$0xff]  }
0x1066   : > { %v5597_v33 = vpop.eup %5596 }
0x1067   : > { %v2753_v7 = vsel %vm1364_vm1, %v5597_v33, 0.0 }
0x1068   : > { %v2754_v5 = vrot.slane %v2753_v7, 4 }
0x106a   : > { %v2755_v49 = vadd.f32 %v2754_v5, %v2753_v7  ;;  %v7199_v7 = vld [vmem:[#allocation11 + $0x98] ss:$12 sps:$4 sm:$0xff]   ;;  %v7203_v5 = vld [vmem:[#allocation11 + $0xb0] ss:$12 sps:$4 sm:$0xff]  }
0x106c   : > { %v2756_v27 = vrot.slane %v2755_v49, 2 }
0x106e   : > { %v2757_v46 = vadd.f32 %v2756_v27, %v2755_v49 }
0x1070   : > { %v2758_v24 = vrot.slane %v2757_v46, 1 }
0x1072   : > { %v2759_v54 = vadd.f32 %v2758_v24, %v2757_v46 }
0x1074   : > { %5598 = vrcp.f32 %v2759_v54 }
0x107e   : > { %v5599_v3 = vpop.eup %5598 }
0x107f   : > { %v2761_v16 = vmul.f32 %v5599_v3, %v5597_v33  ;;  %v7195_v33 = vld [vmem:[#allocation11 + $0x80] ss:$12 sps:$4 sm:$0xff]  }
0x1081   : > { %v2762_v10 = vadd.f32 1e-08, %v2761_v16 }
0x1083   : > { %v2765_v9 = vsel %vm1364_vm1, %v2762_v10, 0.0  ;;  %4578 = vst.msk [vmem:[%s6759_s28 + $0x10] sm:$0xf] %vm1364_vm1, %v2762_v10 }
0x1084   : > { %2766 = vadd.xlane.f32.xlu1 %v2765_v9 }
0x1088   : > { %2996 = vadd.xlane.f32.xlu1 %v2995_v48 }
0x1111   : > { %v2767_v0 = vpop.xlane.xlu1 %2766 }
0x1112   : > { %5600 = vrcp.f32 %v2767_v0 }
0x1113   : > { %5602 = vrcp.f32 %v2882_v25 }
0x1115   : > { %v2997_v4 = vpop.xlane.xlu1 %2996 }
0x1116   : > { %5604 = vrcp.f32 %v2997_v4 }
0x111c   : > { %v5601_v6 = vpop.eup %5600 }
0x111d   : > { %v2769_v8 = vmul.f32 %v5601_v6, %v2762_v10  ;;  %v5603_v2 = vpop.eup %5602 }
0x111e   : > { %v2884_v30 = vmul.f32 %v5603_v2, %v7131_v26  ;;  %v7179_v26 = vld [vmem:[#allocation11 + $0x20] ss:$12 sps:$4 sm:$0xff]   ;;  %v7210_v2 = vld [vmem:[#allocation12 + $0x8] ss:$12 sps:$4 sm:$0xff]  }
0x111f   : > { %v2770_v28 = vpack.c.bf16 %v2769_v8, %v2769_v8 }
0x1120   : > { %v2885_v32 = vpack.c.bf16 %v2884_v30, %v2884_v30  ;;  %v5605_v35 = vpop.eup %5604  ;;  %v7213_v30 = vld [vmem:[#allocation12 + $0x1c] ss:$12 sps:$4 sm:$0xff]  }
0x1121   : > { %4975 = vmatmul.mubr.msk.bf16.vlgmr.msra.gmra.mrb[52].mxu0 %vm1392_vm2, %v2770_v28  ;;  %v2999_v36 = vmul.f32 %v5605_v35, %v7138_v44  ;;  %v7183_v44 = vld [vmem:[#allocation11 + $0x38] ss:$12 sps:$4 sm:$0xff]   ;;  %v7207_v28 = vld [vmem:[#allocation12] ss:$12 sps:$4 sm:$0xff]  }
0x1122   : > { %4985 = vmatpush3.bf16.msra.mxu0 %v6749_v53  ;;  %4986 = vmatprep.mubr.msk.bf16.mxu0 %vm6126_vm0, %v7778_v21  ;;  %v7223_v35 = vld [vmem:[#allocation12 + $0x20] ss:$12 sps:$4 sm:$0xff]  }
0x1123   : > { %4996 = vmatprep.subr.bf16.mxu0 %v7778_v21  ;;  %v3000_v38 = vpack.c.bf16 %v2999_v36, %v2999_v36  ;;  %v7226_v36 = vld [vmem:[#allocation12 + $0x34] ss:$12 sps:$4 sm:$0xff]  }
0x1129   : > { %4987 = vmatmul.mubr.msk.bf16.vlgmr.msra.gmra.mrb[56].mxu0 %vm1392_vm2, %v2885_v32  ;;  %v7220_v32 = vld [vmem:[#allocation12 + $0x18] ss:$12 sps:$4 sm:$0xff]  }
0x112a   : > { %4997 = vmatpush3.bf16.msra.mxu0 %v6753_v59  ;;  %4998 = vmatprep.mubr.msk.bf16.mxu0 %vm6126_vm0, %v7778_v21 }
0x112b   : > { %5002 = vmatprep.subr.bf16.mxu0 %v7778_v21 }
0x1131   : > { %4999 = vmatmul.mubr.msk.bf16.vlgmr.msra.gmra.mrb[60].mxu0 %vm1392_vm2, %v3000_v38  ;;  %v7230_v38 = vld [vmem:[#allocation12 + $0x30] ss:$12 sps:$4 sm:$0xff]  }
0x1132   : > { %5003 = vmatpush3.bf16.msra.mxu0 %v7173_v19  ;;  %5018 = vmatprep.mubr.msk.bf16.mxu0 %vm6126_vm0, %v7778_v21 }
0x1133   : > { %5004 = vmatprep.subr.bf16.mxu0 %v7778_v21 }
0x1136   : > { %5005 = vmatpush3.bf16.msra.mxu0 %v7179_v26 }
0x1137   : > { %5006 = vmatprep.subr.bf16.mxu0 %v7778_v21 }
0x113a   : > { %5007 = vmatpush3.bf16.msra.mxu0 %v7183_v44 }
0x113b   : > { %5008 = vmatprep.subr.bf16.mxu0 %v7778_v21 }
0x113e   : > { %5009 = vmatpush3.bf16.msra.mxu0 %v7187_v14 }
0x113f   : > { %5010 = vmatprep.subr.bf16.mxu0 %v7778_v21 }
0x1142   : > { %5011 = vmatpush3.bf16.msra.mxu0 %v7191_v41 }
0x1143   : > { %5012 = vmatprep.subr.bf16.mxu0 %v7778_v21 }
0x1146   : > { %5013 = vmatpush3.bf16.msra.mxu0 %v7195_v33 }
0x1147   : > { %5014 = vmatprep.subr.bf16.mxu0 %v7778_v21 }
0x114a   : > { %5015 = vmatpush3.bf16.msra.mxu0 %v7199_v7 }
0x114b   : > { %5016 = vmatprep.subr.bf16.mxu0 %v7778_v21 }
0x114e   : > { %5017 = vmatpush3.bf16.msra.mxu0 %v7203_v5 }
0x114f   : > { %5022 = vmatprep.subr.bf16.mxu0 %v7778_v21 }
0x11f4   : > { %v2808_v49 = vpop.f32.mrb[52].mxu0 }
0x11f5   : > { %2814 = vst [vmem:[#allocation2 + $0x4] sm:$0xf] %v2808_v49  ;;  %v4976_v27 = vpop.f32.mrb[53].mxu0  ;;  %v7233_v49 = vld [vmem:[#allocation12 + $0x38] ss:$12 sps:$4 sm:$0xff]  }
0x11f6   : > { %v2811_v46 = vpop.f32.mrb[54].mxu0  ;;  %v7236_v27 = vld [vmem:[#allocation12 + $0x4c] ss:$12 sps:$4 sm:$0xff]  }
0x11f7   : > { %v4977_v24 = vpop.f32.mrb[55].mxu0  ;;  %v7240_v46 = vld [vmem:[#allocation12 + $0x48] ss:$12 sps:$4 sm:$0xff]  }
0x11f8   : > { %v7243_v24 = vld [vmem:[#allocation12 + $0x50] ss:$12 sps:$4 sm:$0xff]  }
0x11fc   : > { %v2923_v54 = vpop.f32.mrb[56].mxu0  ;;  %v3045_v4 = vld [vmem:[#allocation2] sm:$0xff] }
0x11fd   : > { %2929 = vst [vmem:[#allocation2 + $0x8] sm:$0xf] %v2923_v54  ;;  %v4988_v3 = vpop.f32.mrb[57].mxu0  ;;  %v7246_v54 = vld [vmem:[#allocation12 + $0x64] ss:$12 sps:$4 sm:$0xff]  }
0x11fe   : > { %v2926_v16 = vpop.f32.mrb[58].mxu0  ;;  %v7250_v3 = vld [vmem:[#allocation12 + $0x60] ss:$12 sps:$4 sm:$0xff]  }
0x11ff   : > { %v4989_v10 = vpop.f32.mrb[59].mxu0  ;;  %v7253_v16 = vld [vmem:[#allocation12 + $0x68] ss:$12 sps:$4 sm:$0xff]  }
0x1200   : > { %v7256_v10 = vld [vmem:[#allocation12 + $0x7c] ss:$12 sps:$4 sm:$0xff]  }
0x1204   : > { %v3038_v9 = vpop.f32.mrb[60].mxu0 }
0x1205   : > { %3044 = vst [vmem:[#allocation2 + $0xc] sm:$0xf] %v3038_v9  ;;  %v5000_v48 = vpop.f32.mrb[61].mxu0  ;;  %v7260_v9 = vld [vmem:[#allocation12 + $0x78] ss:$12 sps:$4 sm:$0xff]  }
0x1206   : > { %v3041_v0 = vpop.f32.mrb[62].mxu0  ;;  %v7263_v48 = vld [vmem:[#allocation12 + $0x80] ss:$12 sps:$4 sm:$0xff]  }
0x1207   : > { %v5001_v25 = vpop.f32.mrb[63].mxu0  ;;  %v7266_v0 = vld [vmem:[#allocation12 + $0x94] ss:$12 sps:$4 sm:$0xff]  }
0x1208   : > { %v7270_v25 = vld [vmem:[#allocation12 + $0x90] ss:$12 sps:$4 sm:$0xff]  }
0x120c   : > { %v3046_v6 = vld [vmem:[#allocation2 + $0x8] sm:$0xff] }
0x120d   : > { %v3047_v8 = vpack.c.bf16 %v3046_v6, %v3045_v4  ;;  %v3132_v4 = vpack.c.bf16 %v7068_v31, %v7064_v43 }
0x120f   : > { %3081 = vmatmul.mubr.bf16.vlgmr.msra.gmra.mrb[44].mxu1 %v3047_v8  ;;  %5019 = vmatmul.mubr.bf16.vlgmr.msra.gmra.mrb[64].mxu0 %v3047_v8 }
0x1210   : > { %3134 = vmatpush1.bf16.msra.mxu1 %v7207_v28  ;;  %5023 = vmatpush3.bf16.msra.mxu0 %v7210_v2 }
0x1211   : > { %3135 = vmatprep.subr.bf16.mxu1 %v7213_v30  ;;  %5024 = vmatprep.subr.bf16.mxu0 %v7778_v21 }
0x1212   : > { %3165 = vmatprep.mubr.bf16.mxu1 %v7779_v23  ;;  %5038 = vmatprep.mubr.msk.bf16.mxu0 %vm6126_vm0, %v7778_v21 }
0x1214   : > { %3136 = vmatpush1.bf16.msra.mxu1 %v7220_v32  ;;  %5025 = vmatpush3.bf16.msra.mxu0 %v7223_v35 }
0x1215   : > { %3137 = vmatprep.subr.bf16.mxu1 %v7226_v36  ;;  %5026 = vmatprep.subr.bf16.mxu0 %v7778_v21 }
0x1218   : > { %3138 = vmatpush1.bf16.msra.mxu1 %v7230_v38  ;;  %5027 = vmatpush3.bf16.msra.mxu0 %v7233_v49 }
0x1219   : > { %3139 = vmatprep.subr.bf16.mxu1 %v7236_v27  ;;  %5028 = vmatprep.subr.bf16.mxu0 %v7778_v21 }
0x121c   : > { %3140 = vmatpush1.bf16.msra.mxu1 %v7240_v46  ;;  %5029 = vmatpush3.bf16.msra.mxu0 %v7243_v24 }
0x121d   : > { %3141 = vmatprep.subr.bf16.mxu1 %v7246_v54  ;;  %5030 = vmatprep.subr.bf16.mxu0 %v7778_v21 }
0x1220   : > { %3142 = vmatpush1.bf16.msra.mxu1 %v7250_v3  ;;  %5031 = vmatpush3.bf16.msra.mxu0 %v7253_v16 }
0x1221   : > { %3143 = vmatprep.subr.bf16.mxu1 %v7256_v10  ;;  %5032 = vmatprep.subr.bf16.mxu0 %v7778_v21 }
0x1224   : > { %3144 = vmatpush1.bf16.msra.mxu1 %v7260_v9  ;;  %5033 = vmatpush3.bf16.msra.mxu0 %v7263_v48 }
0x1225   : > { %3145 = vmatprep.subr.bf16.mxu1 %v7266_v0  ;;  %5034 = vmatprep.subr.bf16.mxu0 %v7778_v21 }
0x1228   : > { %3146 = vmatpush1.bf16.msra.mxu1 %v7270_v25  ;;  %5035 = vmatpush3.bf16.msra.mxu0 %v6874_v40 }
0x1229   : > { %3147 = vmatprep.subr.bf16.mxu1 %v6876_v12  ;;  %5036 = vmatprep.subr.bf16.mxu0 %v7778_v21 }
0x122c   : > { %3148 = vmatpush1.bf16.msra.mxu1 %v6879_v45  ;;  %5037 = vmatpush3.bf16.msra.mxu0 %v6882_v47 }
0x122d   : > { %5042 = vmatprep.subr.bf16.mxu1 %v7778_v21  ;;  %5062 = vmatprep.subr.bf16.mxu0 %v7778_v21 }
0x122f   : > { %3166 = vmatmul.mubr.bf16.vlgmr.msra.gmra.mrb[44].mxu1 %v3132_v4  ;;  %5039 = vmatmul.mubr.bf16.vlgmr.msra.gmra.mrb[68].mxu0 %v3132_v4 }
0x1230   : > { %5043 = vmatpush3.bf16.msra.mxu1 %v6932_v17  ;;  %5058 = vmatprep.mubr.msk.bf16.mxu1 %vm6126_vm0, %v7778_v21 }
0x1231   : > { %5044 = vmatprep.subr.bf16.mxu1 %v7778_v21  ;;  %5063 = vmatpush3.bf16.msra.mxu0 %v6966_v63 }
0x1232   : > { %5064 = vmatprep.subr.bf16.mxu0 %v7778_v21  ;;  %5078 = vmatprep.mubr.msk.bf16.mxu0 %vm6126_vm0, %v7778_v21 }
0x1234   : > { %5045 = vmatpush3.bf16.msra.mxu1 %v6935_v22 }
0x1235   : > { %5046 = vmatprep.subr.bf16.mxu1 %v7778_v21  ;;  %5065 = vmatpush3.bf16.msra.mxu0 %v6969_v55 }
0x1236   : > { %5066 = vmatprep.subr.bf16.mxu0 %v7778_v21 }
0x1238   : > { %5047 = vmatpush3.bf16.msra.mxu1 %v6942_v29 }
0x1239   : > { %5048 = vmatprep.subr.bf16.mxu1 %v7778_v21  ;;  %5067 = vmatpush3.bf16.msra.mxu0 %v6973_v56 }
0x123a   : > { %5068 = vmatprep.subr.bf16.mxu0 %v7778_v21 }
0x123c   : > { %5049 = vmatpush3.bf16.msra.mxu1 %v6946_v37 }
0x123d   : > { %5050 = vmatprep.subr.bf16.mxu1 %v7778_v21  ;;  %5069 = vmatpush3.bf16.msra.mxu0 %v6977_v18 }
0x123e   : > { %5070 = vmatprep.subr.bf16.mxu0 %v7778_v21 }
0x1240   : > { %5051 = vmatpush3.bf16.msra.mxu1 %v6950_v42 }
0x1241   : > { %5052 = vmatprep.subr.bf16.mxu1 %v7778_v21  ;;  %5071 = vmatpush3.bf16.msra.mxu0 %v6981_v60 }
0x1242   : > { %5072 = vmatprep.subr.bf16.mxu0 %v7778_v21 }
0x1244   : > { %5053 = vmatpush3.bf16.msra.mxu1 %v6954_v58  ;;  %v7780_v58 = vld [vmem:[#allocation31_spill] sm:$0xff] }
0x1245   : > { %5054 = vmatprep.subr.bf16.mxu1 %v7778_v21  ;;  %5073 = vmatpush3.bf16.msra.mxu0 %v6985_v62 }
0x1246   : > { %5074 = vmatprep.subr.bf16.mxu0 %v7778_v21 }
0x1248   : > { %5055 = vmatpush3.bf16.msra.mxu1 %v6958_v61 }
0x1249   : > { %5056 = vmatprep.subr.bf16.mxu1 %v7778_v21  ;;  %5075 = vmatpush3.bf16.msra.mxu0 %v6989_v50 }
0x124a   : > { %5076 = vmatprep.subr.bf16.mxu0 %v7778_v21 }
0x124c   : > { %5057 = vmatpush3.bf16.msra.mxu1 %v6961_v52 }
0x124d   : > { %5077 = vmatpush3.bf16.msra.mxu0 %v7042_v1  ;;  %5082 = vmatprep.subr.bf16.mxu1 %v7778_v21 }
0x124e   : > { %5102 = vmatprep.subr.bf16.mxu0 %v7778_v21 }
0x12e2   : > { %v3125_v40 = vpop.f32.mrb[64].mxu0 }
0x12e3   : > { %v5020_v12 = vpop.f32.mrb[65].mxu0 }
0x12e4   : > { %v3128_v45 = vpop.f32.mrb[66].mxu0 }
0x12e5   : > { %v5021_v47 = vpop.f32.mrb[67].mxu0 }
0x1302   : > { %v3167_v17 = vpop.f32.mrb[44].mxu1  ;;  %v3210_v22 = vpop.f32.mrb[68].mxu0 }
0x1303   : > { %v5239_v29 = vadd.f32 %v6908_v15, %v3167_v17  ;;  %v3169_v37 = vpop.f32.mrb[45].mxu1  ;;  %v5040_v42 = vpop.f32.mrb[69].mxu0 }
0x1304   : > { %v5241_v61 = vadd.f32 %v7780_v58, %v3169_v37  ;;  %v3171_v63 = vpop.f32.mrb[46].mxu1  ;;  %v3213_v52 = vpop.f32.mrb[70].mxu0 }
0x1305   : > { %v3219_v55 = vsub.f32 0.0, %v5239_v29  ;;  %v5243_v56 = vadd.f32 %v6908_v15, %v3171_v63  ;;  %v3173_v18 = vpop.f32.mrb[47].mxu1  ;;  %v5041_v60 = vpop.f32.mrb[71].mxu0 }
0x1306   : > { %v5245_v62 = vadd.f32 %v7780_v58, %v3173_v18  ;;  %v3231_v6 = vsub.f32 0.0, %v5241_v61 }
0x1307   : > { %v3221_v50 = vmul.f32 1.442695, %v3219_v55  ;;  %v3220_v1 = vsub.f32 0.0, %v5243_v56  ;;  %v7781_v55 = vld [vmem:[#allocation32_spill] sm:$0xff] }
0x1308   : > { %v3232_v4 = vsub.f32 0.0, %v5245_v62  ;;  %v3233_v12 = vmul.f32 1.442695, %v3231_v6  ;;  %v3211_v56 = vadd.f32 %v3210_v22, %v7781_v55  ;;  %v3214_v6 = vadd.f32 %v3213_v52, %v7781_v55 }
0x1309   : > { %5606 = vpow2.f32 %v3221_v50  ;;  %v3223_v8 = vmul.f32 1.442695, %v3220_v1  ;;  %v7782_v1 = vld [vmem:[#allocation33_spill] sm:$0xff] }
0x130a   : > { %v3235_v47 = vmul.f32 1.442695, %v3232_v4  ;;  %v3126_v62 = vadd.f32 %v3125_v40, %v7782_v1 }
0x130b   : > { %5608 = vpow2.f32 %v3223_v8 }
0x130c   : > { %5610 = vpow2.f32 %v3233_v12  ;;  %v3129_v12 = vadd.f32 %v3128_v45, %v7782_v1 }
0x130d   : > { %5612 = vpow2.f32 %v3235_v47 }
0x1313   : > { %v5607_v17 = vpop.eup %5606 }
0x1314   : > { %v3225_v37 = vadd.f32 1.0, %v5607_v17 }
0x1315   : > { %v5609_v29 = vpop.eup %5608 }
0x1316   : > { %5614 = vrcp.f32 %v3225_v37  ;;  %v3226_v42 = vadd.f32 1.0, %v5609_v29  ;;  %v5611_v63 = vpop.eup %5610 }
0x1317   : > { %v5613_v60 = vpop.eup %5612  ;;  %v3237_v18 = vadd.f32 1.0, %v5611_v63 }
0x1318   : > { %5616 = vrcp.f32 %v3226_v42  ;;  %v3238_v61 = vadd.f32 1.0, %v5613_v60 }
0x1319   : > { %5618 = vrcp.f32 %v3237_v18 }
0x131a   : > { %5620 = vrcp.f32 %v3238_v61 }
0x1320   : > { %v5615_v50 = vpop.eup %5614 }
0x1321   : > { %v3241_v8 = vmul.f32 %v5615_v50, %v3211_v56 }
0x1322   : > { %v5617_v4 = vpop.eup %5616 }
0x1323   : > { %v3243_v47 = vadd.f32 %v3241_v8, %v3126_v62  ;;  %v3242_v17 = vmul.f32 %v5617_v4, %v3214_v6  ;;  %v5619_v29 = vpop.eup %5618 }
0x1324   : > { %v5621_v42 = vpop.eup %5620  ;;  %v3247_v22 = vsub.f32 1.0, %v5619_v29  ;;  %v3251_v40 = vmul.f32 %v5619_v29, %v7064_v43 }
0x1325   : > { %5622 = vtanh.f32 %v3243_v47  ;;  %v3244_v37 = vadd.f32 %v3242_v17, %v3129_v12  ;;  %v3248_v56 = vsub.f32 1.0, %v5621_v42  ;;  %v3252_v45 = vmul.f32 %v5621_v42, %v7068_v31 }
0x1327   : > { %5624 = vtanh.f32 %v3244_v37 }
0x132f   : > { %v5623_v63 = vpop.eup %5622 }
0x1330   : > { %v3249_v60 = vmul.f32 %v5623_v63, %v3247_v22 }
0x1331   : > { %v5625_v18 = vpop.eup %5624 }
0x1332   : > { %v7327_v50 = vadd.f32 %v3251_v40, %v3249_v60  ;;  %v3250_v52 = vmul.f32 %v5625_v18, %v3248_v56 }
0x1334   : > { %3255 = vadd.xlane.f32.xlu0 %v7327_v50  ;;  %v7331_v61 = vadd.f32 %v3252_v45, %v3250_v52  ;;  %v7783_v52 = vld [vmem:[#allocation34_spill] sm:$0xff] }
0x1336   : > { %3257 = vadd.xlane.f32.xlu1 %v7331_v61 }
0x13c1   : > { %v3256_v62 = vpop.xlane.xlu0 %3255 }
0x13c2   : > { %v3259_v8 = vmul.f32 0.0078125, %v3256_v62 }
0x13c3   : > { %v3258_v6 = vpop.xlane.xlu1 %3257 }
0x13c4   : > { %v3261_v4 = vsub.f32 %v7327_v50, %v3259_v8  ;;  %v3260_v12 = vmul.f32 0.0078125, %v3258_v6  ;;  %v7784_v8 = vld [vmem:[#allocation35_spill] sm:$0xff] }
0x13c6   : > { %v3262_v43 = vsub.f32 %v7331_v61, %v3260_v12  ;;  %v3263_v47 = vmul.f32 %v3261_v4, %v3261_v4 }
0x13c8   : > { %3265 = vadd.xlane.f32.xlu0 %v3263_v47  ;;  %v3264_v17 = vmul.f32 %v3262_v43, %v3262_v43 }
0x13ca   : > { %3267 = vadd.xlane.f32.xlu1 %v3264_v17  ;;  %v7785_v17 = vld [vmem:[#allocation36_spill] sm:$0xff] }
0x1455   : > { %v3266_v37 = vpop.xlane.xlu0 %3265 }
0x1456   : > { %v3269_v31 = vmul.f32 0.0078125, %v3266_v37  ;;  %v7788_v37 = vld [vmem:[#allocation39_spill] sm:$0xff] }
0x1457   : > { %v3268_v29 = vpop.xlane.xlu1 %3267 }
0x1458   : > { %v3271_v42 = vadd.f32 1e-05, %v3269_v31  ;;  %v3270_v22 = vmul.f32 0.0078125, %v3268_v29  ;;  %v7789_v31 = vld [vmem:[#allocation40_spill] sm:$0xff]  ;;  %v7790_v29 = vld [vmem:[#allocation41_spill] sm:$0xff] }
0x145a   : > { %5626 = vrsqrt.f32 %v3271_v42  ;;  %v3272_v63 = vadd.f32 1e-05, %v3270_v22  ;;  %v7791_v42 = vld [vmem:[#allocation42_spill] sm:$0xff]  ;;  %v7792_v22 = vld [vmem:[#allocation43_spill] sm:$0xff] }
0x145c   : > { %5628 = vrsqrt.f32 %v3272_v63 }
0x1464   : > { %v5627_v60 = vpop.eup %5626 }
0x1465   : > { %v3275_v40 = vmul.f32 %v5627_v60, %v3261_v4  ;;  %v7786_v4 = vld [vmem:[#allocation37_spill] sm:$0xff]  ;;  %v7793_v60 = vld [vmem:[#allocation44_spill] sm:$0xff] }
0x1466   : > { %v5629_v56 = vpop.eup %5628 }
0x1467   : > { %v3276_v18 = vmul.f32 %v5629_v56, %v3262_v43  ;;  %v3277_v45 = vmul.f32 %v7783_v52, %v3275_v40  ;;  %v7787_v43 = vld [vmem:[#allocation38_spill] sm:$0xff] }
0x1469   : > { %v3278_v62 = vmul.f32 %v7783_v52, %v3276_v18  ;;  %v3279_v6 = vadd.f32 %v7784_v8, %v3277_v45 }
0x146b   : > { %v3280_v12 = vadd.f32 %v7784_v8, %v3278_v62 }
0x146d   : > { %v3281_v47 = vpack.c.bf16 %v3280_v12, %v3279_v6  ;;  %v7794_v12 = vld [vmem:[#allocation30_spill] sm:$0xff] }
0x146f   : > { %5059 = vmatmul.mubr.bf16.vlgmr.msra.gmra.mrb[48].mxu1 %v3281_v47 }
0x1470   : > { %5083 = vmatpush3.bf16.msra.mxu1 %v7785_v17  ;;  %5098 = vmatprep.mubr.msk.bf16.mxu1 %vm6126_vm0, %v7778_v21 }
0x1471   : > { %5084 = vmatprep.subr.bf16.mxu1 %v7778_v21 }
0x1474   : > { %5085 = vmatpush3.bf16.msra.mxu1 %v7786_v4 }
0x1475   : > { %5086 = vmatprep.subr.bf16.mxu1 %v7778_v21 }
0x1478   : > { %5087 = vmatpush3.bf16.msra.mxu1 %v7787_v43 }
0x1479   : > { %5088 = vmatprep.subr.bf16.mxu1 %v7778_v21 }
0x147c   : > { %5089 = vmatpush3.bf16.msra.mxu1 %v7788_v37  ;;  %v7795_v37 = vld [vmem:[#allocation45_spill] sm:$0xff] }
0x147d   : > { %5090 = vmatprep.subr.bf16.mxu1 %v7778_v21 }
0x1480   : > { %5091 = vmatpush3.bf16.msra.mxu1 %v7789_v31 }
0x1481   : > { %5092 = vmatprep.subr.bf16.mxu1 %v7778_v21 }
0x1484   : > { %5093 = vmatpush3.bf16.msra.mxu1 %v7790_v29 }
0x1485   : > { %5094 = vmatprep.subr.bf16.mxu1 %v7778_v21 }
0x1488   : > { %5095 = vmatpush3.bf16.msra.mxu1 %v7791_v42 }
0x1489   : > { %5096 = vmatprep.subr.bf16.mxu1 %v7778_v21 }
0x148c   : > { %5097 = vmatpush3.bf16.msra.mxu1 %v7792_v22 }
0x148d   : > { %5126 = vmatprep.subr.bf16.mxu1 %v7778_v21 }
0x1542   : > { %v3316_v63 = vpop.f32.mrb[48].mxu1 }
0x1543   : > { %v3317_v40 = vadd.f32 %v7793_v60, %v3316_v63  ;;  %v5060_v56 = vpop.f32.mrb[49].mxu1 }
0x1544   : > { %v3319_v18 = vpop.f32.mrb[50].mxu1 }
0x1545   : > { %v3320_v52 = vadd.f32 %v7793_v60, %v3319_v18  ;;  %v5061_v45 = vpop.f32.mrb[51].mxu1  ;;  %v3323_v62 = vmax.f32 %v3317_v40, 0.0 }
0x1547   : > { %v3324_v8 = vmax.f32 %v3320_v52, 0.0 }
0x1549   : > { %v3325_v6 = vpack.c.bf16 %v3324_v8, %v3323_v62 }
0x154b   : > { %5079 = vmatmul.mubr.bf16.vlgmr.msra.gmra.mrb[72].mxu0 %v3325_v6 }
0x154c   : > { %5103 = vmatpush3.bf16.xpose.msra.mxu0 %v7794_v12  ;;  %5104 = vmatprep.mubr.msk.bf16.mxu0 %vm6126_vm0, %v7778_v21 }
0x154d   : > { %5108 = vmatprep.subr.bf16.mxu0 %v7778_v21 }
0x161e   : > { %v3360_v47 = vpop.f32.mrb[72].mxu0 }
0x161f   : > { %v3367_v17 = vadd.f32 %v3360_v47, %v7327_v50  ;;  %v5080_v4 = vpop.f32.mrb[73].mxu0 }
0x1620   : > { %v3363_v43 = vpop.f32.mrb[74].mxu0 }
0x1621   : > { %v7366_v31 = vadd.f32 %v7795_v37, %v3367_v17  ;;  %v3368_v29 = vadd.f32 %v3363_v43, %v7331_v61  ;;  %v5081_v42 = vpop.f32.mrb[75].mxu0 }
0x1623   : > { %v7370_v22 = vadd.f32 %v7795_v37, %v3368_v29  ;;  %3371 = vadd.xlane.f32.xlu0 %v7366_v31 }
0x1625   : > { %3373 = vadd.xlane.f32.xlu1 %v7370_v22 }
0x16b0   : > { %v3372_v63 = vpop.xlane.xlu0 %3371 }
0x16b1   : > { %v3375_v60 = vmul.f32 0.0078125, %v3372_v63 }
0x16b2   : > { %v3374_v40 = vpop.xlane.xlu1 %3373 }
0x16b3   : > { %v3377_v50 = vsub.f32 %v7366_v31, %v3375_v60  ;;  %v3376_v56 = vmul.f32 0.0078125, %v3374_v40 }
0x16b5   : > { %v3378_v18 = vsub.f32 %v7370_v22, %v3376_v56  ;;  %v3379_v52 = vmul.f32 %v3377_v50, %v3377_v50 }
0x16b7   : > { %3381 = vadd.xlane.f32.xlu0 %v3379_v52  ;;  %v3380_v45 = vmul.f32 %v3378_v18, %v3378_v18 }
0x16b9   : > { %3383 = vadd.xlane.f32.xlu1 %v3380_v45 }
0x1744   : > { %v3382_v61 = vpop.xlane.xlu0 %3381 }
0x1745   : > { %v3385_v62 = vmul.f32 0.0078125, %v3382_v61  ;;  %v5722_v61 = vld [vmem:[#allocation11] ss:$12 sps:$4 sm:$0xff]  }
0x1746   : > { %v3384_v8 = vpop.xlane.xlu1 %3383 }
0x1747   : > { %v3387_v6 = vadd.f32 1e-05, %v3385_v62  ;;  %v3386_v12 = vmul.f32 0.0078125, %v3384_v8  ;;  %v5724_v62 = vld [vmem:[#allocation11 + $0x18] ss:$12 sps:$4 sm:$0xff]  }
0x1748   : > { %v5725_v8 = vld [vmem:[#allocation11 + $0x34] ss:$12 sps:$4 sm:$0xff]  }
0x1749   : > { %5630 = vrsqrt.f32 %v3387_v6  ;;  %v3388_v47 = vadd.f32 1e-05, %v3386_v12  ;;  %v5726_v6 = vld [vmem:[#allocation11 + $0x30] ss:$12 sps:$4 sm:$0xff]   ;;  %v5728_v12 = vld [vmem:[#allocation11 + $0x48] ss:$12 sps:$4 sm:$0xff]  }
0x174b   : > { %5632 = vrsqrt.f32 %v3388_v47  ;;  %v5729_v47 = vld [vmem:[#allocation11 + $0x64] ss:$12 sps:$4 sm:$0xff]  }
0x1753   : > { %v5631_v17 = vpop.eup %5630 }
0x1754   : > { %v3391_v4 = vmul.f32 %v5631_v17, %v3377_v50  ;;  %v5730_v17 = vld [vmem:[#allocation11 + $0x60] ss:$12 sps:$4 sm:$0xff]  }
0x1755   : > { %v5633_v43 = vpop.eup %5632 }
0x1756   : > { %v3392_v37 = vmul.f32 %v5633_v43, %v3378_v18  ;;  %v3393_v29 = vmul.f32 %v7077_v39, %v3391_v4  ;;  %v5731_v4 = vld [vmem:[#allocation11 + $0x7c] ss:$12 sps:$4 sm:$0xff]   ;;  %v5732_v43 = vld [vmem:[#allocation11 + $0x78] ss:$12 sps:$4 sm:$0xff]  }
0x1758   : > { %v3394_v42 = vmul.f32 %v7077_v39, %v3392_v37  ;;  %v3395_v63 = vadd.f32 %v7084_v11, %v3393_v29  ;;  %v5733_v37 = vld [vmem:[#allocation11 + $0x94] ss:$12 sps:$4 sm:$0xff]   ;;  %v5734_v29 = vld [vmem:[#allocation11 + $0x90] ss:$12 sps:$4 sm:$0xff]  }
0x175a   : > { %v3396_v60 = vadd.f32 %v7084_v11, %v3394_v42  ;;  %v5735_v42 = vld [vmem:[#allocation11 + $0xac] ss:$12 sps:$4 sm:$0xff]  }
0x175c   : > { %v3397_v40 = vpack.c.bf16 %v3396_v60, %v3395_v63  ;;  %v5736_v63 = vld [vmem:[#allocation11 + $0xa8] ss:$12 sps:$4 sm:$0xff]   ;;  %v5737_v60 = vld [vmem:[#allocation12 + $0x4] ss:$12 sps:$4 sm:$0xff]  }
0x175e   : > { %5099 = vmatmul.mubr.bf16.vlgmr.msra.gmra.mrb[52].mxu1 %v3397_v40 }
0x175f   : > { %5127 = vmatpush3.bf16.xpose.msra.mxu1 %v6747_v51  ;;  %5128 = vmatprep.mubr.msk.bf16.mxu1 %vm6126_vm0, %v7778_v21  ;;  %v5721_v51 = vld [vmem:[#allocation11 + $0x4] ss:$12 sps:$4 sm:$0xff]  }
0x1760   : > { %5138 = vmatprep.subr.bf16.mxu1 %v7778_v21 }
0x1831   : > { %v3432_v50 = vpop.f32.mrb[52].mxu1 }
0x1832   : > { %v5100_v56 = vpop.f32.mrb[53].mxu1 }
0x1833   : > { %v3435_v18 = vpop.f32.mrb[54].mxu1 }
0x1834   : > { %v7384_v52 = vpack.c.bf16 %v3435_v18, %v3432_v50  ;;  %v5101_v45 = vpop.f32.mrb[55].mxu1 }
0x1836   : > { %5105 = vmatmul.mubr.bf16.vlgmr.msra.gmra.mrb[76].mxu0 %v7384_v52  ;;  %v3669_v39 = vrot.slane %v7384_v52, 4  ;;  %v3784_v11 = vrot.slane %v7384_v52, 6 }
0x1837   : > { %5109 = vmatpush3.bf16.msra.mxu0 %v6730_v13  ;;  %5110 = vmatprep.mubr.msk.bf16.mxu0 %vm6126_vm0, %v7778_v21  ;;  %v5723_v13 = vld [vmem:[#allocation11 + $0x1c] ss:$12 sps:$4 sm:$0xff]  }
0x1838   : > { %5129 = vmatmul.mubr.bf16.vlgmr.msra.gmra.mrb[56].mxu1 %v3669_v39  ;;  %5114 = vmatprep.subr.bf16.mxu0 %v7778_v21 }
0x1839   : > { %5139 = vmatpush3.bf16.xpose.msra.mxu1 %v6751_v57  ;;  %5140 = vmatprep.mubr.msk.bf16.mxu1 %vm6126_vm0, %v7778_v21  ;;  %v5727_v57 = vld [vmem:[#allocation11 + $0x4c] ss:$12 sps:$4 sm:$0xff]  }
0x183a   : > { %3902 = vmatprep.subr.bf16.mxu1 %v5721_v51 }
0x1840   : > { %5141 = vmatmul.mubr.bf16.vlgmr.msra.gmra.mrb[60].mxu1 %v3784_v11 }
0x1841   : > { %3903 = vmatpush1.bf16.msra.mxu1 %v5722_v61  ;;  %3934 = vmatprep.mubr.bf16.mxu1 %v7779_v23 }
0x1842   : > { %3904 = vmatprep.subr.bf16.mxu1 %v5723_v13 }
0x1845   : > { %3905 = vmatpush1.bf16.msra.mxu1 %v5724_v62 }
0x1846   : > { %3906 = vmatprep.subr.bf16.mxu1 %v5725_v8 }
0x1849   : > { %3907 = vmatpush1.bf16.msra.mxu1 %v5726_v6 }
0x184a   : > { %3908 = vmatprep.subr.bf16.mxu1 %v5727_v57 }
0x184d   : > { %3909 = vmatpush1.bf16.msra.mxu1 %v5728_v12 }
0x184e   : > { %3910 = vmatprep.subr.bf16.mxu1 %v5729_v47 }
0x1851   : > { %3911 = vmatpush1.bf16.msra.mxu1 %v5730_v17 }
0x1852   : > { %3912 = vmatprep.subr.bf16.mxu1 %v5731_v4 }
0x1855   : > { %3913 = vmatpush1.bf16.msra.mxu1 %v5732_v43 }
0x1856   : > { %3914 = vmatprep.subr.bf16.mxu1 %v5733_v37 }
0x1859   : > { %3915 = vmatpush1.bf16.msra.mxu1 %v5734_v29 }
0x185a   : > { %3916 = vmatprep.subr.bf16.mxu1 %v5735_v42 }
0x185d   : > { %3917 = vmatpush1.bf16.msra.mxu1 %v5736_v63 }
0x185e   : > { %3987 = vmatprep.subr.bf16.mxu1 %v5737_v60 }
0x1909   : > { %v3474_v40 = vpop.f32.mrb[76].mxu0 }
0x190a   : > { %v3480_v50 = vmul.f32 0.088388346, %v3474_v40  ;;  %v5106_v56 = vpop.f32.mrb[77].mxu0 }
0x190b   : > { %v3477_v18 = vpop.f32.mrb[78].mxu0  ;;  %v3705_v45 = vpop.f32.mrb[56].mxu1 }
0x190c   : > { %v3481_v39 = vsel %vm1364_vm1, %v3480_v50, -inf  ;;  %v3711_v51 = vmul.f32 0.088388346, %v3705_v45  ;;  %v5107_v11 = vpop.f32.mrb[79].mxu0  ;;  %v5130_v61 = vpop.f32.mrb[57].mxu1 }
0x190d   : > { %v3482_v13 = vrot.slane %v3481_v39, 4  ;;  %v3708_v62 = vpop.f32.mrb[58].mxu1 }
0x190e   : > { %v3712_v8 = vsel %vm1364_vm1, %v3711_v51, -inf  ;;  %v5131_v6 = vpop.f32.mrb[59].mxu1 }
0x190f   : > { %v3483_v57 = vmax.f32 %v3481_v39, %v3482_v13  ;;  %v3713_v12 = vrot.slane %v3712_v8, 4 }
0x1911   : > { %v3484_v47 = vrot.slane %v3483_v57, 2  ;;  %v3714_v17 = vmax.f32 %v3712_v8, %v3713_v12 }
0x1913   : > { %v3485_v4 = vmax.f32 %v3483_v57, %v3484_v47  ;;  %v3715_v43 = vrot.slane %v3714_v17, 2  ;;  %v3820_v37 = vpop.f32.mrb[60].mxu1 }
0x1914   : > { %v3826_v29 = vmul.f32 0.088388346, %v3820_v37  ;;  %v5142_v42 = vpop.f32.mrb[61].mxu1 }
0x1915   : > { %v3486_v63 = vrot.slane %v3485_v4, 1  ;;  %v3716_v60 = vmax.f32 %v3714_v17, %v3715_v43  ;;  %v3823_v40 = vpop.f32.mrb[62].mxu1 }
0x1916   : > { %v3827_v56 = vsel %vm1364_vm1, %v3826_v29, -inf  ;;  %v5143_v18 = vpop.f32.mrb[63].mxu1 }
0x1917   : > { %v3487_v45 = vmax.f32 %v3485_v4, %v3486_v63  ;;  %v3717_v11 = vrot.slane %v3716_v60, 1  ;;  %v3828_v61 = vrot.slane %v3827_v56, 4 }
0x1919   : > { %v3488_v62 = vsub.f32 %v3480_v50, %v3487_v45  ;;  %v3718_v6 = vmax.f32 %v3716_v60, %v3717_v11  ;;  %v3829_v39 = vmax.f32 %v3827_v56, %v3828_v61 }
0x191b   : > { %v3489_v13 = vmul.f32 1.442695, %v3488_v62  ;;  %v3719_v1 = vsub.f32 %v3711_v51, %v3718_v6  ;;  %v3830_v8 = vrot.slane %v3829_v39, 2 }
0x191d   : > { %5634 = vpow2.f32 %v3489_v13  ;;  %v3720_v57 = vmul.f32 1.442695, %v3719_v1  ;;  %v3831_v12 = vmax.f32 %v3829_v39, %v3830_v8 }
0x191f   : > { %5636 = vpow2.f32 %v3720_v57  ;;  %v3832_v47 = vrot.slane %v3831_v12, 1 }
0x1921   : > { %v3833_v37 = vmax.f32 %v3831_v12, %v3832_v47 }
0x1923   : > { %v3834_v17 = vsub.f32 %v3826_v29, %v3833_v37 }
0x1925   : > { %v3835_v43 = vmul.f32 1.442695, %v3834_v17 }
0x1927   : > { %v5635_v42 = vpop.eup %5634  ;;  %5638 = vpow2.f32 %v3835_v43 }
0x1928   : > { %v3491_v4 = vsel %vm1364_vm1, %v5635_v42, 0.0 }
0x1929   : > { %v5637_v63 = vpop.eup %5636  ;;  %v3492_v40 = vrot.slane %v3491_v4, 4 }
0x192a   : > { %v3722_v50 = vsel %vm1364_vm1, %v5637_v63, 0.0 }
0x192b   : > { %v3493_v60 = vadd.f32 %v3492_v40, %v3491_v4  ;;  %v3723_v56 = vrot.slane %v3722_v50, 4 }
0x192d   : > { %v3494_v51 = vrot.slane %v3493_v60, 2  ;;  %v3724_v18 = vadd.f32 %v3723_v56, %v3722_v50 }
0x192f   : > { %v3495_v45 = vadd.f32 %v3494_v51, %v3493_v60  ;;  %v3725_v1 = vrot.slane %v3724_v18, 2 }
0x1931   : > { %v5639_v11 = vpop.eup %5638  ;;  %v3726_v61 = vadd.f32 %v3725_v1, %v3724_v18  ;;  %v3496_v62 = vrot.slane %v3495_v45, 1 }
0x1932   : > { %v3837_v29 = vsel %vm1364_vm1, %v5639_v11, 0.0 }
0x1933   : > { %v3838_v6 = vrot.slane %v3837_v29, 4  ;;  %v3497_v39 = vadd.f32 %v3496_v62, %v3495_v45  ;;  %v3727_v13 = vrot.slane %v3726_v61, 1 }
0x1935   : > { %v3839_v8 = vadd.f32 %v3838_v6, %v3837_v29  ;;  %5640 = vrcp.f32 %v3497_v39  ;;  %v3728_v57 = vadd.f32 %v3727_v13, %v3726_v61 }
0x1937   : > { %v3840_v12 = vrot.slane %v3839_v8, 2  ;;  %5642 = vrcp.f32 %v3728_v57 }
0x1939   : > { %v3841_v47 = vadd.f32 %v3840_v12, %v3839_v8 }
0x193b   : > { %v3842_v37 = vrot.slane %v3841_v47, 1 }
0x193d   : > { %v3843_v17 = vadd.f32 %v3842_v37, %v3841_v47 }
0x193f   : > { %v5641_v43 = vpop.eup %5640  ;;  %5644 = vrcp.f32 %v3843_v17 }
0x1940   : > { %v3499_v4 = vmul.f32 %v5641_v43, %v5635_v42 }
0x1941   : > { %v5643_v40 = vpop.eup %5642 }
0x1942   : > { %v3500_v50 = vadd.f32 1e-08, %v3499_v4  ;;  %v3730_v60 = vmul.f32 %v5643_v40, %v5637_v63 }
0x1944   : > { %v3503_v56 = vsel %vm1364_vm1, %v3500_v50, 0.0  ;;  %4584 = vst.msk [vmem:[%s6759_s28 + $0x8] sm:$0xf] %vm1364_vm1, %v3500_v50  ;;  %v7406_v51 = vadd.f32 1e-08, %v3730_v60 }
0x1945   : > { %3504 = vadd.xlane.f32.xlu0 %v3503_v56 }
0x1946   : > { %4588 = vst.msk [vmem:[%s6759_s28 + $0x20] sm:$0xf] %vm1364_vm1, %v7406_v51  ;;  %v3734_v18 = vsel %vm1364_vm1, %v7406_v51, 0.0 }
0x1949   : > { %v5645_v45 = vpop.eup %5644  ;;  %3735 = vadd.xlane.f32.xlu0 %v3734_v18 }
0x194a   : > { %v3845_v1 = vmul.f32 %v5645_v45, %v5639_v11  ;;  %v3554_v11 = vrot.slane %v7384_v52, 2 }
0x194c   : > { %v7413_v42 = vadd.f32 1e-08, %v3845_v1 }
0x194e   : > { %4590 = vst.msk [vmem:[%s6759_s28 + $0x2c] sm:$0xf] %vm1364_vm1, %v7413_v42 }
0x19d2   : > { %v3505_v63 = vpop.xlane.xlu0 %3504 }
0x19d3   : > { %5646 = vrcp.f32 %v3505_v63 }
0x19dd   : > { %v5647_v61 = vpop.eup %5646 }
0x19de   : > { %v3507_v62 = vmul.f32 %v5647_v61, %v3500_v50 }
0x19e0   : > { %v3508_v29 = vpack.c.bf16 %v3507_v62, %v3507_v62 }
0x19e2   : > { %5111 = vmatmul.mubr.msk.bf16.vlgmr.msra.gmra.mrb[80].mxu0 %vm1392_vm2, %v3508_v29 }
0x19e3   : > { %5115 = vmatpush3.bf16.xpose.msra.mxu0 %v6741_v34  ;;  %5116 = vmatprep.mubr.msk.bf16.mxu0 %vm6126_vm0, %v7778_v21 }
0x19e4   : > { %5120 = vmatprep.subr.bf16.mxu0 %v7778_v21 }
0x19ea   : > { %5117 = vmatmul.mubr.bf16.vlgmr.msra.gmra.mrb[84].mxu0 %v3554_v11 }
0x19eb   : > { %5121 = vmatpush3.bf16.msra.mxu0 %v6743_v20  ;;  %5122 = vmatprep.mubr.msk.bf16.mxu0 %vm6126_vm0, %v7778_v21 }
0x19ec   : > { %5132 = vmatprep.subr.bf16.mxu0 %v7778_v21 }
0x1ab5   : > { %v3546_v6 = vpop.f32.mrb[80].mxu0 }
0x1ab6   : > { %3552 = vst [vmem:[#allocation2] sm:$0xf] %v3546_v6  ;;  %v5112_v39 = vpop.f32.mrb[81].mxu0 }
0x1ab7   : > { %v3549_v13 = vpop.f32.mrb[82].mxu0 }
0x1ab8   : > { %v5113_v34 = vpop.f32.mrb[83].mxu0 }
0x1abd   : > { %v3590_v8 = vpop.f32.mrb[84].mxu0 }
0x1abe   : > { %v3596_v57 = vmul.f32 0.088388346, %v3590_v8  ;;  %v5118_v12 = vpop.f32.mrb[85].mxu0  ;;  %v3849_v8 = vsel %vm1364_vm1, %v7413_v42, 0.0 }
0x1abf   : > { %v3593_v47 = vpop.f32.mrb[86].mxu0  ;;  %v3736_v12 = vpop.xlane.xlu0 %3735 }
0x1ac0   : > { %v3597_v37 = vsel %vm1364_vm1, %v3596_v57, -inf  ;;  %v5119_v52 = vpop.f32.mrb[87].mxu0 }
0x1ac1   : > { %v3598_v17 = vrot.slane %v3597_v37, 4 }
0x1ac3   : > { %v3599_v43 = vmax.f32 %v3597_v37, %v3598_v17 }
0x1ac5   : > { %v3600_v20 = vrot.slane %v3599_v43, 2 }
0x1ac7   : > { %v3601_v4 = vmax.f32 %v3599_v43, %v3600_v20 }
0x1ac9   : > { %v3602_v40 = vrot.slane %v3601_v4, 1 }
0x1acb   : > { %v3603_v50 = vmax.f32 %v3601_v4, %v3602_v40 }
0x1acd   : > { %v3604_v60 = vsub.f32 %v3596_v57, %v3603_v50 }
0x1acf   : > { %v3605_v56 = vmul.f32 1.442695, %v3604_v60 }
0x1ad1   : > { %5648 = vpow2.f32 %v3605_v56 }
0x1adb   : > { %v5649_v18 = vpop.eup %5648 }
0x1adc   : > { %v3607_v45 = vsel %vm1364_vm1, %v5649_v18, 0.0 }
0x1add   : > { %v3608_v1 = vrot.slane %v3607_v45, 4 }
0x1adf   : > { %v3609_v63 = vadd.f32 %v3608_v1, %v3607_v45  ;;  %v5757_v1 = vld [vmem:[#allocation15 + $0x38] sm:$0xff]  }
0x1ae1   : > { %v3610_v61 = vrot.slane %v3609_v63, 2 }
0x1ae3   : > { %v3611_v62 = vadd.f32 %v3610_v61, %v3609_v63 }
0x1ae5   : > { %v3612_v29 = vrot.slane %v3611_v62, 1 }
0x1ae7   : > { %v3613_v11 = vadd.f32 %v3612_v29, %v3611_v62 }
0x1ae9   : > { %5650 = vrcp.f32 %v3613_v11 }
0x1af3   : > { %v5651_v6 = vpop.eup %5650 }
0x1af4   : > { %v3615_v39 = vmul.f32 %v5651_v6, %v5649_v18 }
0x1af6   : > { %v3616_v13 = vadd.f32 1e-08, %v3615_v39 }
0x1af8   : > { %v3619_v34 = vsel %vm1364_vm1, %v3616_v13, 0.0  ;;  %4586 = vst.msk [vmem:[%s6759_s28 + $0x14] sm:$0xf] %vm1364_vm1, %v3616_v13 }
0x1af9   : > { %3620 = vadd.xlane.f32.xlu1 %v3619_v34 }
0x1afd   : > { %3850 = vadd.xlane.f32.xlu1 %v3849_v8 }
0x1b86   : > { %v3621_v57 = vpop.xlane.xlu1 %3620 }
0x1b87   : > { %5652 = vrcp.f32 %v3621_v57 }
0x1b88   : > { %5654 = vrcp.f32 %v3736_v12 }
0x1b8a   : > { %v3851_v47 = vpop.xlane.xlu1 %3850 }
0x1b8b   : > { %5656 = vrcp.f32 %v3851_v47 }
0x1b91   : > { %v5653_v37 = vpop.eup %5652 }
0x1b92   : > { %v3623_v52 = vmul.f32 %v5653_v37, %v3616_v13  ;;  %v5655_v43 = vpop.eup %5654 }
0x1b93   : > { %v3738_v20 = vmul.f32 %v5655_v43, %v7406_v51 }
0x1b94   : > { %v3624_v17 = vpack.c.bf16 %v3623_v52, %v3623_v52 }
0x1b95   : > { %v3739_v4 = vpack.c.bf16 %v3738_v20, %v3738_v20  ;;  %v5657_v40 = vpop.eup %5656 }
0x1b96   : > { %5123 = vmatmul.mubr.msk.bf16.vlgmr.msra.gmra.mrb[88].mxu0 %vm1392_vm2, %v3624_v17  ;;  %v3853_v50 = vmul.f32 %v5657_v40, %v7413_v42 }
0x1b97   : > { %5133 = vmatpush3.bf16.msra.mxu0 %v6749_v53  ;;  %5134 = vmatprep.mubr.msk.bf16.mxu0 %vm6126_vm0, %v7778_v21 }
0x1b98   : > { %5144 = vmatprep.subr.bf16.mxu0 %v7778_v21  ;;  %v3854_v53 = vpack.c.bf16 %v3853_v50, %v3853_v50 }
0x1b9e   : > { %5135 = vmatmul.mubr.msk.bf16.vlgmr.msra.gmra.mrb[92].mxu0 %vm1392_vm2, %v3739_v4 }
0x1b9f   : > { %5145 = vmatpush3.bf16.msra.mxu0 %v6753_v59  ;;  %5146 = vmatprep.mubr.msk.bf16.mxu0 %vm6126_vm0, %v7778_v21 }
0x1ba0   : > { %5150 = vmatprep.subr.bf16.mxu0 %v7778_v21 }
0x1ba6   : > { %5147 = vmatmul.mubr.msk.bf16.vlgmr.msra.gmra.mrb[96].mxu0 %vm1392_vm2, %v3854_v53 }
0x1ba7   : > { %5151 = vmatpush3.bf16.msra.mxu0 %v7173_v19  ;;  %5166 = vmatprep.mubr.msk.bf16.mxu0 %vm6126_vm0, %v7778_v21 }
0x1ba8   : > { %5152 = vmatprep.subr.bf16.mxu0 %v7778_v21 }
0x1bab   : > { %5153 = vmatpush3.bf16.msra.mxu0 %v7179_v26 }
0x1bac   : > { %5154 = vmatprep.subr.bf16.mxu0 %v7778_v21 }
0x1baf   : > { %5155 = vmatpush3.bf16.msra.mxu0 %v7183_v44 }
0x1bb0   : > { %5156 = vmatprep.subr.bf16.mxu0 %v7778_v21 }
0x1bb3   : > { %5157 = vmatpush3.bf16.msra.mxu0 %v7187_v14 }
0x1bb4   : > { %5158 = vmatprep.subr.bf16.mxu0 %v7778_v21 }
0x1bb7   : > { %5159 = vmatpush3.bf16.msra.mxu0 %v7191_v41 }
0x1bb8   : > { %5160 = vmatprep.subr.bf16.mxu0 %v7778_v21 }
0x1bbb   : > { %5161 = vmatpush3.bf16.msra.mxu0 %v7195_v33 }
0x1bbc   : > { %5162 = vmatprep.subr.bf16.mxu0 %v7778_v21 }
0x1bbf   : > { %5163 = vmatpush3.bf16.msra.mxu0 %v7199_v7 }
0x1bc0   : > { %5164 = vmatprep.subr.bf16.mxu0 %v7778_v21 }
0x1bc3   : > { %5165 = vmatpush3.bf16.msra.mxu0 %v7203_v5 }
0x1bc4   : > { %5170 = vmatprep.subr.bf16.mxu0 %v7778_v21 }
0x1c69   : > { %v3662_v59 = vpop.f32.mrb[88].mxu0 }
0x1c6a   : > { %3668 = vst [vmem:[#allocation2 + $0x4] sm:$0xf] %v3662_v59  ;;  %v5124_v19 = vpop.f32.mrb[89].mxu0 }
0x1c6b   : > { %v3665_v26 = vpop.f32.mrb[90].mxu0 }
0x1c6c   : > { %v5125_v44 = vpop.f32.mrb[91].mxu0 }
0x1c71   : > { %v3777_v14 = vpop.f32.mrb[92].mxu0  ;;  %v3899_v18 = vld [vmem:[#allocation2] sm:$0xff] }
0x1c72   : > { %3783 = vst [vmem:[#allocation2 + $0x8] sm:$0xf] %v3777_v14  ;;  %v5136_v41 = vpop.f32.mrb[93].mxu0 }
0x1c73   : > { %v3780_v51 = vpop.f32.mrb[94].mxu0 }
0x1c74   : > { %v5137_v33 = vpop.f32.mrb[95].mxu0 }
0x1c79   : > { %v3892_v42 = vpop.f32.mrb[96].mxu0 }
0x1c7a   : > { %3898 = vst [vmem:[#allocation2 + $0xc] sm:$0xf] %v3892_v42  ;;  %v5148_v60 = vpop.f32.mrb[97].mxu0 }
0x1c7b   : > { %v3895_v7 = vpop.f32.mrb[98].mxu0  ;;  %v7796_v60 = vld [vmem:[#allocation33_spill] sm:$0xff] }
0x1c7c   : > { %v5149_v56 = vpop.f32.mrb[99].mxu0 }
0x1c81   : > { %v3900_v45 = vld [vmem:[#allocation2 + $0x8] sm:$0xff] }
0x1c82   : > { %v3901_v5 = vpack.c.bf16 %v3900_v45, %v3899_v18 }
0x1c84   : > { %3935 = vmatmul.mubr.bf16.vlgmr.msra.gmra.mrb[64].mxu1 %v3901_v5  ;;  %5167 = vmatmul.mubr.bf16.vlgmr.msra.gmra.mrb[100].mxu0 %v3901_v5 }
0x1c85   : > { %3988 = vmatpush1.bf16.msra.mxu1 %v7207_v28  ;;  %5171 = vmatpush3.bf16.msra.mxu0 %v7210_v2  ;;  %v5739_v28 = vld [vmem:[#allocation12 + $0xac] ss:$12 sps:$4 sm:$0xff]   ;;  %v5740_v2 = vld [vmem:[#allocation12 + $0xa8] ss:$12 sps:$4 sm:$0xff]  }
0x1c86   : > { %3989 = vmatprep.subr.bf16.mxu1 %v7213_v30  ;;  %5172 = vmatprep.subr.bf16.mxu0 %v7778_v21  ;;  %v5741_v30 = vld [vmem:[#allocation12 + $0xb0] ss:$12 sps:$4 sm:$0xff]  }
0x1c87   : > { %4019 = vmatprep.mubr.bf16.mxu1 %v7779_v23  ;;  %5186 = vmatprep.mubr.msk.bf16.mxu0 %vm6126_vm0, %v7778_v21  ;;  %v5738_v23 = vld [vmem:[#allocation12 + $0x98] ss:$12 sps:$4 sm:$0xff]  }
0x1c89   : > { %3990 = vmatpush1.bf16.msra.mxu1 %v7220_v32  ;;  %5173 = vmatpush3.bf16.msra.mxu0 %v7223_v35  ;;  %v3986_v32 = vpack.c.bf16 %v7370_v22, %v7366_v31  ;;  %v5742_v35 = vld [vmem:[#allocation14] sm:$0xff]  }
0x1c8a   : > { %3991 = vmatprep.subr.bf16.mxu1 %v7226_v36  ;;  %5174 = vmatprep.subr.bf16.mxu0 %v7778_v21  ;;  %v5743_v36 = vld [vmem:[#allocation15] sm:$0xff]  }
0x1c8d   : > { %3992 = vmatpush1.bf16.msra.mxu1 %v7230_v38  ;;  %5175 = vmatpush3.bf16.msra.mxu0 %v7233_v49  ;;  %v5744_v38 = vld [vmem:[#allocation14 + $0x8] sm:$0xff]  }
0x1c8e   : > { %3993 = vmatprep.subr.bf16.mxu1 %v7236_v27  ;;  %5176 = vmatprep.subr.bf16.mxu0 %v7778_v21  ;;  %v5745_v49 = vld [vmem:[#allocation15 + $0x8] sm:$0xff]   ;;  %v5746_v27 = vld [vmem:[#allocation14 + $0x10] sm:$0xff]  }
0x1c91   : > { %3994 = vmatpush1.bf16.msra.mxu1 %v7240_v46  ;;  %5177 = vmatpush3.bf16.msra.mxu0 %v7243_v24  ;;  %v5747_v46 = vld [vmem:[#allocation15 + $0x10] sm:$0xff]   ;;  %v5748_v24 = vld [vmem:[#allocation14 + $0x18] sm:$0xff]  }
0x1c92   : > { %3995 = vmatprep.subr.bf16.mxu1 %v7246_v54  ;;  %5178 = vmatprep.subr.bf16.mxu0 %v7778_v21  ;;  %v5749_v54 = vld [vmem:[#allocation15 + $0x18] sm:$0xff]  }
0x1c95   : > { %3996 = vmatpush1.bf16.msra.mxu1 %v7250_v3  ;;  %5179 = vmatpush3.bf16.msra.mxu0 %v7253_v16  ;;  %v5750_v3 = vld [vmem:[#allocation14 + $0x20] sm:$0xff]  }
0x1c96   : > { %3997 = vmatprep.subr.bf16.mxu1 %v7256_v10  ;;  %5180 = vmatprep.subr.bf16.mxu0 %v7778_v21  ;;  %v5751_v16 = vld [vmem:[#allocation15 + $0x20] sm:$0xff]   ;;  %v5752_v10 = vld [vmem:[#allocation14 + $0x28] sm:$0xff]  }
0x1c99   : > { %3998 = vmatpush1.bf16.msra.mxu1 %v7260_v9  ;;  %5181 = vmatpush3.bf16.msra.mxu0 %v7263_v48  ;;  %v5753_v9 = vld [vmem:[#allocation15 + $0x28] sm:$0xff]   ;;  %v5754_v48 = vld [vmem:[#allocation14 + $0x30] sm:$0xff]  }
0x1c9a   : > { %3999 = vmatprep.subr.bf16.mxu1 %v7266_v0  ;;  %5182 = vmatprep.subr.bf16.mxu0 %v7778_v21  ;;  %v5755_v0 = vld [vmem:[#allocation15 + $0x30] sm:$0xff]  }
0x1c9d   : > { %4000 = vmatpush1.bf16.msra.mxu1 %v7270_v25  ;;  %5183 = vmatpush3.bf16.msra.mxu0 %v5738_v23  ;;  %v5756_v25 = vld [vmem:[#allocation14 + $0x38] sm:$0xff]  }
0x1c9e   : > { %4001 = vmatprep.subr.bf16.mxu1 %v5739_v28  ;;  %5184 = vmatprep.subr.bf16.mxu0 %v7778_v21 }
0x1ca1   : > { %4002 = vmatpush1.bf16.msra.mxu1 %v5740_v2  ;;  %5185 = vmatpush3.bf16.msra.mxu0 %v5741_v30 }
0x1ca2   : > { %5190 = vmatprep.subr.bf16.mxu1 %v7778_v21  ;;  %5210 = vmatprep.subr.bf16.mxu0 %v7778_v21 }
0x1ca4   : > { %4020 = vmatmul.mubr.bf16.vlgmr.msra.gmra.mrb[64].mxu1 %v3986_v32  ;;  %5187 = vmatmul.mubr.bf16.vlgmr.msra.gmra.mrb[104].mxu0 %v3986_v32 }
0x1ca5   : > { %5191 = vmatpush3.bf16.msra.mxu1 %v5742_v35  ;;  %5206 = vmatprep.mubr.msk.bf16.mxu1 %vm6126_vm0, %v7778_v21 }
0x1ca6   : > { %5192 = vmatprep.subr.bf16.mxu1 %v7778_v21  ;;  %5211 = vmatpush3.bf16.msra.mxu0 %v5743_v36 }
0x1ca7   : > { %5212 = vmatprep.subr.bf16.mxu0 %v7778_v21  ;;  %5226 = vmatprep.mubr.msk.bf16.mxu0 %vm6126_vm0, %v7778_v21 }
0x1ca9   : > { %5193 = vmatpush3.bf16.msra.mxu1 %v5744_v38 }
0x1caa   : > { %5194 = vmatprep.subr.bf16.mxu1 %v7778_v21  ;;  %5213 = vmatpush3.bf16.msra.mxu0 %v5745_v49 }
0x1cab   : > { %5214 = vmatprep.subr.bf16.mxu0 %v7778_v21 }
0x1cad   : > { %5195 = vmatpush3.bf16.msra.mxu1 %v5746_v27 }
0x1cae   : > { %5196 = vmatprep.subr.bf16.mxu1 %v7778_v21  ;;  %5215 = vmatpush3.bf16.msra.mxu0 %v5747_v46 }
0x1caf   : > { %5216 = vmatprep.subr.bf16.mxu0 %v7778_v21 }
0x1cb1   : > { %5197 = vmatpush3.bf16.msra.mxu1 %v5748_v24 }
0x1cb2   : > { %5198 = vmatprep.subr.bf16.mxu1 %v7778_v21  ;;  %5217 = vmatpush3.bf16.msra.mxu0 %v5749_v54 }
0x1cb3   : > { %5218 = vmatprep.subr.bf16.mxu0 %v7778_v21 }
0x1cb5   : > { %5199 = vmatpush3.bf16.msra.mxu1 %v5750_v3 }
0x1cb6   : > { %5200 = vmatprep.subr.bf16.mxu1 %v7778_v21  ;;  %5219 = vmatpush3.bf16.msra.mxu0 %v5751_v16 }
0x1cb7   : > { %5220 = vmatprep.subr.bf16.mxu0 %v7778_v21 }
0x1cb9   : > { %5201 = vmatpush3.bf16.msra.mxu1 %v5752_v10 }
0x1cba   : > { %5202 = vmatprep.subr.bf16.mxu1 %v7778_v21  ;;  %5221 = vmatpush3.bf16.msra.mxu0 %v5753_v9 }
0x1cbb   : > { %5222 = vmatprep.subr.bf16.mxu0 %v7778_v21 }
0x1cbd   : > { %5203 = vmatpush3.bf16.msra.mxu1 %v5754_v48 }
0x1cbe   : > { %5204 = vmatprep.subr.bf16.mxu1 %v7778_v21  ;;  %5223 = vmatpush3.bf16.msra.mxu0 %v5755_v0 }
0x1cbf   : > { %5224 = vmatprep.subr.bf16.mxu0 %v7778_v21 }
0x1cc1   : > { %5205 = vmatpush3.bf16.msra.mxu1 %v5756_v25 }
0x1cc2   : > { %5225 = vmatpush3.bf16.msra.mxu0 %v5757_v1 }
0x1d57   : > { %v3979_v63 = vpop.f32.mrb[100].mxu0 }
0x1d58   : > { %v5168_v61 = vpop.f32.mrb[101].mxu0  ;;  %v3980_v7 = vadd.f32 %v3979_v63, %v7796_v60 }
0x1d59   : > { %v3982_v62 = vpop.f32.mrb[102].mxu0 }
0x1d5a   : > { %v5169_v29 = vpop.f32.mrb[103].mxu0  ;;  %v3983_v5 = vadd.f32 %v3982_v62, %v7796_v60 }
0x1d77   : > { %v4021_v11 = vpop.f32.mrb[64].mxu1  ;;  %v4064_v6 = vpop.f32.mrb[104].mxu0 }
0x1d78   : > { %v5247_v39 = vadd.f32 %v6908_v15, %v4021_v11  ;;  %v4023_v13 = vpop.f32.mrb[65].mxu1  ;;  %v5188_v34 = vpop.f32.mrb[105].mxu0  ;;  %v4065_v51 = vadd.f32 %v4064_v6, %v7781_v55 }
0x1d79   : > { %v5249_v8 = vadd.f32 %v7780_v58, %v4023_v13  ;;  %v4025_v57 = vpop.f32.mrb[66].mxu1  ;;  %v4067_v12 = vpop.f32.mrb[106].mxu0 }
0x1d7a   : > { %v4073_v47 = vsub.f32 0.0, %v5247_v39  ;;  %v5251_v21 = vadd.f32 %v6908_v15, %v4025_v57  ;;  %v4027_v37 = vpop.f32.mrb[67].mxu1  ;;  %v5189_v52 = vpop.f32.mrb[107].mxu0  ;;  %v4068_v18 = vadd.f32 %v4067_v12, %v7781_v55 }
0x1d7b   : > { %v5253_v17 = vadd.f32 %v7780_v58, %v4027_v37  ;;  %v4085_v4 = vsub.f32 0.0, %v5249_v8  ;;  %v5758_v8 = vld [vmem:[%s7762_s16] ss:$0 sm:$0xff] }
0x1d7c   : > { %v4075_v43 = vmul.f32 1.442695, %v4073_v47  ;;  %v4074_v20 = vsub.f32 0.0, %v5251_v21  ;;  %v5759_v47 = vld [vmem:[%s7764_s6] ss:$0 sm:$0xff] }
0x1d7d   : > { %v4086_v50 = vsub.f32 0.0, %v5253_v17  ;;  %v4087_v53 = vmul.f32 1.442695, %v4085_v4 }
0x1d7e   : > { %5658 = vpow2.f32 %v4075_v43  ;;  %v4077_v40 = vmul.f32 1.442695, %v4074_v20  ;;  %v5760_v43 = vld [vmem:[%s7774_s5] ss:$0 sm:$0xff] }
0x1d7f   : > { %v4089_v59 = vmul.f32 1.442695, %v4086_v50 }
0x1d80   : > { %5660 = vpow2.f32 %v4077_v40 }
0x1d81   : > { %5662 = vpow2.f32 %v4087_v53 }
0x1d82   : > { %5664 = vpow2.f32 %v4089_v59 }
0x1d88   : > { %v5659_v19 = vpop.eup %5658 }
0x1d89   : > { %v4079_v26 = vadd.f32 1.0, %v5659_v19 }
0x1d8a   : > { %v5661_v44 = vpop.eup %5660 }
0x1d8b   : > { %5666 = vrcp.f32 %v4079_v26  ;;  %v4080_v15 = vadd.f32 1.0, %v5661_v44  ;;  %v5663_v14 = vpop.eup %5662 }
0x1d8c   : > { %v5665_v41 = vpop.eup %5664  ;;  %v4091_v58 = vadd.f32 1.0, %v5663_v14 }
0x1d8d   : > { %5668 = vrcp.f32 %v4080_v15  ;;  %v4092_v33 = vadd.f32 1.0, %v5665_v41 }
0x1d8e   : > { %5670 = vrcp.f32 %v4091_v58 }
0x1d8f   : > { %5672 = vrcp.f32 %v4092_v33 }
0x1d95   : > { %v5667_v42 = vpop.eup %5666 }
0x1d96   : > { %v4095_v56 = vmul.f32 %v5667_v42, %v4065_v51 }
0x1d97   : > { %v5669_v45 = vpop.eup %5668 }
0x1d98   : > { %v4097_v23 = vadd.f32 %v4095_v56, %v3980_v7  ;;  %v4096_v28 = vmul.f32 %v5669_v45, %v4068_v18  ;;  %v5671_v30 = vpop.eup %5670 }
0x1d99   : > { %v5673_v32 = vpop.eup %5672  ;;  %v4101_v35 = vsub.f32 1.0, %v5671_v30  ;;  %v4105_v49 = vmul.f32 %v5671_v30, %v7366_v31 }
0x1d9a   : > { %5674 = vtanh.f32 %v4097_v23  ;;  %v4098_v2 = vadd.f32 %v4096_v28, %v3983_v5  ;;  %v4102_v27 = vsub.f32 1.0, %v5673_v32  ;;  %v4106_v54 = vmul.f32 %v5673_v32, %v7370_v22 }
0x1d9c   : > { %5676 = vtanh.f32 %v4098_v2 }
0x1da4   : > { %v5675_v36 = vpop.eup %5674 }
0x1da5   : > { %v4103_v38 = vmul.f32 %v5675_v36, %v4101_v35 }
0x1da6   : > { %v5677_v46 = vpop.eup %5676 }
0x1da7   : > { %v7526_v24 = vadd.f32 %v4105_v49, %v4103_v38  ;;  %v4104_v55 = vmul.f32 %v5677_v46, %v4102_v27 }
0x1da9   : > { %4109 = vadd.xlane.f32.xlu0 %v7526_v24  ;;  %v7530_v3 = vadd.f32 %v4106_v54, %v4104_v55 }
0x1dab   : > { %4111 = vadd.xlane.f32.xlu1 %v7530_v3 }
0x1e36   : > { %v4110_v16 = vpop.xlane.xlu0 %4109 }
0x1e37   : > { %v4113_v10 = vmul.f32 0.0078125, %v4110_v16 }
0x1e38   : > { %v4112_v9 = vpop.xlane.xlu1 %4111 }
0x1e39   : > { %v4115_v48 = vsub.f32 %v7526_v24, %v4113_v10  ;;  %v4114_v0 = vmul.f32 0.0078125, %v4112_v9 }
0x1e3b   : > { %v4116_v31 = vsub.f32 %v7530_v3, %v4114_v0  ;;  %v4117_v25 = vmul.f32 %v4115_v48, %v4115_v48 }
0x1e3d   : > { %4119 = vadd.xlane.f32.xlu0 %v4117_v25  ;;  %v4118_v1 = vmul.f32 %v4116_v31, %v4116_v31 }
0x1e3f   : > { %4121 = vadd.xlane.f32.xlu1 %v4118_v1 }
0x1eca   : > { %v4120_v63 = vpop.xlane.xlu0 %4119 }
0x1ecb   : > { %v4123_v22 = vmul.f32 0.0078125, %v4120_v63 }
0x1ecc   : > { %v4122_v61 = vpop.xlane.xlu1 %4121 }
0x1ecd   : > { %v4125_v62 = vadd.f32 1e-05, %v4123_v22  ;;  %v4124_v29 = vmul.f32 0.0078125, %v4122_v61 }
0x1ecf   : > { %5678 = vrsqrt.f32 %v4125_v62  ;;  %v4126_v11 = vadd.f32 1e-05, %v4124_v29 }
0x1ed1   : > { %5680 = vrsqrt.f32 %v4126_v11 }
0x1ed9   : > { %v5679_v6 = vpop.eup %5678 }
0x1eda   : > { %v4129_v39 = vmul.f32 %v5679_v6, %v4115_v48 }
0x1edb   : > { %v5681_v13 = vpop.eup %5680 }
0x1edc   : > { %v4130_v34 = vmul.f32 %v5681_v13, %v4116_v31  ;;  %v4131_v57 = vmul.f32 %v5758_v8, %v4129_v39 }
0x1ede   : > { %v4132_v12 = vmul.f32 %v5758_v8, %v4130_v34  ;;  %v4133_v21 = vadd.f32 %v5759_v47, %v4131_v57 }
0x1ee0   : > { %v4134_v37 = vadd.f32 %v5759_v47, %v4132_v12 }
0x1ee2   : > { %v4135_v52 = vpack.c.bf16 %v4134_v37, %v4133_v21 }
0x1ee4   : > { %5207 = vmatmul.mubr.bf16.vlgmr.msra.gmra.mrb[68].mxu1 %v4135_v52 }
0x1fb7   : > { %v4170_v17 = vpop.f32.mrb[68].mxu1 }
0x1fb8   : > { %v4171_v20 = vadd.f32 %v5760_v43, %v4170_v17  ;;  %v5208_v4 = vpop.f32.mrb[69].mxu1 }
0x1fb9   : > { %v4173_v40 = vpop.f32.mrb[70].mxu1 }
0x1fba   : > { %v4174_v50 = vadd.f32 %v5760_v43, %v4173_v40  ;;  %v5209_v53 = vpop.f32.mrb[71].mxu1  ;;  %v4177_v59 = vmax.f32 %v4171_v20, 0.0 }
0x1fbc   : > { %v4178_v19 = vmax.f32 %v4174_v50, 0.0 }
0x1fbe   : > { %v4179_v26 = vpack.c.bf16 %v4178_v19, %v4177_v59 }
0x1fc0   : > { %5227 = vmatmul.mubr.bf16.vlgmr.msra.gmra.mrb[108].mxu0 %v4179_v26 }
0x1fc1   : > { %6003 = shalt.err (!%p6000_p1)
}
0x1fc2   : > { %s6004_s28 = scalar_lea.hbm %s7548_s10, 768  ;;  %s6008_s29 = scalar_lea.hbm %s7797_s26, 1536 }
0x1fc3   : > { %p6005_p10 = scmp.ne.s32.totalorder %s7548_s10, %s6004_s28  ;;  %p6009_p12 = scmp.lt.u32.totalorder %s7548_s10, %s7797_s26 }
0x1fc4   : > { %p6010_p6 = scmp.lt.u32.totalorder %s6008_s29, %s6004_s28  ;;  %p6012_p7 = scmp.lt.u32.totalorder %s6004_s28, %s7548_s10 }
0x1fc5   : > { %p6006_p11 = pnand %p6005_p10, %p7798_p9 }
0x1fc6   : > { %p6011_p13 = por %p6010_p6, %p6009_p12 }
0x1fc7   : > { %p6007_p3 = pneg %p6006_p11 }
0x1fc8   : > { %p6013_p0 = por %p6012_p7, %p6011_p13 }
0x1fca   : > { %p6014_p2 = pnand %p6013_p0, %p6007_p3 }
0x1fcc   : > { %6017 = shalt.err (!%p6014_p2)
}
0x1fcd   : > { %s6128_s22 = smov 64   ;;  %s6129_s8 = smov 4   ;;  %v5761_v58 = vld [vmem:[%s7776_s4] ss:$0 sm:$0xff] }
0x1fce   : > { %5297 = dma.vmem_to_hbm [thread:$0]  (%p7798_p9), %s7551_s7, 768, %s7548_s10, %s4233_s18, %s6128_s22, %s6128_s22, %s6129_s8  }
0x1fcf   : > { %s751_s24 = scalar_lea.vmem [#allocation17], %s4465_s23  ;;  %s4602_s28 = sshll.u32 %s6254_s2, 8 }
0x1fd0   : > { %s4246_s19 = sshll.u32 %s751_s24, 4  ;;  %s7799_s7 = sld [smem:[#allocation60_spill]]  ;;  %s7584_s19 = int_to_ptr.vmem [resolvable:$true] %s4246_s19 }
0x1fd1   : > { %s4228_s2 = scalar_lea.sflag [#allocation5], %s6556_s20  ;;  %s6018_s27 = scalar_lea.vmem %s7584_s19, 256 }
0x1fd2   : > { %p6019_p5 = scmp.ne.s32.totalorder %s7584_s19, %s6018_s27  ;;  %s6130_s25 = smov [#allocation17]  }
0x1fd3   : > { %s6022_s22 = sshll.u32 %s6130_s25, 4  ;;  %s6023_s22 = int_to_ptr.vmem [resolvable:$false] %s6022_s22 }
0x1fd4   : > { %p6020_p8 = pnand %p6019_p5, %p7798_p9  ;;  %s6024_s8 = scalar_lea.vmem %s6023_s22, 512 }
0x1fd5   : > { %p6025_p1 = scmp.lt.s32.totalorder %s7584_s19, %s6023_s22  ;;  %p6026_p10 = scmp.lt.s32.totalorder %s6024_s8, %s6018_s27 }
0x1fd6   : > { %s7590_s18 = scalar_lea.hbm %s7799_s7, %s4602_s28  ;;  %p6021_p4 = pneg %p6020_p8 }
0x1fd7   : > { %p6027_p11 = por %p6026_p10, %p6025_p1 }
0x1fd9   : > { %p6028_p3 = pnand %p6027_p11, %p6021_p4 }
0x2093   : > { %v4214_v44 = vpop.f32.mrb[108].mxu0 }
0x2094   : > { %v4221_v15 = vadd.f32 %v4214_v44, %v7526_v24  ;;  %v5228_v14 = vpop.f32.mrb[109].mxu0 }
0x2095   : > { %v4217_v41 = vpop.f32.mrb[110].mxu0 }
0x2096   : > { %v4223_v51 = vadd.f32 %v5761_v58, %v4221_v15  ;;  %v4222_v33 = vadd.f32 %v4217_v41, %v7530_v3  ;;  %v5229_v42 = vpop.f32.mrb[111].mxu0 }
0x2098   : > { %4225 = vst [vmem:[%s751_s24] sm:$0xff] %v4223_v51  ;;  %v4224_v60 = vadd.f32 %v5761_v58, %v4222_v33 }
0x209a   : > { %4226 = vst [vmem:[%s751_s24 + $0x8] sm:$0xff] %v4224_v60 }
0x209b   : > { %6031 = shalt.err (!%p6028_p3)
}
0x209c   : > { %s6032_s24 = scalar_lea.hbm %s7590_s18, 256  ;;  %s6036_s29 = scalar_lea.hbm %s7799_s7, 512 }
0x209d   : > { %p6033_p12 = scmp.ne.s32.totalorder %s7590_s18, %s6032_s24  ;;  %p6037_p7 = scmp.lt.u32.totalorder %s7590_s18, %s7799_s7 }
0x209e   : > { %p6038_p0 = scmp.lt.u32.totalorder %s6036_s29, %s6032_s24  ;;  %p6040_p5 = scmp.lt.u32.totalorder %s6032_s24, %s7590_s18 }
0x209f   : > { %p6034_p6 = pnand %p6033_p12, %p7798_p9 }
0x20a0   : > { %p6039_p2 = por %p6038_p0, %p6037_p7 }
0x20a1   : > { %p6035_p13 = pneg %p6034_p6 }
0x20a2   : > { %p6041_p8 = por %p6040_p5, %p6039_p2 }
0x20a4   : > { %p6042_p4 = pnand %p6041_p8, %p6035_p13 }
0x20a6   : > { %6045 = shalt.err (!%p6042_p4)
}
0x20a7   : > { %s6131_s27 = smov 128   ;;  %s6132_s25 = smov 8  }
0x20a8   : > { %5296 = dma.vmem_to_hbm [thread:$0]  (%p7798_p9), %s7584_s19, 256, %s7590_s18, %s4228_s2, %s6131_s27, %s6131_s27, %s6132_s25  }
0x20a9 PF: > { %s4278_s22 = sand.u32 1, %s6096_s0   ;;  %p7800_p1 = scmp.ne.s32.totalorder %s7740_s17, 0 }
0x20aa   : > { %p7801_p10 = scmp.ge.s32.totalorder %s6108_s21, 2  ;;  %s4279_s8 = scalar_lea.sflag [#allocation5], %s4278_s22 }
0x20ac   : > { %p5327_p11 = pnand %p7801_p10, %p7800_p1 }
0x20ae   : > { %6087 = dma.done.wait (!%p5327_p11), %s4279_s8, 256  }
0x20af   : > { %6089 = vsyncadd (!%p5327_p11), %s4279_s8, 4294967040  ;;  %s4288_s24 = scalar_lea.sflag [#allocation19], %s4278_s22 }
0x20b0   : > { %6091 = dma.done.wait (!%p5327_p11), %s4288_s24, 768  }
0x20b1   : > { %6093 = vsyncadd (!%p5327_p11), %s4288_s24, 4294966528  ;;  %s7802_s28 = sld [smem:[#allocation28_spill]]  ;;  %s7803_s20 = sld [smem:[#allocation29_spill]] }
0x20b2   : > { %p42_p9 = scmp.ge.s32.totalorder %s6428_s3, 4   ;;  %s7804_s0 = smov %s6100_s30 }
0x20b3   : > { %s7806_s21 = smov %s6428_s3 }
0x20b4   :  { %44 = sbr.rel (!%p42_p9) target bundleno = 29 (0x1d), region = 202 }
0x20b7   : > { %s7805_s30 = smov %s7802_s28 }
0x20bb   :  { %4293 = vsyncpa [#allocation4], 1 }
0x20bc   :  { %4295 = vsyncpa [#allocation4 + $0x1], 1 }
0x20bd   :  { %4296 = vsyncpa [#allocation7], 1 }
0x20be   :  { %4298 = vsyncpa [#allocation7 + $0x1], 1 }
0x20bf   :  { %4299 = vsyncpa [#allocation10], 1 }
0x20c0   :  { %4300 = vsyncpa [#allocation13], 1 }
0x20c1   :  { %4301 = vsyncpa [#allocation16], 1 }
0x20c2   :  { %4302 = vsyncpa [#allocation5], 1 }
0x20c3   :  { %4304 = vsyncpa [#allocation5 + $0x1], 1 }
0x20c4   :  { %4305 = vsyncpa [#allocation19], 1 }
0x20c5   :  { %4307 = vsyncpa [#allocation19 + $0x1], 1 }

</bundles_post_ra>
